<compile_context>
chip_gen: v5e
topology: v5e:2x2
jax: 0.10.0
libtpu: 0.0.40
codegen_flags: <defaults>
</compile_context>

<pallas_src>
import functools

import numpy as np
import jax
import jax.numpy as jnp
from jax import lax
from jax.experimental import pallas as pl
from jax.experimental.pallas import tpu as pltpu

PAD_ROWS = 8                      # slack rows so shifted tap slices never OOB
_VMEM_LIMIT = 32 * 1024 * 1024    # safe on v5e/v6e (128 MiB) and v7x (64 MiB)


# ----------------------------------------------------------------------------
# Pallas kernels
# ----------------------------------------------------------------------------
def _conv3x3_relu_kernel(x_ref, w_ref, b_ref, o_ref, *, W, L, pad_out):
    """Fused im2col + 3x3 VALID conv + bias + ReLU for one image.

    x_ref: (R_in, Cin) bf16, image flattened row-major on an (Hg, W) grid
           (columns beyond the valid width / pad rows hold junk / zeros).
    w_ref: (9, Cin, Cout) bf16, taps ordered t = dy*3+dx.
    o_ref: (L+pad_out, Cout) bf16, conv output on the same W-wide grid.
    Tap (dy,dx) is the contiguous row slice x[dy*W+dx : dy*W+dx+L] -> one MXU
    matmul; 9 taps accumulate in an f32 register accumulator.
    """
    cout = o_ref.shape[-1]

    def tap(t):
        dy, dx = divmod(t, 3)
        a = x_ref[pl.ds(dy * W + dx, L), :]
        return jnp.dot(a, w_ref[t], preferred_element_type=jnp.float32)

    acc = tap(0)
    for t in range(1, 9):
        acc = acc + tap(t)
    acc = jnp.maximum(acc + b_ref[...], 0.0)
    o_ref[pl.ds(0, L), :] = acc.astype(o_ref.dtype)
    if pad_out:
        o_ref[pl.ds(L, pad_out), :] = jnp.zeros((pad_out, cout), o_ref.dtype)


def _conv3x3_relu_pool_kernel(x_ref, w_ref, b_ref, sel_ref, o_ref, *,
                              W, L, npool, pad_out):
    """Same as above plus a fused 2x2 max-pool epilogue.

    sel_ref: (4, npool, L) bf16 one-hot selection matrices.  sel[s] @ acc picks
    the conv value at pool offset (s//2, s%2) for every pooled pixel; the pool
    is the elementwise max of four tiny MXU matmuls and lands directly in the
    next layer's compact row-major (h, w) layout -- zero extra HBM traffic.
    """
    cout = o_ref.shape[-1]

    def tap(t):
        dy, dx = divmod(t, 3)
        a = x_ref[pl.ds(dy * W + dx, L), :]
        return jnp.dot(a, w_ref[t], preferred_element_type=jnp.float32)

    acc = tap(0)
    for t in range(1, 9):
        acc = acc + tap(t)
    acc = jnp.maximum(acc + b_ref[...], 0.0).astype(jnp.bfloat16)

    pooled = jnp.dot(sel_ref[0], acc, preferred_element_type=jnp.float32)
    for s in range(1, 4):
        pooled = jnp.maximum(
            pooled, jnp.dot(sel_ref[s], acc, preferred_element_type=jnp.float32))
    o_ref[pl.ds(0, npool), :] = pooled.astype(o_ref.dtype)
    if pad_out:
        o_ref[pl.ds(npool, pad_out), :] = jnp.zeros((pad_out, cout), o_ref.dtype)


def _mlp_head_kernel(x_ref, w1_ref, b1_ref, w2_ref, b2_ref, o_ref):
    """Fused fc1 + ReLU + fc2; both weight matrices are VMEM-resident."""
    h = jnp.dot(x_ref[...], w1_ref[...], preferred_element_type=jnp.float32)
    h = jnp.maximum(h + b1_ref[...], 0.0).astype(jnp.bfloat16)
    out = jnp.dot(h, w2_ref[...], preferred_element_type=jnp.float32)
    o_ref[...] = out + b2_ref[...]


# ----------------------------------------------------------------------------
# Layer wrappers (pallas_call plumbing)
# ----------------------------------------------------------------------------
def _pool_selectors(ph, pw, W, L):
    """One-hot (4, ph*pw, L) matrices selecting the 2x2 pooling taps."""
    sel = np.zeros((4, ph * pw, L), np.float32)
    for s in range(4):
        a, b = divmod(s, 2)
        for py in range(ph):
            for px in range(pw):
                sel[s, py * pw + px, (2 * py + a) * W + (2 * px + b)] = 1.0
    return jnp.asarray(sel, jnp.bfloat16)


def conv3x3_relu(x, w9, b, *, Hg, Wg, Wv, pool, pad_out):
    """One fused conv(+pool) layer over a batch of flattened images.

    x : (N, R_in, Cin) bf16, rows = (Hg, Wg) grid row-major + PAD_ROWS slack,
        valid columns are 0..Wv-1.  Returns (out, Hg', Wg', Wv').
    """
    N, R_in, Cin = x.shape
    Cout = w9.shape[-1]
    OHg, OWv = Hg - 2, Wv - 2
    L = OHg * Wg
    assert R_in >= L + 2 * Wg + 2, "input needs >= 2 rows of tap slack"
    b2d = b.reshape(1, Cout).astype(jnp.float32)

    comp = pltpu.CompilerParams(dimension_semantics=("parallel",),
                                vmem_limit_bytes=_VMEM_LIMIT)
    x_spec = pl.BlockSpec((None, R_in, Cin), lambda n: (n, 0, 0))
    w_spec = pl.BlockSpec((9, Cin, Cout), lambda n: (0, 0, 0))
    b_spec = pl.BlockSpec((1, Cout), lambda n: (0, 0))

    if pool:
        PH, PW = OHg // 2, OWv // 2          # floor, matches MaxPool2d(2)
        npool = PH * PW
        R_out = npool + pad_out
        sel = _pool_selectors(PH, PW, Wg, L)
        out = pl.pallas_call(
            functools.partial(_conv3x3_relu_pool_kernel, W=Wg, L=L,
                              npool=npool, pad_out=pad_out),
            out_shape=jax.ShapeDtypeStruct((N, R_out, Cout), jnp.bfloat16),
            grid=(N,),
            in_specs=[x_spec, w_spec, b_spec,
                      pl.BlockSpec((4, npool, L), lambda n: (0, 0, 0))],
            out_specs=pl.BlockSpec((None, R_out, Cout), lambda n: (n, 0, 0)),
            compiler_params=comp,
        )(x, w9, b2d, sel)
        return out, PH, PW, PW

    R_out = L + pad_out
    out = pl.pallas_call(
        functools.partial(_conv3x3_relu_kernel, W=Wg, L=L, pad_out=pad_out),
        out_shape=jax.ShapeDtypeStruct((N, R_out, Cout), jnp.bfloat16),
        grid=(N,),
        in_specs=[x_spec, w_spec, b_spec],
        out_specs=pl.BlockSpec((None, R_out, Cout), lambda n: (n, 0, 0)),
        compiler_params=comp,
    )(x, w9, b2d)
    return out, OHg, Wg, OWv


def mlp_head(x, w1, b1, w2, b2):
    """Fused Linear(fc_in,128)+ReLU+Linear(128, padded 128) in one kernel."""
    vmem = pl.BlockSpec(memory_space=pltpu.MemorySpace.VMEM)
    return pl.pallas_call(
        _mlp_head_kernel,
        out_shape=jax.ShapeDtypeStruct((x.shape[0], w2.shape[1]), jnp.float32),
        in_specs=[vmem] * 5,
        out_specs=vmem,
        compiler_params=pltpu.CompilerParams(vmem_limit_bytes=_VMEM_LIMIT),
    )(x, w1, b1, w2, b2)


# ----------------------------------------------------------------------------
# One-time weight repacking (hoisted out of the per-call forward)
# ----------------------------------------------------------------------------
def prepare_params(params, in_shape, num_classes):
    c_in, H, W = in_shape
    hf = ((H - 4) // 2 - 2) // 2
    wf = ((W - 4) // 2 - 2) // 2

    def conv_w(w):                       # OIHW -> (9, Cin, Cout) bf16
        co, ci, kh, kw = w.shape
        return (jnp.transpose(w, (2, 3, 1, 0))
                .reshape(kh * kw, ci, co).astype(jnp.bfloat16))

    # fc1 rows permuted from PyTorch NCHW-flatten order (c,h,w) to our (h,w,c).
    wf1 = (params["wf1"].reshape(-1, 64, hf, wf).transpose(2, 3, 1, 0)
           .reshape(hf * wf * 64, -1)).astype(jnp.bfloat16)          # (fc_in,128)
    nc = params["wf2"].shape[0]
    ncp = ((nc + 127) // 128) * 128                                  # lane-dense
    wf2 = jnp.zeros((params["wf2"].shape[1], ncp), jnp.bfloat16)
    wf2 = wf2.at[:, :nc].set(params["wf2"].T.astype(jnp.bfloat16))
    bf2 = jnp.zeros((1, ncp), jnp.float32).at[0, :nc].set(params["bf2"])
    return {
        "w1": conv_w(params["w1"]), "b1": params["b1"].astype(jnp.float32),
        "w2": conv_w(params["w2"]), "b2": params["b2"].astype(jnp.float32),
        "w3": conv_w(params["w3"]), "b3": params["b3"].astype(jnp.float32),
        "wf1": wf1, "bf1": params["bf1"].reshape(1, -1).astype(jnp.float32),
        "wf2": wf2, "bf2": bf2,
    }


def make_forward(in_shape, num_classes):
    c_in, H, W = in_shape

    @jax.jit
    def forward(x_nchw, prep):
        n = x_nchw.shape[0]
        # NCHW -> NHWC -> per-image flattened (H*W, C) rows + tap slack, bf16.
        x = jnp.transpose(x_nchw, (0, 2, 3, 1)).astype(jnp.bfloat16)
        x = x.reshape(n, H * W, c_in)
        x = jnp.concatenate(
            [x, jnp.zeros((n, PAD_ROWS, c_in), jnp.bfloat16)], axis=1)

        x, hg, wg, wv = conv3x3_relu(x, prep["w1"], prep["b1"],
                                     Hg=H, Wg=W, Wv=W, pool=False,
                                     pad_out=PAD_ROWS)
        x, hg, wg, wv = conv3x3_relu(x, prep["w2"], prep["b2"],
                                     Hg=hg, Wg=wg, Wv=wv, pool=True,
                                     pad_out=PAD_ROWS)
        x, hg, wg, wv = conv3x3_relu(x, prep["w3"], prep["b3"],
                                     Hg=hg, Wg=wg, Wv=wv, pool=True,
                                     pad_out=0)
        flat = x.reshape(n, hg * wg * x.shape[-1])       # (N, fc_in), (h,w,c)
        logits = mlp_head(flat, prep["wf1"], prep["bf1"],
                          prep["wf2"], prep["bf2"])
        return logits[:, :num_classes]

    return forward


# ----------------------------------------------------------------------------
# Pure-JAX f32 reference (mirrors the PyTorch module exactly)
# ----------------------------------------------------------------------------
def reference_forward(x, params):
    dn = ("NCHW", "OIHW", "NCHW")
    hp = lax.Precision.HIGHEST

    def conv(h, w, b):
        h = lax.conv_general_dilated(h, w, (1, 1), "VALID",
                                     dimension_numbers=dn, precision=hp)
        return jax.nn.relu(h + b[None, :, None, None])

    def pool(h):
        return lax.reduce_window(h, -jnp.inf, lax.max,
                                 (1, 1, 2, 2), (1, 1, 2, 2), "VALID")

    h = conv(x, params["w1"], params["b1"])
    h = conv(h, params["w2"], params["b2"])
    h = pool(h)
    h = conv(h, params["w3"], params["b3"])
    h = pool(h)
    h = h.reshape(h.shape[0], -1)                        # NCHW flatten (c,h,w)
    h = jax.nn.relu(jnp.dot(h, params["wf1"].T, precision=hp) + params["bf1"])
    return jnp.dot(h, params["wf2"].T, precision=hp) + params["bf2"]


# ----------------------------------------------------------------------------
# Deterministic parameter init (PyTorch layouts: conv OIHW, linear (out, in))
# ----------------------------------------------------------------------------
def init_params(key, in_shape, num_classes):
    c_in, h, w = in_shape
    fc_in = 64 * (((h - 4) // 2 - 2) // 2) * (((w - 4) // 2 - 2) // 2)
    ks = jax.random.split(key, 10)
    s = 0.05
    return {
        "w1": s * jax.random.normal(ks[0], (32, c_in, 3, 3), jnp.float32),
        "b1": s * jax.random.normal(ks[1], (32,), jnp.float32),
        "w2": s * jax.random.normal(ks[2], (64, 32, 3, 3), jnp.float32),
        "b2": s * jax.random.normal(ks[3], (64,), jnp.float32),
        "w3": s * jax.random.normal(ks[4], (64, 64, 3, 3), jnp.float32),
        "b3": s * jax.random.normal(ks[5], (64,), jnp.float32),
        "wf1": s * jax.random.normal(ks[6], (128, fc_in), jnp.float32),
        "bf1": s * jax.random.normal(ks[7], (128,), jnp.float32),
        "wf2": s * jax.random.normal(ks[8], (num_classes, 128), jnp.float32),
        "bf2": s * jax.random.normal(ks[9], (num_classes,), jnp.float32),
    }


if __name__ == "__main__":
    key = jax.random.PRNGKey(0)
    kx, kp = jax.random.split(key)

    in_shape = (4, 16, 16)          # (C, H, W) -> fc input = 64*2*2 = 256
    batch, num_classes = 2, 10

    x = jax.random.normal(kx, (batch,) + in_shape, jnp.float32)   # NCHW
    params = init_params(kp, in_shape, num_classes)
    prep = prepare_params(params, in_shape, num_classes)          # hoisted repack

    forward = make_forward(in_shape, num_classes)
    out = jax.block_until_ready(forward(x, prep))
    assert out.shape == (batch, num_classes), out.shape

    ref = jax.block_until_ready(reference_forward(x, params))
    err = float(jnp.max(jnp.abs(out - ref)))
    assert err < 2e-2, f"max abs diff vs reference: {err}"

    print("KERNEL_OK")
</pallas_src>

<mosaic_0001>
module attributes {stable_mosaic.version = 11 : i64} {
  func.func @_conv3x3_relu_kernel(%arg0: i32, %arg1: memref<1x264x4xbf16, #tpu.memory_space<vmem>>, %arg2: memref<9x4x32xbf16, #tpu.memory_space<vmem>>, %arg3: memref<1x32xf32, #tpu.memory_space<vmem>>, %arg4: memref<1x232x32xbf16, #tpu.memory_space<vmem>>) attributes {dimension_semantics = [#tpu.dimension_semantics<parallel>], iteration_bounds = array<i64: 2>, scalar_prefetch = 0 : i64, scratch_operands = 0 : i64, tpu.core_type = #tpu.core_type<tc>, window_params = [{transform_indices = @transform_0, window_bounds = array<i64: 1, 264, 4>}, {pipeline_mode = #tpu.pipeline_mode<synchronous>, transform_indices = @transform_1, window_bounds = array<i64: 9, 4, 32>}, {pipeline_mode = #tpu.pipeline_mode<synchronous>, transform_indices = @transform_2, window_bounds = array<i64: 1, 32>}, {transform_indices = @transform_3, window_bounds = array<i64: 1, 232, 32>}]} {
    %c0 = arith.constant 0 : index
    %c0_0 = arith.constant 0 : index
    %c0_1 = arith.constant 0 : index
    %0 = vector.load %arg1[%c0, %c0_0, %c0_1] : memref<1x264x4xbf16, #tpu.memory_space<vmem>>, vector<1x224x4xbf16>
    %1 = vector.shape_cast %0 : vector<1x224x4xbf16> to vector<224x4xbf16>
    %c0_2 = arith.constant 0 : index
    %c0_3 = arith.constant 0 : index
    %c0_4 = arith.constant 0 : index
    %2 = vector.load %arg2[%c0_2, %c0_3, %c0_4] : memref<9x4x32xbf16, #tpu.memory_space<vmem>>, vector<1x4x32xbf16>
    %3 = vector.shape_cast %2 : vector<1x4x32xbf16> to vector<4x32xbf16>
    %cst = arith.constant dense<0.000000e+00> : vector<224x32xf32>
    %4 = tpu.matmul %1, %3, %cst {dimension_numbers = #tpu.dot_dimension_numbers<[1], [0], [0], [1], [0, 0, 1, 1], [], []>} : vector<224x4xbf16>, vector<4x32xbf16>, vector<224x32xf32> -> vector<224x32xf32>
    %c0_5 = arith.constant 0 : index
    %c1 = arith.constant 1 : index
    %c0_6 = arith.constant 0 : index
    %5 = vector.load %arg1[%c0_5, %c1, %c0_6] : memref<1x264x4xbf16, #tpu.memory_space<vmem>>, vector<1x224x4xbf16>
    %6 = vector.shape_cast %5 : vector<1x224x4xbf16> to vector<224x4xbf16>
    %c1_7 = arith.constant 1 : index
    %c0_8 = arith.constant 0 : index
    %c0_9 = arith.constant 0 : index
    %7 = vector.load %arg2[%c1_7, %c0_8, %c0_9] : memref<9x4x32xbf16, #tpu.memory_space<vmem>>, vector<1x4x32xbf16>
    %8 = vector.shape_cast %7 : vector<1x4x32xbf16> to vector<4x32xbf16>
    %cst_10 = arith.constant dense<0.000000e+00> : vector<224x32xf32>
    %9 = tpu.matmul %6, %8, %cst_10 {dimension_numbers = #tpu.dot_dimension_numbers<[1], [0], [0], [1], [0, 0, 1, 1], [], []>} : vector<224x4xbf16>, vector<4x32xbf16>, vector<224x32xf32> -> vector<224x32xf32>
    %10 = arith.addf %4, %9 : vector<224x32xf32>
    %c0_11 = arith.constant 0 : index
    %c2 = arith.constant 2 : index
    %c0_12 = arith.constant 0 : index
    %11 = vector.load %arg1[%c0_11, %c2, %c0_12] : memref<1x264x4xbf16, #tpu.memory_space<vmem>>, vector<1x224x4xbf16>
    %12 = vector.shape_cast %11 : vector<1x224x4xbf16> to vector<224x4xbf16>
    %c2_13 = arith.constant 2 : index
    %c0_14 = arith.constant 0 : index
    %c0_15 = arith.constant 0 : index
    %13 = vector.load %arg2[%c2_13, %c0_14, %c0_15] : memref<9x4x32xbf16, #tpu.memory_space<vmem>>, vector<1x4x32xbf16>
    %14 = vector.shape_cast %13 : vector<1x4x32xbf16> to vector<4x32xbf16>
    %cst_16 = arith.constant dense<0.000000e+00> : vector<224x32xf32>
    %15 = tpu.matmul %12, %14, %cst_16 {dimension_numbers = #tpu.dot_dimension_numbers<[1], [0], [0], [1], [0, 0, 1, 1], [], []>} : vector<224x4xbf16>, vector<4x32xbf16>, vector<224x32xf32> -> vector<224x32xf32>
    %16 = arith.addf %10, %15 : vector<224x32xf32>
    %c0_17 = arith.constant 0 : index
    %c16 = arith.constant 16 : index
    %c0_18 = arith.constant 0 : index
    %17 = vector.load %arg1[%c0_17, %c16, %c0_18] : memref<1x264x4xbf16, #tpu.memory_space<vmem>>, vector<1x224x4xbf16>
    %18 = vector.shape_cast %17 : vector<1x224x4xbf16> to vector<224x4xbf16>
    %c3 = arith.constant 3 : index
    %c0_19 = arith.constant 0 : index
    %c0_20 = arith.constant 0 : index
    %19 = vector.load %arg2[%c3, %c0_19, %c0_20] : memref<9x4x32xbf16, #tpu.memory_space<vmem>>, vector<1x4x32xbf16>
    %20 = vector.shape_cast %19 : vector<1x4x32xbf16> to vector<4x32xbf16>
    %cst_21 = arith.constant dense<0.000000e+00> : vector<224x32xf32>
    %21 = tpu.matmul %18, %20, %cst_21 {dimension_numbers = #tpu.dot_dimension_numbers<[1], [0], [0], [1], [0, 0, 1, 1], [], []>} : vector<224x4xbf16>, vector<4x32xbf16>, vector<224x32xf32> -> vector<224x32xf32>
    %22 = arith.addf %16, %21 : vector<224x32xf32>
    %c0_22 = arith.constant 0 : index
    %c17 = arith.constant 17 : index
    %c0_23 = arith.constant 0 : index
    %23 = vector.load %arg1[%c0_22, %c17, %c0_23] : memref<1x264x4xbf16, #tpu.memory_space<vmem>>, vector<1x224x4xbf16>
    %24 = vector.shape_cast %23 : vector<1x224x4xbf16> to vector<224x4xbf16>
    %c4 = arith.constant 4 : index
    %c0_24 = arith.constant 0 : index
    %c0_25 = arith.constant 0 : index
    %25 = vector.load %arg2[%c4, %c0_24, %c0_25] : memref<9x4x32xbf16, #tpu.memory_space<vmem>>, vector<1x4x32xbf16>
    %26 = vector.shape_cast %25 : vector<1x4x32xbf16> to vector<4x32xbf16>
    %cst_26 = arith.constant dense<0.000000e+00> : vector<224x32xf32>
    %27 = tpu.matmul %24, %26, %cst_26 {dimension_numbers = #tpu.dot_dimension_numbers<[1], [0], [0], [1], [0, 0, 1, 1], [], []>} : vector<224x4xbf16>, vector<4x32xbf16>, vector<224x32xf32> -> vector<224x32xf32>
    %28 = arith.addf %22, %27 : vector<224x32xf32>
    %c0_27 = arith.constant 0 : index
    %c18 = arith.constant 18 : index
    %c0_28 = arith.constant 0 : index
    %29 = vector.load %arg1[%c0_27, %c18, %c0_28] : memref<1x264x4xbf16, #tpu.memory_space<vmem>>, vector<1x224x4xbf16>
    %30 = vector.shape_cast %29 : vector<1x224x4xbf16> to vector<224x4xbf16>
    %c5 = arith.constant 5 : index
    %c0_29 = arith.constant 0 : index
    %c0_30 = arith.constant 0 : index
    %31 = vector.load %arg2[%c5, %c0_29, %c0_30] : memref<9x4x32xbf16, #tpu.memory_space<vmem>>, vector<1x4x32xbf16>
    %32 = vector.shape_cast %31 : vector<1x4x32xbf16> to vector<4x32xbf16>
    %cst_31 = arith.constant dense<0.000000e+00> : vector<224x32xf32>
    %33 = tpu.matmul %30, %32, %cst_31 {dimension_numbers = #tpu.dot_dimension_numbers<[1], [0], [0], [1], [0, 0, 1, 1], [], []>} : vector<224x4xbf16>, vector<4x32xbf16>, vector<224x32xf32> -> vector<224x32xf32>
    %34 = arith.addf %28, %33 : vector<224x32xf32>
    %c0_32 = arith.constant 0 : index
    %c32 = arith.constant 32 : index
    %c0_33 = arith.constant 0 : index
    %35 = vector.load %arg1[%c0_32, %c32, %c0_33] : memref<1x264x4xbf16, #tpu.memory_space<vmem>>, vector<1x224x4xbf16>
    %36 = vector.shape_cast %35 : vector<1x224x4xbf16> to vector<224x4xbf16>
    %c6 = arith.constant 6 : index
    %c0_34 = arith.constant 0 : index
    %c0_35 = arith.constant 0 : index
    %37 = vector.load %arg2[%c6, %c0_34, %c0_35] : memref<9x4x32xbf16, #tpu.memory_space<vmem>>, vector<1x4x32xbf16>
    %38 = vector.shape_cast %37 : vector<1x4x32xbf16> to vector<4x32xbf16>
    %cst_36 = arith.constant dense<0.000000e+00> : vector<224x32xf32>
    %39 = tpu.matmul %36, %38, %cst_36 {dimension_numbers = #tpu.dot_dimension_numbers<[1], [0], [0], [1], [0, 0, 1, 1], [], []>} : vector<224x4xbf16>, vector<4x32xbf16>, vector<224x32xf32> -> vector<224x32xf32>
    %40 = arith.addf %34, %39 : vector<224x32xf32>
    %c0_37 = arith.constant 0 : index
    %c33 = arith.constant 33 : index
    %c0_38 = arith.constant 0 : index
    %41 = vector.load %arg1[%c0_37, %c33, %c0_38] : memref<1x264x4xbf16, #tpu.memory_space<vmem>>, vector<1x224x4xbf16>
    %42 = vector.shape_cast %41 : vector<1x224x4xbf16> to vector<224x4xbf16>
    %c7 = arith.constant 7 : index
    %c0_39 = arith.constant 0 : index
    %c0_40 = arith.constant 0 : index
    %43 = vector.load %arg2[%c7, %c0_39, %c0_40] : memref<9x4x32xbf16, #tpu.memory_space<vmem>>, vector<1x4x32xbf16>
    %44 = vector.shape_cast %43 : vector<1x4x32xbf16> to vector<4x32xbf16>
    %cst_41 = arith.constant dense<0.000000e+00> : vector<224x32xf32>
    %45 = tpu.matmul %42, %44, %cst_41 {dimension_numbers = #tpu.dot_dimension_numbers<[1], [0], [0], [1], [0, 0, 1, 1], [], []>} : vector<224x4xbf16>, vector<4x32xbf16>, vector<224x32xf32> -> vector<224x32xf32>
    %46 = arith.addf %40, %45 : vector<224x32xf32>
    %c0_42 = arith.constant 0 : index
    %c34 = arith.constant 34 : index
    %c0_43 = arith.constant 0 : index
    %47 = vector.load %arg1[%c0_42, %c34, %c0_43] : memref<1x264x4xbf16, #tpu.memory_space<vmem>>, vector<1x224x4xbf16>
    %48 = vector.shape_cast %47 : vector<1x224x4xbf16> to vector<224x4xbf16>
    %c8 = arith.constant 8 : index
    %c0_44 = arith.constant 0 : index
    %c0_45 = arith.constant 0 : index
    %49 = vector.load %arg2[%c8, %c0_44, %c0_45] : memref<9x4x32xbf16, #tpu.memory_space<vmem>>, vector<1x4x32xbf16>
    %50 = vector.shape_cast %49 : vector<1x4x32xbf16> to vector<4x32xbf16>
    %cst_46 = arith.constant dense<0.000000e+00> : vector<224x32xf32>
    %51 = tpu.matmul %48, %50, %cst_46 {dimension_numbers = #tpu.dot_dimension_numbers<[1], [0], [0], [1], [0, 0, 1, 1], [], []>} : vector<224x4xbf16>, vector<4x32xbf16>, vector<224x32xf32> -> vector<224x32xf32>
    %52 = arith.addf %46, %51 : vector<224x32xf32>
    %c0_47 = arith.constant 0 : index
    %c0_48 = arith.constant 0 : index
    %53 = vector.load %arg3[%c0_47, %c0_48] : memref<1x32xf32, #tpu.memory_space<vmem>>, vector<1x32xf32>
    %54 = vector.broadcast %53 : vector<1x32xf32> to vector<224x32xf32>
    %55 = arith.addf %52, %54 : vector<224x32xf32>
    %cst_49 = arith.constant 0.000000e+00 : f32
    %56 = vector.broadcast %cst_49 : f32 to vector<224x32xf32>
    %57 = arith.maximumf %55, %56 : vector<224x32xf32>
    %58 = arith.truncf %57 : vector<224x32xf32> to vector<224x32xbf16>
    %c0_50 = arith.constant 0 : index
    %c0_51 = arith.constant 0 : index
    %c0_52 = arith.constant 0 : index
    %59 = vector.load %arg4[%c0_50, %c0_51, %c0_52] : memref<1x232x32xbf16, #tpu.memory_space<vmem>>, vector<1x224x32xbf16>
    %60 = vector.shape_cast %59 : vector<1x224x32xbf16> to vector<224x32xbf16>
    %61 = vector.shape_cast %58 : vector<224x32xbf16> to vector<1x224x32xbf16>
    tpu.vector_store %arg4[%c0_50, %c0_51, %c0_52], %61 {strides = array<i32>} : memref<1x232x32xbf16, #tpu.memory_space<vmem>>, vector<1x224x32xbf16>,
    %cst_53 = arith.constant 0.000000e+00 : bf16
    %62 = vector.broadcast %cst_53 : bf16 to vector<8x32xbf16>
    %c0_54 = arith.constant 0 : index
    %c224 = arith.constant 224 : index
    %c0_55 = arith.constant 0 : index
    %63 = vector.load %arg4[%c0_54, %c224, %c0_55] : memref<1x232x32xbf16, #tpu.memory_space<vmem>>, vector<1x8x32xbf16>
    %64 = vector.shape_cast %63 : vector<1x8x32xbf16> to vector<8x32xbf16>
    %65 = vector.shape_cast %62 : vector<8x32xbf16> to vector<1x8x32xbf16>
    tpu.vector_store %arg4[%c0_54, %c224, %c0_55], %65 {strides = array<i32>} : memref<1x232x32xbf16, #tpu.memory_space<vmem>>, vector<1x8x32xbf16>,
    return
  }
  func.func @transform_0(%arg0: i32) -> (i32, i32, i32) {
    %c0_i32 = arith.constant 0 : i32
    %c0_i32_0 = arith.constant 0 : i32
    %c0_i32_1 = arith.constant 0 : i32
    return %arg0, %c0_i32, %c0_i32_0 : i32, i32, i32
  }
  func.func @transform_1(%arg0: i32) -> (i32, i32, i32) {
    %c0_i32 = arith.constant 0 : i32
    %c0_i32_0 = arith.constant 0 : i32
    %c0_i32_1 = arith.constant 0 : i32
    %c0_i32_2 = arith.constant 0 : i32
    return %c0_i32, %c0_i32_0, %c0_i32_1 : i32, i32, i32
  }
  func.func @transform_2(%arg0: i32) -> (i32, i32) {
    %c0_i32 = arith.constant 0 : i32
    %c0_i32_0 = arith.constant 0 : i32
    %c0_i32_1 = arith.constant 0 : i32
    return %c0_i32, %c0_i32_0 : i32, i32
  }
  func.func @transform_3(%arg0: i32) -> (i32, i32, i32) {
    %c0_i32 = arith.constant 0 : i32
    %c0_i32_0 = arith.constant 0 : i32
    %c0_i32_1 = arith.constant 0 : i32
    return %arg0, %c0_i32, %c0_i32_0 : i32, i32, i32
  }
}

module attributes {stable_mosaic.version = 11 : i64} {
  func.func @_conv3x3_relu_pool_kernel(%arg0: i32, %arg1: memref<1x44x64xbf16, #tpu.memory_space<vmem>>, %arg2: memref<9x64x64xbf16, #tpu.memory_space<vmem>>, %arg3: memref<1x64xf32, #tpu.memory_space<vmem>>, %arg4: memref<4x4x24xbf16, #tpu.memory_space<vmem>>, %arg5: memref<1x4x64xbf16, #tpu.memory_space<vmem>>) attributes {dimension_semantics = [#tpu.dimension_semantics<parallel>], iteration_bounds = array<i64: 2>, scalar_prefetch = 0 : i64, scratch_operands = 0 : i64, tpu.core_type = #tpu.core_type<tc>, window_params = [{transform_indices = @transform_0, window_bounds = array<i64: 1, 44, 64>}, {pipeline_mode = #tpu.pipeline_mode<synchronous>, transform_indices = @transform_1, window_bounds = array<i64: 9, 64, 64>}, {pipeline_mode = #tpu.pipeline_mode<synchronous>, transform_indices = @transform_2, window_bounds = array<i64: 1, 64>}, {pipeline_mode = #tpu.pipeline_mode<synchronous>, transform_indices = @transform_3, window_bounds = array<i64: 4, 4, 24>}, {transform_indices = @transform_4, window_bounds = array<i64: 1, 4, 64>}]} {
    %c0 = arith.constant 0 : index
    %c0_0 = arith.constant 0 : index
    %c0_1 = arith.constant 0 : index
    %0 = vector.load %arg1[%c0, %c0_0, %c0_1] : memref<1x44x64xbf16, #tpu.memory_space<vmem>>, vector<1x24x64xbf16>
    %1 = vector.shape_cast %0 : vector<1x24x64xbf16> to vector<24x64xbf16>
    %c0_2 = arith.constant 0 : index
    %c0_3 = arith.constant 0 : index
    %c0_4 = arith.constant 0 : index
    %2 = vector.load %arg2[%c0_2, %c0_3, %c0_4] : memref<9x64x64xbf16, #tpu.memory_space<vmem>>, vector<1x64x64xbf16>
    %3 = vector.shape_cast %2 : vector<1x64x64xbf16> to vector<64x64xbf16>
    %cst = arith.constant dense<0.000000e+00> : vector<24x64xf32>
    %4 = tpu.matmul %1, %3, %cst {dimension_numbers = #tpu.dot_dimension_numbers<[1], [0], [0], [1], [0, 0, 1, 1], [], []>} : vector<24x64xbf16>, vector<64x64xbf16>, vector<24x64xf32> -> vector<24x64xf32>
    %c0_5 = arith.constant 0 : index
    %c1 = arith.constant 1 : index
    %c0_6 = arith.constant 0 : index
    %5 = vector.load %arg1[%c0_5, %c1, %c0_6] : memref<1x44x64xbf16, #tpu.memory_space<vmem>>, vector<1x24x64xbf16>
    %6 = vector.shape_cast %5 : vector<1x24x64xbf16> to vector<24x64xbf16>
    %c1_7 = arith.constant 1 : index
    %c0_8 = arith.constant 0 : index
    %c0_9 = arith.constant 0 : index
    %7 = vector.load %arg2[%c1_7, %c0_8, %c0_9] : memref<9x64x64xbf16, #tpu.memory_space<vmem>>, vector<1x64x64xbf16>
    %8 = vector.shape_cast %7 : vector<1x64x64xbf16> to vector<64x64xbf16>
    %cst_10 = arith.constant dense<0.000000e+00> : vector<24x64xf32>
    %9 = tpu.matmul %6, %8, %cst_10 {dimension_numbers = #tpu.dot_dimension_numbers<[1], [0], [0], [1], [0, 0, 1, 1], [], []>} : vector<24x64xbf16>, vector<64x64xbf16>, vector<24x64xf32> -> vector<24x64xf32>
    %10 = arith.addf %4, %9 : vector<24x64xf32>
    %c0_11 = arith.constant 0 : index
    %c2 = arith.constant 2 : index
    %c0_12 = arith.constant 0 : index
    %11 = vector.load %arg1[%c0_11, %c2, %c0_12] : memref<1x44x64xbf16, #tpu.memory_space<vmem>>, vector<1x24x64xbf16>
    %12 = vector.shape_cast %11 : vector<1x24x64xbf16> to vector<24x64xbf16>
    %c2_13 = arith.constant 2 : index
    %c0_14 = arith.constant 0 : index
    %c0_15 = arith.constant 0 : index
    %13 = vector.load %arg2[%c2_13, %c0_14, %c0_15] : memref<9x64x64xbf16, #tpu.memory_space<vmem>>, vector<1x64x64xbf16>
    %14 = vector.shape_cast %13 : vector<1x64x64xbf16> to vector<64x64xbf16>
    %cst_16 = arith.constant dense<0.000000e+00> : vector<24x64xf32>
    %15 = tpu.matmul %12, %14, %cst_16 {dimension_numbers = #tpu.dot_dimension_numbers<[1], [0], [0], [1], [0, 0, 1, 1], [], []>} : vector<24x64xbf16>, vector<64x64xbf16>, vector<24x64xf32> -> vector<24x64xf32>
    %16 = arith.addf %10, %15 : vector<24x64xf32>
    %c0_17 = arith.constant 0 : index
    %c6 = arith.constant 6 : index
    %c0_18 = arith.constant 0 : index
    %17 = vector.load %arg1[%c0_17, %c6, %c0_18] : memref<1x44x64xbf16, #tpu.memory_space<vmem>>, vector<1x24x64xbf16>
    %18 = vector.shape_cast %17 : vector<1x24x64xbf16> to vector<24x64xbf16>
    %c3 = arith.constant 3 : index
    %c0_19 = arith.constant 0 : index
    %c0_20 = arith.constant 0 : index
    %19 = vector.load %arg2[%c3, %c0_19, %c0_20] : memref<9x64x64xbf16, #tpu.memory_space<vmem>>, vector<1x64x64xbf16>
    %20 = vector.shape_cast %19 : vector<1x64x64xbf16> to vector<64x64xbf16>
    %cst_21 = arith.constant dense<0.000000e+00> : vector<24x64xf32>
    %21 = tpu.matmul %18, %20, %cst_21 {dimension_numbers = #tpu.dot_dimension_numbers<[1], [0], [0], [1], [0, 0, 1, 1], [], []>} : vector<24x64xbf16>, vector<64x64xbf16>, vector<24x64xf32> -> vector<24x64xf32>
    %22 = arith.addf %16, %21 : vector<24x64xf32>
    %c0_22 = arith.constant 0 : index
    %c7 = arith.constant 7 : index
    %c0_23 = arith.constant 0 : index
    %23 = vector.load %arg1[%c0_22, %c7, %c0_23] : memref<1x44x64xbf16, #tpu.memory_space<vmem>>, vector<1x24x64xbf16>
    %24 = vector.shape_cast %23 : vector<1x24x64xbf16> to vector<24x64xbf16>
    %c4 = arith.constant 4 : index
    %c0_24 = arith.constant 0 : index
    %c0_25 = arith.constant 0 : index
    %25 = vector.load %arg2[%c4, %c0_24, %c0_25] : memref<9x64x64xbf16, #tpu.memory_space<vmem>>, vector<1x64x64xbf16>
    %26 = vector.shape_cast %25 : vector<1x64x64xbf16> to vector<64x64xbf16>
    %cst_26 = arith.constant dense<0.000000e+00> : vector<24x64xf32>
    %27 = tpu.matmul %24, %26, %cst_26 {dimension_numbers = #tpu.dot_dimension_numbers<[1], [0], [0], [1], [0, 0, 1, 1], [], []>} : vector<24x64xbf16>, vector<64x64xbf16>, vector<24x64xf32> -> vector<24x64xf32>
    %28 = arith.addf %22, %27 : vector<24x64xf32>
    %c0_27 = arith.constant 0 : index
    %c8 = arith.constant 8 : index
    %c0_28 = arith.constant 0 : index
    %29 = vector.load %arg1[%c0_27, %c8, %c0_28] : memref<1x44x64xbf16, #tpu.memory_space<vmem>>, vector<1x24x64xbf16>
    %30 = vector.shape_cast %29 : vector<1x24x64xbf16> to vector<24x64xbf16>
    %c5 = arith.constant 5 : index
    %c0_29 = arith.constant 0 : index
    %c0_30 = arith.constant 0 : index
    %31 = vector.load %arg2[%c5, %c0_29, %c0_30] : memref<9x64x64xbf16, #tpu.memory_space<vmem>>, vector<1x64x64xbf16>
    %32 = vector.shape_cast %31 : vector<1x64x64xbf16> to vector<64x64xbf16>
    %cst_31 = arith.constant dense<0.000000e+00> : vector<24x64xf32>
    %33 = tpu.matmul %30, %32, %cst_31 {dimension_numbers = #tpu.dot_dimension_numbers<[1], [0], [0], [1], [0, 0, 1, 1], [], []>} : vector<24x64xbf16>, vector<64x64xbf16>, vector<24x64xf32> -> vector<24x64xf32>
    %34 = arith.addf %28, %33 : vector<24x64xf32>
    %c0_32 = arith.constant 0 : index
    %c12 = arith.constant 12 : index
    %c0_33 = arith.constant 0 : index
    %35 = vector.load %arg1[%c0_32, %c12, %c0_33] : memref<1x44x64xbf16, #tpu.memory_space<vmem>>, vector<1x24x64xbf16>
    %36 = vector.shape_cast %35 : vector<1x24x64xbf16> to vector<24x64xbf16>
    %c6_34 = arith.constant 6 : index
    %c0_35 = arith.constant 0 : index
    %c0_36 = arith.constant 0 : index
    %37 = vector.load %arg2[%c6_34, %c0_35, %c0_36] : memref<9x64x64xbf16, #tpu.memory_space<vmem>>, vector<1x64x64xbf16>
    %38 = vector.shape_cast %37 : vector<1x64x64xbf16> to vector<64x64xbf16>
    %cst_37 = arith.constant dense<0.000000e+00> : vector<24x64xf32>
    %39 = tpu.matmul %36, %38, %cst_37 {dimension_numbers = #tpu.dot_dimension_numbers<[1], [0], [0], [1], [0, 0, 1, 1], [], []>} : vector<24x64xbf16>, vector<64x64xbf16>, vector<24x64xf32> -> vector<24x64xf32>
    %40 = arith.addf %34, %39 : vector<24x64xf32>
    %c0_38 = arith.constant 0 : index
    %c13 = arith.constant 13 : index
    %c0_39 = arith.constant 0 : index
    %41 = vector.load %arg1[%c0_38, %c13, %c0_39] : memref<1x44x64xbf16, #tpu.memory_space<vmem>>, vector<1x24x64xbf16>
    %42 = vector.shape_cast %41 : vector<1x24x64xbf16> to vector<24x64xbf16>
    %c7_40 = arith.constant 7 : index
    %c0_41 = arith.constant 0 : index
    %c0_42 = arith.constant 0 : index
    %43 = vector.load %arg2[%c7_40, %c0_41, %c0_42] : memref<9x64x64xbf16, #tpu.memory_space<vmem>>, vector<1x64x64xbf16>
    %44 = vector.shape_cast %43 : vector<1x64x64xbf16> to vector<64x64xbf16>
    %cst_43 = arith.constant dense<0.000000e+00> : vector<24x64xf32>
    %45 = tpu.matmul %42, %44, %cst_43 {dimension_numbers = #tpu.dot_dimension_numbers<[1], [0], [0], [1], [0, 0, 1, 1], [], []>} : vector<24x64xbf16>, vector<64x64xbf16>, vector<24x64xf32> -> vector<24x64xf32>
    %46 = arith.addf %40, %45 : vector<24x64xf32>
    %c0_44 = arith.constant 0 : index
    %c14 = arith.constant 14 : index
    %c0_45 = arith.constant 0 : index
    %47 = vector.load %arg1[%c0_44, %c14, %c0_45] : memref<1x44x64xbf16, #tpu.memory_space<vmem>>, vector<1x24x64xbf16>
    %48 = vector.shape_cast %47 : vector<1x24x64xbf16> to vector<24x64xbf16>
    %c8_46 = arith.constant 8 : index
    %c0_47 = arith.constant 0 : index
    %c0_48 = arith.constant 0 : index
    %49 = vector.load %arg2[%c8_46, %c0_47, %c0_48] : memref<9x64x64xbf16, #tpu.memory_space<vmem>>, vector<1x64x64xbf16>
    %50 = vector.shape_cast %49 : vector<1x64x64xbf16> to vector<64x64xbf16>
    %cst_49 = arith.constant dense<0.000000e+00> : vector<24x64xf32>
    %51 = tpu.matmul %48, %50, %cst_49 {dimension_numbers = #tpu.dot_dimension_numbers<[1], [0], [0], [1], [0, 0, 1, 1], [], []>} : vector<24x64xbf16>, vector<64x64xbf16>, vector<24x64xf32> -> vector<24x64xf32>
    %52 = arith.addf %46, %51 : vector<24x64xf32>
    %c0_50 = arith.constant 0 : index
    %c0_51 = arith.constant 0 : index
    %53 = vector.load %arg3[%c0_50, %c0_51] : memref<1x64xf32, #tpu.memory_space<vmem>>, vector<1x64xf32>
    %54 = vector.broadcast %53 : vector<1x64xf32> to vector<24x64xf32>
    %55 = arith.addf %52, %54 : vector<24x64xf32>
    %cst_52 = arith.constant 0.000000e+00 : f32
    %56 = vector.broadcast %cst_52 : f32 to vector<24x64xf32>
    %57 = arith.maximumf %55, %56 : vector<24x64xf32>
    %58 = arith.truncf %57 : vector<24x64xf32> to vector<24x64xbf16>
    %c0_53 = arith.constant 0 : index
    %c0_54 = arith.constant 0 : index
    %c0_55 = arith.constant 0 : index
    %59 = vector.load %arg4[%c0_53, %c0_54, %c0_55] : memref<4x4x24xbf16, #tpu.memory_space<vmem>>, vector<1x4x24xbf16>
    %60 = vector.shape_cast %59 : vector<1x4x24xbf16> to vector<4x24xbf16>
    %cst_56 = arith.constant dense<0.000000e+00> : vector<4x64xf32>
    %61 = tpu.matmul %60, %58, %cst_56 {dimension_numbers = #tpu.dot_dimension_numbers<[1], [0], [0], [1], [0, 0, 1, 1], [], []>} : vector<4x24xbf16>, vector<24x64xbf16>, vector<4x64xf32> -> vector<4x64xf32>
    %c1_57 = arith.constant 1 : index
    %c0_58 = arith.constant 0 : index
    %c0_59 = arith.constant 0 : index
    %62 = vector.load %arg4[%c1_57, %c0_58, %c0_59] : memref<4x4x24xbf16, #tpu.memory_space<vmem>>, vector<1x4x24xbf16>
    %63 = vector.shape_cast %62 : vector<1x4x24xbf16> to vector<4x24xbf16>
    %cst_60 = arith.constant dense<0.000000e+00> : vector<4x64xf32>
    %64 = tpu.matmul %63, %58, %cst_60 {dimension_numbers = #tpu.dot_dimension_numbers<[1], [0], [0], [1], [0, 0, 1, 1], [], []>} : vector<4x24xbf16>, vector<24x64xbf16>, vector<4x64xf32> -> vector<4x64xf32>
    %65 = arith.maximumf %61, %64 : vector<4x64xf32>
    %c2_61 = arith.constant 2 : index
    %c0_62 = arith.constant 0 : index
    %c0_63 = arith.constant 0 : index
    %66 = vector.load %arg4[%c2_61, %c0_62, %c0_63] : memref<4x4x24xbf16, #tpu.memory_space<vmem>>, vector<1x4x24xbf16>
    %67 = vector.shape_cast %66 : vector<1x4x24xbf16> to vector<4x24xbf16>
    %cst_64 = arith.constant dense<0.000000e+00> : vector<4x64xf32>
    %68 = tpu.matmul %67, %58, %cst_64 {dimension_numbers = #tpu.dot_dimension_numbers<[1], [0], [0], [1], [0, 0, 1, 1], [], []>} : vector<4x24xbf16>, vector<24x64xbf16>, vector<4x64xf32> -> vector<4x64xf32>
    %69 = arith.maximumf %65, %68 : vector<4x64xf32>
    %c3_65 = arith.constant 3 : index
    %c0_66 = arith.constant 0 : index
    %c0_67 = arith.constant 0 : index
    %70 = vector.load %arg4[%c3_65, %c0_66, %c0_67] : memref<4x4x24xbf16, #tpu.memory_space<vmem>>, vector<1x4x24xbf16>
    %71 = vector.shape_cast %70 : vector<1x4x24xbf16> to vector<4x24xbf16>
    %cst_68 = arith.constant dense<0.000000e+00> : vector<4x64xf32>
    %72 = tpu.matmul %71, %58, %cst_68 {dimension_numbers = #tpu.dot_dimension_numbers<[1], [0], [0], [1], [0, 0, 1, 1], [], []>} : vector<4x24xbf16>, vector<24x64xbf16>, vector<4x64xf32> -> vector<4x64xf32>
    %73 = arith.maximumf %69, %72 : vector<4x64xf32>
    %74 = arith.truncf %73 : vector<4x64xf32> to vector<4x64xbf16>
    %c0_69 = arith.constant 0 : index
    %c0_70 = arith.constant 0 : index
    %c0_71 = arith.constant 0 : index
    %75 = vector.load %arg5[%c0_69, %c0_70, %c0_71] : memref<1x4x64xbf16, #tpu.memory_space<vmem>>, vector<1x4x64xbf16>
    %76 = vector.shape_cast %75 : vector<1x4x64xbf16> to vector<4x64xbf16>
    %77 = vector.shape_cast %74 : vector<4x64xbf16> to vector<1x4x64xbf16>
    tpu.vector_store %arg5[%c0_69, %c0_70, %c0_71], %77 {strides = array<i32>} : memref<1x4x64xbf16, #tpu.memory_space<vmem>>, vector<1x4x64xbf16>,
    return
  }
  func.func @transform_0(%arg0: i32) -> (i32, i32, i32) {
    %c0_i32 = arith.constant 0 : i32
    %c0_i32_0 = arith.constant 0 : i32
    %c0_i32_1 = arith.constant 0 : i32
    return %arg0, %c0_i32, %c0_i32_0 : i32, i32, i32
  }
  func.func @transform_1(%arg0: i32) -> (i32, i32, i32) {
    %c0_i32 = arith.constant 0 : i32
    %c0_i32_0 = arith.constant 0 : i32
    %c0_i32_1 = arith.constant 0 : i32
    %c0_i32_2 = arith.constant 0 : i32
    return %c0_i32, %c0_i32_0, %c0_i32_1 : i32, i32, i32
  }
  func.func @transform_2(%arg0: i32) -> (i32, i32) {
    %c0_i32 = arith.constant 0 : i32
    %c0_i32_0 = arith.constant 0 : i32
    %c0_i32_1 = arith.constant 0 : i32
    return %c0_i32, %c0_i32_0 : i32, i32
  }
  func.func @transform_3(%arg0: i32) -> (i32, i32, i32) {
    %c0_i32 = arith.constant 0 : i32
    %c0_i32_0 = arith.constant 0 : i32
    %c0_i32_1 = arith.constant 0 : i32
    %c0_i32_2 = arith.constant 0 : i32
    return %c0_i32, %c0_i32_0, %c0_i32_1 : i32, i32, i32
  }
  func.func @transform_4(%arg0: i32) -> (i32, i32, i32) {
    %c0_i32 = arith.constant 0 : i32
    %c0_i32_0 = arith.constant 0 : i32
    %c0_i32_1 = arith.constant 0 : i32
    return %arg0, %c0_i32, %c0_i32_0 : i32, i32, i32
  }
}

module attributes {stable_mosaic.version = 11 : i64} {
  func.func @_conv3x3_relu_pool_kernel(%arg0: i32, %arg1: memref<1x232x32xbf16, #tpu.memory_space<vmem>>, %arg2: memref<9x32x64xbf16, #tpu.memory_space<vmem>>, %arg3: memref<1x64xf32, #tpu.memory_space<vmem>>, %arg4: memref<4x36x192xbf16, #tpu.memory_space<vmem>>, %arg5: memref<1x44x64xbf16, #tpu.memory_space<vmem>>) attributes {dimension_semantics = [#tpu.dimension_semantics<parallel>], iteration_bounds = array<i64: 2>, scalar_prefetch = 0 : i64, scratch_operands = 0 : i64, tpu.core_type = #tpu.core_type<tc>, window_params = [{transform_indices = @transform_0, window_bounds = array<i64: 1, 232, 32>}, {pipeline_mode = #tpu.pipeline_mode<synchronous>, transform_indices = @transform_1, window_bounds = array<i64: 9, 32, 64>}, {pipeline_mode = #tpu.pipeline_mode<synchronous>, transform_indices = @transform_2, window_bounds = array<i64: 1, 64>}, {pipeline_mode = #tpu.pipeline_mode<synchronous>, transform_indices = @transform_3, window_bounds = array<i64: 4, 36, 192>}, {transform_indices = @transform_4, window_bounds = array<i64: 1, 44, 64>}]} {
    %c0 = arith.constant 0 : index
    %c0_0 = arith.constant 0 : index
    %c0_1 = arith.constant 0 : index
    %0 = vector.load %arg1[%c0, %c0_0, %c0_1] : memref<1x232x32xbf16, #tpu.memory_space<vmem>>, vector<1x192x32xbf16>
    %1 = vector.shape_cast %0 : vector<1x192x32xbf16> to vector<192x32xbf16>
    %c0_2 = arith.constant 0 : index
    %c0_3 = arith.constant 0 : index
    %c0_4 = arith.constant 0 : index
    %2 = vector.load %arg2[%c0_2, %c0_3, %c0_4] : memref<9x32x64xbf16, #tpu.memory_space<vmem>>, vector<1x32x64xbf16>
    %3 = vector.shape_cast %2 : vector<1x32x64xbf16> to vector<32x64xbf16>
    %cst = arith.constant dense<0.000000e+00> : vector<192x64xf32>
    %4 = tpu.matmul %1, %3, %cst {dimension_numbers = #tpu.dot_dimension_numbers<[1], [0], [0], [1], [0, 0, 1, 1], [], []>} : vector<192x32xbf16>, vector<32x64xbf16>, vector<192x64xf32> -> vector<192x64xf32>
    %c0_5 = arith.constant 0 : index
    %c1 = arith.constant 1 : index
    %c0_6 = arith.constant 0 : index
    %5 = vector.load %arg1[%c0_5, %c1, %c0_6] : memref<1x232x32xbf16, #tpu.memory_space<vmem>>, vector<1x192x32xbf16>
    %6 = vector.shape_cast %5 : vector<1x192x32xbf16> to vector<192x32xbf16>
    %c1_7 = arith.constant 1 : index
    %c0_8 = arith.constant 0 : index
    %c0_9 = arith.constant 0 : index
    %7 = vector.load %arg2[%c1_7, %c0_8, %c0_9] : memref<9x32x64xbf16, #tpu.memory_space<vmem>>, vector<1x32x64xbf16>
    %8 = vector.shape_cast %7 : vector<1x32x64xbf16> to vector<32x64xbf16>
    %cst_10 = arith.constant dense<0.000000e+00> : vector<192x64xf32>
    %9 = tpu.matmul %6, %8, %cst_10 {dimension_numbers = #tpu.dot_dimension_numbers<[1], [0], [0], [1], [0, 0, 1, 1], [], []>} : vector<192x32xbf16>, vector<32x64xbf16>, vector<192x64xf32> -> vector<192x64xf32>
    %10 = arith.addf %4, %9 : vector<192x64xf32>
    %c0_11 = arith.constant 0 : index
    %c2 = arith.constant 2 : index
    %c0_12 = arith.constant 0 : index
    %11 = vector.load %arg1[%c0_11, %c2, %c0_12] : memref<1x232x32xbf16, #tpu.memory_space<vmem>>, vector<1x192x32xbf16>
    %12 = vector.shape_cast %11 : vector<1x192x32xbf16> to vector<192x32xbf16>
    %c2_13 = arith.constant 2 : index
    %c0_14 = arith.constant 0 : index
    %c0_15 = arith.constant 0 : index
    %13 = vector.load %arg2[%c2_13, %c0_14, %c0_15] : memref<9x32x64xbf16, #tpu.memory_space<vmem>>, vector<1x32x64xbf16>
    %14 = vector.shape_cast %13 : vector<1x32x64xbf16> to vector<32x64xbf16>
    %cst_16 = arith.constant dense<0.000000e+00> : vector<192x64xf32>
    %15 = tpu.matmul %12, %14, %cst_16 {dimension_numbers = #tpu.dot_dimension_numbers<[1], [0], [0], [1], [0, 0, 1, 1], [], []>} : vector<192x32xbf16>, vector<32x64xbf16>, vector<192x64xf32> -> vector<192x64xf32>
    %16 = arith.addf %10, %15 : vector<192x64xf32>
    %c0_17 = arith.constant 0 : index
    %c16 = arith.constant 16 : index
    %c0_18 = arith.constant 0 : index
    %17 = vector.load %arg1[%c0_17, %c16, %c0_18] : memref<1x232x32xbf16, #tpu.memory_space<vmem>>, vector<1x192x32xbf16>
    %18 = vector.shape_cast %17 : vector<1x192x32xbf16> to vector<192x32xbf16>
    %c3 = arith.constant 3 : index
    %c0_19 = arith.constant 0 : index
    %c0_20 = arith.constant 0 : index
    %19 = vector.load %arg2[%c3, %c0_19, %c0_20] : memref<9x32x64xbf16, #tpu.memory_space<vmem>>, vector<1x32x64xbf16>
    %20 = vector.shape_cast %19 : vector<1x32x64xbf16> to vector<32x64xbf16>
    %cst_21 = arith.constant dense<0.000000e+00> : vector<192x64xf32>
    %21 = tpu.matmul %18, %20, %cst_21 {dimension_numbers = #tpu.dot_dimension_numbers<[1], [0], [0], [1], [0, 0, 1, 1], [], []>} : vector<192x32xbf16>, vector<32x64xbf16>, vector<192x64xf32> -> vector<192x64xf32>
    %22 = arith.addf %16, %21 : vector<192x64xf32>
    %c0_22 = arith.constant 0 : index
    %c17 = arith.constant 17 : index
    %c0_23 = arith.constant 0 : index
    %23 = vector.load %arg1[%c0_22, %c17, %c0_23] : memref<1x232x32xbf16, #tpu.memory_space<vmem>>, vector<1x192x32xbf16>
    %24 = vector.shape_cast %23 : vector<1x192x32xbf16> to vector<192x32xbf16>
    %c4 = arith.constant 4 : index
    %c0_24 = arith.constant 0 : index
    %c0_25 = arith.constant 0 : index
    %25 = vector.load %arg2[%c4, %c0_24, %c0_25] : memref<9x32x64xbf16, #tpu.memory_space<vmem>>, vector<1x32x64xbf16>
    %26 = vector.shape_cast %25 : vector<1x32x64xbf16> to vector<32x64xbf16>
    %cst_26 = arith.constant dense<0.000000e+00> : vector<192x64xf32>
    %27 = tpu.matmul %24, %26, %cst_26 {dimension_numbers = #tpu.dot_dimension_numbers<[1], [0], [0], [1], [0, 0, 1, 1], [], []>} : vector<192x32xbf16>, vector<32x64xbf16>, vector<192x64xf32> -> vector<192x64xf32>
    %28 = arith.addf %22, %27 : vector<192x64xf32>
    %c0_27 = arith.constant 0 : index
    %c18 = arith.constant 18 : index
    %c0_28 = arith.constant 0 : index
    %29 = vector.load %arg1[%c0_27, %c18, %c0_28] : memref<1x232x32xbf16, #tpu.memory_space<vmem>>, vector<1x192x32xbf16>
    %30 = vector.shape_cast %29 : vector<1x192x32xbf16> to vector<192x32xbf16>
    %c5 = arith.constant 5 : index
    %c0_29 = arith.constant 0 : index
    %c0_30 = arith.constant 0 : index
    %31 = vector.load %arg2[%c5, %c0_29, %c0_30] : memref<9x32x64xbf16, #tpu.memory_space<vmem>>, vector<1x32x64xbf16>
    %32 = vector.shape_cast %31 : vector<1x32x64xbf16> to vector<32x64xbf16>
    %cst_31 = arith.constant dense<0.000000e+00> : vector<192x64xf32>
    %33 = tpu.matmul %30, %32, %cst_31 {dimension_numbers = #tpu.dot_dimension_numbers<[1], [0], [0], [1], [0, 0, 1, 1], [], []>} : vector<192x32xbf16>, vector<32x64xbf16>, vector<192x64xf32> -> vector<192x64xf32>
    %34 = arith.addf %28, %33 : vector<192x64xf32>
    %c0_32 = arith.constant 0 : index
    %c32 = arith.constant 32 : index
    %c0_33 = arith.constant 0 : index
    %35 = vector.load %arg1[%c0_32, %c32, %c0_33] : memref<1x232x32xbf16, #tpu.memory_space<vmem>>, vector<1x192x32xbf16>
    %36 = vector.shape_cast %35 : vector<1x192x32xbf16> to vector<192x32xbf16>
    %c6 = arith.constant 6 : index
    %c0_34 = arith.constant 0 : index
    %c0_35 = arith.constant 0 : index
    %37 = vector.load %arg2[%c6, %c0_34, %c0_35] : memref<9x32x64xbf16, #tpu.memory_space<vmem>>, vector<1x32x64xbf16>
    %38 = vector.shape_cast %37 : vector<1x32x64xbf16> to vector<32x64xbf16>
    %cst_36 = arith.constant dense<0.000000e+00> : vector<192x64xf32>
    %39 = tpu.matmul %36, %38, %cst_36 {dimension_numbers = #tpu.dot_dimension_numbers<[1], [0], [0], [1], [0, 0, 1, 1], [], []>} : vector<192x32xbf16>, vector<32x64xbf16>, vector<192x64xf32> -> vector<192x64xf32>
    %40 = arith.addf %34, %39 : vector<192x64xf32>
    %c0_37 = arith.constant 0 : index
    %c33 = arith.constant 33 : index
    %c0_38 = arith.constant 0 : index
    %41 = vector.load %arg1[%c0_37, %c33, %c0_38] : memref<1x232x32xbf16, #tpu.memory_space<vmem>>, vector<1x192x32xbf16>
    %42 = vector.shape_cast %41 : vector<1x192x32xbf16> to vector<192x32xbf16>
    %c7 = arith.constant 7 : index
    %c0_39 = arith.constant 0 : index
    %c0_40 = arith.constant 0 : index
    %43 = vector.load %arg2[%c7, %c0_39, %c0_40] : memref<9x32x64xbf16, #tpu.memory_space<vmem>>, vector<1x32x64xbf16>
    %44 = vector.shape_cast %43 : vector<1x32x64xbf16> to vector<32x64xbf16>
    %cst_41 = arith.constant dense<0.000000e+00> : vector<192x64xf32>
    %45 = tpu.matmul %42, %44, %cst_41 {dimension_numbers = #tpu.dot_dimension_numbers<[1], [0], [0], [1], [0, 0, 1, 1], [], []>} : vector<192x32xbf16>, vector<32x64xbf16>, vector<192x64xf32> -> vector<192x64xf32>
    %46 = arith.addf %40, %45 : vector<192x64xf32>
    %c0_42 = arith.constant 0 : index
    %c34 = arith.constant 34 : index
    %c0_43 = arith.constant 0 : index
    %47 = vector.load %arg1[%c0_42, %c34, %c0_43] : memref<1x232x32xbf16, #tpu.memory_space<vmem>>, vector<1x192x32xbf16>
    %48 = vector.shape_cast %47 : vector<1x192x32xbf16> to vector<192x32xbf16>
    %c8 = arith.constant 8 : index
    %c0_44 = arith.constant 0 : index
    %c0_45 = arith.constant 0 : index
    %49 = vector.load %arg2[%c8, %c0_44, %c0_45] : memref<9x32x64xbf16, #tpu.memory_space<vmem>>, vector<1x32x64xbf16>
    %50 = vector.shape_cast %49 : vector<1x32x64xbf16> to vector<32x64xbf16>
    %cst_46 = arith.constant dense<0.000000e+00> : vector<192x64xf32>
    %51 = tpu.matmul %48, %50, %cst_46 {dimension_numbers = #tpu.dot_dimension_numbers<[1], [0], [0], [1], [0, 0, 1, 1], [], []>} : vector<192x32xbf16>, vector<32x64xbf16>, vector<192x64xf32> -> vector<192x64xf32>
    %52 = arith.addf %46, %51 : vector<192x64xf32>
    %c0_47 = arith.constant 0 : index
    %c0_48 = arith.constant 0 : index
    %53 = vector.load %arg3[%c0_47, %c0_48] : memref<1x64xf32, #tpu.memory_space<vmem>>, vector<1x64xf32>
    %54 = vector.broadcast %53 : vector<1x64xf32> to vector<192x64xf32>
    %55 = arith.addf %52, %54 : vector<192x64xf32>
    %cst_49 = arith.constant 0.000000e+00 : f32
    %56 = vector.broadcast %cst_49 : f32 to vector<192x64xf32>
    %57 = arith.maximumf %55, %56 : vector<192x64xf32>
    %58 = arith.truncf %57 : vector<192x64xf32> to vector<192x64xbf16>
    %c0_50 = arith.constant 0 : index
    %c0_51 = arith.constant 0 : index
    %c0_52 = arith.constant 0 : index
    %59 = vector.load %arg4[%c0_50, %c0_51, %c0_52] : memref<4x36x192xbf16, #tpu.memory_space<vmem>>, vector<1x36x192xbf16>
    %60 = vector.shape_cast %59 : vector<1x36x192xbf16> to vector<36x192xbf16>
    %cst_53 = arith.constant dense<0.000000e+00> : vector<36x64xf32>
    %61 = tpu.matmul %60, %58, %cst_53 {dimension_numbers = #tpu.dot_dimension_numbers<[1], [0], [0], [1], [0, 0, 1, 1], [], []>} : vector<36x192xbf16>, vector<192x64xbf16>, vector<36x64xf32> -> vector<36x64xf32>
    %c1_54 = arith.constant 1 : index
    %c0_55 = arith.constant 0 : index
    %c0_56 = arith.constant 0 : index
    %62 = vector.load %arg4[%c1_54, %c0_55, %c0_56] : memref<4x36x192xbf16, #tpu.memory_space<vmem>>, vector<1x36x192xbf16>
    %63 = vector.shape_cast %62 : vector<1x36x192xbf16> to vector<36x192xbf16>
    %cst_57 = arith.constant dense<0.000000e+00> : vector<36x64xf32>
    %64 = tpu.matmul %63, %58, %cst_57 {dimension_numbers = #tpu.dot_dimension_numbers<[1], [0], [0], [1], [0, 0, 1, 1], [], []>} : vector<36x192xbf16>, vector<192x64xbf16>, vector<36x64xf32> -> vector<36x64xf32>
    %65 = arith.maximumf %61, %64 : vector<36x64xf32>
    %c2_58 = arith.constant 2 : index
    %c0_59 = arith.constant 0 : index
    %c0_60 = arith.constant 0 : index
    %66 = vector.load %arg4[%c2_58, %c0_59, %c0_60] : memref<4x36x192xbf16, #tpu.memory_space<vmem>>, vector<1x36x192xbf16>
    %67 = vector.shape_cast %66 : vector<1x36x192xbf16> to vector<36x192xbf16>
    %cst_61 = arith.constant dense<0.000000e+00> : vector<36x64xf32>
    %68 = tpu.matmul %67, %58, %cst_61 {dimension_numbers = #tpu.dot_dimension_numbers<[1], [0], [0], [1], [0, 0, 1, 1], [], []>} : vector<36x192xbf16>, vector<192x64xbf16>, vector<36x64xf32> -> vector<36x64xf32>
    %69 = arith.maximumf %65, %68 : vector<36x64xf32>
    %c3_62 = arith.constant 3 : index
    %c0_63 = arith.constant 0 : index
    %c0_64 = arith.constant 0 : index
    %70 = vector.load %arg4[%c3_62, %c0_63, %c0_64] : memref<4x36x192xbf16, #tpu.memory_space<vmem>>, vector<1x36x192xbf16>
    %71 = vector.shape_cast %70 : vector<1x36x192xbf16> to vector<36x192xbf16>
    %cst_65 = arith.constant dense<0.000000e+00> : vector<36x64xf32>
    %72 = tpu.matmul %71, %58, %cst_65 {dimension_numbers = #tpu.dot_dimension_numbers<[1], [0], [0], [1], [0, 0, 1, 1], [], []>} : vector<36x192xbf16>, vector<192x64xbf16>, vector<36x64xf32> -> vector<36x64xf32>
    %73 = arith.maximumf %69, %72 : vector<36x64xf32>
    %74 = arith.truncf %73 : vector<36x64xf32> to vector<36x64xbf16>
    %c0_66 = arith.constant 0 : index
    %c0_67 = arith.constant 0 : index
    %c0_68 = arith.constant 0 : index
    %75 = vector.load %arg5[%c0_66, %c0_67, %c0_68] : memref<1x44x64xbf16, #tpu.memory_space<vmem>>, vector<1x36x64xbf16>
    %76 = vector.shape_cast %75 : vector<1x36x64xbf16> to vector<36x64xbf16>
    %77 = vector.shape_cast %74 : vector<36x64xbf16> to vector<1x36x64xbf16>
    tpu.vector_store %arg5[%c0_66, %c0_67, %c0_68], %77 {strides = array<i32>} : memref<1x44x64xbf16, #tpu.memory_space<vmem>>, vector<1x36x64xbf16>,
    %cst_69 = arith.constant 0.000000e+00 : bf16
    %78 = vector.broadcast %cst_69 : bf16 to vector<8x64xbf16>
    %c0_70 = arith.constant 0 : index
    %c36 = arith.constant 36 : index
    %c0_71 = arith.constant 0 : index
    %79 = vector.load %arg5[%c0_70, %c36, %c0_71] : memref<1x44x64xbf16, #tpu.memory_space<vmem>>, vector<1x8x64xbf16>
    %80 = vector.shape_cast %79 : vector<1x8x64xbf16> to vector<8x64xbf16>
    %81 = vector.shape_cast %78 : vector<8x64xbf16> to vector<1x8x64xbf16>
    tpu.vector_store %arg5[%c0_70, %c36, %c0_71], %81 {strides = array<i32>} : memref<1x44x64xbf16, #tpu.memory_space<vmem>>, vector<1x8x64xbf16>,
    return
  }
  func.func @transform_0(%arg0: i32) -> (i32, i32, i32) {
    %c0_i32 = arith.constant 0 : i32
    %c0_i32_0 = arith.constant 0 : i32
    %c0_i32_1 = arith.constant 0 : i32
    return %arg0, %c0_i32, %c0_i32_0 : i32, i32, i32
  }
  func.func @transform_1(%arg0: i32) -> (i32, i32, i32) {
    %c0_i32 = arith.constant 0 : i32
    %c0_i32_0 = arith.constant 0 : i32
    %c0_i32_1 = arith.constant 0 : i32
    %c0_i32_2 = arith.constant 0 : i32
    return %c0_i32, %c0_i32_0, %c0_i32_1 : i32, i32, i32
  }
  func.func @transform_2(%arg0: i32) -> (i32, i32) {
    %c0_i32 = arith.constant 0 : i32
    %c0_i32_0 = arith.constant 0 : i32
    %c0_i32_1 = arith.constant 0 : i32
    return %c0_i32, %c0_i32_0 : i32, i32
  }
  func.func @transform_3(%arg0: i32) -> (i32, i32, i32) {
    %c0_i32 = arith.constant 0 : i32
    %c0_i32_0 = arith.constant 0 : i32
    %c0_i32_1 = arith.constant 0 : i32
    %c0_i32_2 = arith.constant 0 : i32
    return %c0_i32, %c0_i32_0, %c0_i32_1 : i32, i32, i32
  }
  func.func @transform_4(%arg0: i32) -> (i32, i32, i32) {
    %c0_i32 = arith.constant 0 : i32
    %c0_i32_0 = arith.constant 0 : i32
    %c0_i32_1 = arith.constant 0 : i32
    return %arg0, %c0_i32, %c0_i32_0 : i32, i32, i32
  }
}

module attributes {stable_mosaic.version = 11 : i64} {
  func.func @_mlp_head_kernel(%arg0: memref<2x256xbf16, #tpu.memory_space<vmem>>, %arg1: memref<256x128xbf16, #tpu.memory_space<vmem>>, %arg2: memref<1x128xf32, #tpu.memory_space<vmem>>, %arg3: memref<128x128xbf16, #tpu.memory_space<vmem>>, %arg4: memref<1x128xf32, #tpu.memory_space<vmem>>, %arg5: memref<2x128xf32, #tpu.memory_space<vmem>>) attributes {dimension_semantics = [], scalar_prefetch = 0 : i64, scratch_operands = 0 : i64, tpu.core_type = #tpu.core_type<tc>} {
    %c0 = arith.constant 0 : index
    %c0_0 = arith.constant 0 : index
    %0 = vector.load %arg0[%c0, %c0_0] : memref<2x256xbf16, #tpu.memory_space<vmem>>, vector<2x256xbf16>
    %c0_1 = arith.constant 0 : index
    %c0_2 = arith.constant 0 : index
    %1 = vector.load %arg1[%c0_1, %c0_2] : memref<256x128xbf16, #tpu.memory_space<vmem>>, vector<256x128xbf16>
    %cst = arith.constant dense<0.000000e+00> : vector<2x128xf32>
    %2 = tpu.matmul %0, %1, %cst {dimension_numbers = #tpu.dot_dimension_numbers<[1], [0], [0], [1], [0, 0, 1, 1], [], []>} : vector<2x256xbf16>, vector<256x128xbf16>, vector<2x128xf32> -> vector<2x128xf32>
    %c0_3 = arith.constant 0 : index
    %c0_4 = arith.constant 0 : index
    %3 = vector.load %arg2[%c0_3, %c0_4] : memref<1x128xf32, #tpu.memory_space<vmem>>, vector<1x128xf32>
    %4 = vector.broadcast %3 : vector<1x128xf32> to vector<2x128xf32>
    %5 = arith.addf %2, %4 : vector<2x128xf32>
    %cst_5 = arith.constant 0.000000e+00 : f32
    %6 = vector.broadcast %cst_5 : f32 to vector<2x128xf32>
    %7 = arith.maximumf %5, %6 : vector<2x128xf32>
    %8 = arith.truncf %7 : vector<2x128xf32> to vector<2x128xbf16>
    %c0_6 = arith.constant 0 : index
    %c0_7 = arith.constant 0 : index
    %9 = vector.load %arg3[%c0_6, %c0_7] : memref<128x128xbf16, #tpu.memory_space<vmem>>, vector<128x128xbf16>
    %cst_8 = arith.constant dense<0.000000e+00> : vector<2x128xf32>
    %10 = tpu.matmul %8, %9, %cst_8 {dimension_numbers = #tpu.dot_dimension_numbers<[1], [0], [0], [1], [0, 0, 1, 1], [], []>} : vector<2x128xbf16>, vector<128x128xbf16>, vector<2x128xf32> -> vector<2x128xf32>
    %c0_9 = arith.constant 0 : index
    %c0_10 = arith.constant 0 : index
    %11 = vector.load %arg4[%c0_9, %c0_10] : memref<1x128xf32, #tpu.memory_space<vmem>>, vector<1x128xf32>
    %12 = vector.broadcast %11 : vector<1x128xf32> to vector<2x128xf32>
    %13 = arith.addf %10, %12 : vector<2x128xf32>
    %c0_11 = arith.constant 0 : index
    %c0_12 = arith.constant 0 : index
    %14 = vector.load %arg5[%c0_11, %c0_12] : memref<2x128xf32, #tpu.memory_space<vmem>>, vector<2x128xf32>
    tpu.vector_store %arg5[%c0_11, %c0_12], %13 {strides = array<i32>} : memref<2x128xf32, #tpu.memory_space<vmem>>, vector<2x128xf32>,
    return
  }
}

</mosaic_0001>

<bundles_post_ra>
// kernel: forward.7
= control target key start
LH: loop header
LB: loop body
LE: loop exit
PB: predicated region body
PF: predicated region fallthrough
CT: control target
= control target key end

     0   :  { %s550_s0 = inlined_call_operand.vmem [shape: bf16[2,256], index: 0, kind: input, shape index: {}]   ;;  %s551_s1 = inlined_call_operand.vmem [shape: bf16[256,128], index: 1, kind: input, shape index: {}]   ;;  %s552_s2 = inlined_call_operand.vmem [shape: f32[1,128], index: 2, kind: input, shape index: {}]   ;;  %s553_s3 = inlined_call_operand.vmem [shape: bf16[128,128], index: 3, kind: input, shape index: {}]   ;;  %s554_s4 = inlined_call_operand.vmem [shape: f32[1,128], index: 4, kind: input, shape index: {}]   ;;  %s555_s5 = inlined_call_operand.hbm [shape: f32[2,128], index: 5, kind: output, shape index: {}]  }
   0x1   :  { %v389_v0 = vld [vmem:[%s551_s1 + $0x38] sm:$0xff]  ;;  %v388_v2 = vld [vmem:[%s551_s1 + $0x30] sm:$0xff]  ;;  %v21_v4 = vld [vmem:[%s550_s0] sm:$0x3] }
   0x2   :  { %v397_v1 = vld [vmem:[%s551_s1 + $0x78] sm:$0xff]  ;;  %160 = vmatpush.bf16.msra.mxu0 %v389_v0  ;;  %v396_v3 = vld [vmem:[%s551_s1 + $0x70] sm:$0xff]  ;;  %v387_v6 = vld [vmem:[%s551_s1 + $0x28] sm:$0xff]  ;;  %59 = vst [vmem:[#allocation1] ss:$9 sm:$0xff] %v21_v4 }
   0x3   :  { %173 = vmatpush.bf16.msra.mxu1 %v397_v1  ;;  %v405_v5 = vld [vmem:[%s553_s3 + $0x38] sm:$0xff]  ;;  %v395_v7 = vld [vmem:[%s551_s1 + $0x68] sm:$0xff]  ;;  %v404_v8 = vld [vmem:[%s553_s3 + $0x30] sm:$0xff] }
   0x4   :  { %256 = vmatpush.bf16.msra.mxu2 %v405_v5 }
   0x6   :  { %161 = vmatpush.bf16.msra.mxu0 %v388_v2 }
   0x7   :  { %174 = vmatpush.bf16.msra.mxu1 %v396_v3 }
   0x8   :  { %10 = vsyncpa [#allocation3], 0  ;;  %v386_v9 = vld [vmem:[%s551_s1 + $0x20] sm:$0xff]  ;;  %257 = vmatpush.bf16.msra.mxu2 %v404_v8  ;;  %v403_v11 = vld [vmem:[%s553_s3 + $0x28] sm:$0xff]  ;;  %s435_s19 = smov [#allocation2]   ;;  %s277_s22 = sshll.u32 %s555_s5, 4  ;;  %s278_s22 = int_to_ptr.hbm [resolvable:$true] %s277_s22 }
   0x9   :  { %v394_v10 = vld [vmem:[%s551_s1 + $0x60] sm:$0xff]  ;;  %v385_v12 = vld [vmem:[%s551_s1 + $0x18] sm:$0xff]  ;;  %v384_v15 = vld [vmem:[%s551_s1 + $0x10] sm:$0xff] }
   0xa   :  { %162 = vmatpush.bf16.msra.mxu0 %v387_v6  ;;  %v393_v13 = vld [vmem:[%s551_s1 + $0x58] sm:$0xff]  ;;  %v402_v14 = vld [vmem:[%s553_s3 + $0x20] sm:$0xff]  ;;  %v392_v16 = vld [vmem:[%s551_s1 + $0x50] sm:$0xff] }
   0xb   :  { %175 = vmatpush.bf16.msra.mxu1 %v395_v7  ;;  %v401_v17 = vld [vmem:[%s553_s3 + $0x18] sm:$0xff]  ;;  %v383_v18 = vld [vmem:[%s551_s1 + $0x8] sm:$0xff]  ;;  %v400_v20 = vld [vmem:[%s553_s3 + $0x10] sm:$0xff] }
   0xc   :  { %258 = vmatpush.bf16.msra.mxu2 %v403_v11  ;;  %v391_v19 = vld [vmem:[%s551_s1 + $0x48] sm:$0xff]  ;;  %v382_v21 = vld [vmem:[%s551_s1] sm:$0xff] }
   0xd   :  { %v390_v22 = vld [vmem:[%s551_s1 + $0x40] sm:$0xff]  ;;  %v61_v24 = vld [vmem:[#allocation1 + $0x9] sm:$0xff] }
   0xe   :  { %163 = vmatpush.bf16.msra.mxu0 %v386_v9  ;;  %v60_v23 = vld [vmem:[#allocation1] sm:$0xff]  ;;  %v399_v25 = vld [vmem:[%s553_s3 + $0x8] sm:$0xff] }
   0xf   :  { %176 = vmatpush.bf16.msra.mxu1 %v394_v10  ;;  %v398_v26 = vld [vmem:[%s553_s3] sm:$0xff]  ;;  %s275_s3 = sshll.u32 %s435_s19, 4  ;;  %s276_s3 = int_to_ptr.vmem [resolvable:$true] %s275_s3 }
  0x10   :  { %259 = vmatpush.bf16.msra.mxu2 %v402_v14  ;;  %v407_v27 = vld [vmem:[%s552_s2] ss:$0 sm:$0xff] }
  0x11   :  { %v408_v36 = vld [vmem:[%s554_s4] ss:$0 sm:$0xff] }
  0x12   :  { %164 = vmatpush.bf16.msra.mxu0 %v385_v12 }
  0x13   :  { %177 = vmatpush.bf16.msra.mxu1 %v393_v13 }
  0x14   :  { %260 = vmatpush.bf16.msra.mxu2 %v401_v17 }
  0x16   :  { %165 = vmatpush.bf16.msra.mxu0 %v384_v15 }
  0x17   :  { %178 = vmatpush.bf16.msra.mxu1 %v392_v16 }
  0x18   :  { %261 = vmatpush.bf16.msra.mxu2 %v400_v20 }
  0x1a   :  { %166 = vmatpush.bf16.msra.mxu0 %v383_v18 }
  0x1b   :  { %179 = vmatpush.bf16.msra.mxu1 %v391_v19 }
  0x1c   :  { %262 = vmatpush.bf16.msra.mxu2 %v399_v25 }
  0x1e   :  { %167 = vmatpush.bf16.msra.mxu0 %v382_v21 }
  0x1f   :  { %180 = vmatpush.bf16.msra.mxu1 %v390_v22 }
  0x20   :  { %263 = vmatpush.bf16.msra.mxu2 %v398_v26 }
  0x21   :  { %168 = vmatmul.bf16.vlgmr.msra.gmra.mxu0 %v60_v23 }
  0x22   :  { %181 = vmatmul.bf16.vlgmr.msra.gmra.mxu1 %v61_v24 }
  0x9e   :  { %v169_v28 = vpop.f32.mrf.mxu0 }
  0x9f   :  { %v182_v29 = vpop.f32.mrf.mxu1  ;;  %v170_v30 = vadd.f32 %v407_v27, %v169_v28 }
  0xa1   :  { %v183_v31 = vadd.f32 %v182_v29, %v170_v30 }
  0xa3   :  { %v186_v32 = vmax.f32 %v183_v31, 0.0 }
  0xa5   :  { %v187_v33 = vpack.c.bf16 %v186_v32, %v186_v32 }
  0xa6   :  { %v171_v34 = vpop.f32.mrf.mxu0 }
  0xa7   :  { %v184_v35 = vpop.f32.mrf.mxu1  ;;  %264 = vmatmul.bf16.vlgmr.msra.gmra.mxu2 %v187_v33 }
 0x12a   :  { %v265_v37 = vpop.f32.mrf.mxu2 }
 0x12b   :  { %v266_v38 = vadd.f32 %v408_v36, %v265_v37 }
 0x12d   :  { %269 = vst [vmem:[#allocation2] sm:$0x3] %v266_v38 }
 0x12e   :  { %280 = dma.vmem_to_hbm [thread:$0]  %s276_s3, 32, %s278_s22, [#allocation3]  }
 0x132   :  { %v267_v39 = vpop.f32.mrf.mxu2 }
 0x133   :  { %433 = dma.done.wait [#allocation3], 32  }
 0x134   :  { %434 = vsyncadd [#allocation3], 4294967264 }
 0x135   :  { %285 = vsyncpa [#allocation3], 1 }

// kernel: forward.6
= control target key start
LH: loop header
LB: loop body
LE: loop exit
PB: predicated region body
PF: predicated region fallthrough
CT: control target
= control target key end

     0   :  { %s1329_s15 = smov 0   ;;  %s1553_s0 = inlined_call_operand.vmem [shape: bf16[2,44,64], index: 0, kind: input, shape index: {}]   ;;  %s1554_s1 = inlined_call_operand.vmem [shape: bf16[9,64,64], index: 1, kind: input, shape index: {}]   ;;  %s1555_s2 = inlined_call_operand.vmem [shape: f32[1,64], index: 2, kind: input, shape index: {}]   ;;  %s1556_s3 = inlined_call_operand.vmem [shape: bf16[4,4,24], index: 3, kind: input, shape index: {}]   ;;  %s1557_s4 = inlined_call_operand.vmem [shape: bf16[2,4,64], index: 4, kind: output, shape index: {}]  }
   0x1 LB: > { %s999_s16 = sadd.s32 4294967295, %s1302_s15   ;;  %p1003_p0 = scmp.ge.s32.totalorder %s1302_s15, 1  ;;  %s1302_s15 = sphi %s1329_s15, %s14_s15  }
   0x2   : > { %p162_p1 = scmp.lt.s32.totalorder %s1302_s15, 3 }
   0x4   : > { %p163_p2 = pnand %p1003_p0, %p162_p1 }
   0x5   : > { %p187_p3 = scmp.lt.s32.totalorder (!%p163_p2), %s999_s16, 1 }
   0x6   : > { %166 = sbr.rel (%p163_p2) target bundleno = 399 (0x18f), region = 36 }
   0xb   : > { %v1248_v0 = vld [vmem:[%s1554_s1 + $0x38] sm:$0xff]  ;;  %v1247_v4 = vld [vmem:[%s1554_s1 + $0x30] sm:$0xff]  ;;  %s1559_s16 = smov (!%p187_p3, %s999_s16), 1  ;;  %v1246_v8 = vld [vmem:[%s1554_s1 + $0x28] sm:$0xff]  ;;  %vm354_vm0 = vcmask 1046528   ;;  %vm426_vm2 = vcmask 1044480  }
   0xc   : > { %v1244_v1 = vld [vmem:[%s1554_s1 + $0x18] sm:$0xff]  ;;  %279 = vmatpush.bf16.msra.mxu0 %v1248_v0  ;;  %v1243_v5 = vld [vmem:[%s1554_s1 + $0x10] sm:$0xff]  ;;  %s1286_s7 = smul.u32 24, %s1559_s16  ;;  %v1242_v9 = vld [vmem:[%s1554_s1 + $0x8] sm:$0xff]  ;;  %vm228_vm1 = vsmask.f32 7424 }
   0xd   : > { %v1252_v2 = vld [vmem:[%s1554_s1 + $0x58] sm:$0xff]  ;;  %327 = vmatpush.bf16.msra.mxu1 %v1244_v1  ;;  %v1251_v6 = vld [vmem:[%s1554_s1 + $0x50] sm:$0xff]  ;;  %v1250_v10 = vld [vmem:[%s1554_s1 + $0x48] sm:$0xff]  ;;  %vm268_vm3 = vcmask 523264   ;;  %vm494_vm4 = vsmask.f32 4352 }
   0xe   : > { %v1256_v3 = vld [vmem:[%s1554_s1 + $0x78] sm:$0xff]  ;;  %392 = vmatpush.bf16.msra.mxu2 %v1252_v2  ;;  %v1255_v7 = vld [vmem:[%s1554_s1 + $0x70] sm:$0xff]  ;;  %v1254_v11 = vld [vmem:[%s1554_s1 + $0x68] sm:$0xff]  ;;  %s1379_s20 = scalar_lea.vmem %s1553_s0, %s1286_s7  ;;  %vm648_vm5 = vcmask 1045504   ;;  %vm716_vm6 = vsmask.f32 5376 }
   0xf   : > { %464 = vmatpush.bf16.msra.mxu3 %v1256_v3  ;;  %v1278_v12 = vld [vmem:[%s1379_s20] sm:$0xff]   ;;  %v1383_v13 = vld [vmem:[%s1379_s20 + $0x8] sm:$0xff]   ;;  %v1260_v38 = vld [vmem:[%s1554_s1 + $0x98] sm:$0xff]  ;;  %vm869_vm7 = vcmask 1043456   ;;  %vm865_vm8 = vcmask 195584   ;;  %s1005_s6 = sshll.u32 %s1559_s16, 1 }
  0x10   : > { %280 = vmatpush.bf16.msra.mxu0 %v1247_v4  ;;  %v208_v14 = vld [vmem:[%s1379_s20 + $0xc] sm:$0x1]  ;;  %v1387_v15 = vunpack.c.l.b16 %v1383_v13  ;;  %v230_v17 = vshrl.u32 %v1278_v12, 16  ;;  %v232_v18 = vshll.u32 %v1278_v12, 16  ;;  %v341_v19 = vld [vmem:[%s1379_s20] sm:$0xe]  ;;  %v1391_v21 = vunpack.c.h.b16 %v1278_v12  ;;  %s195_s9 = scalar_lea.vmem %s1557_s4, %s1005_s6 }
  0x11   : > { %328 = vmatpush.bf16.msra.mxu1 %v1243_v5  ;;  %v225_v16 = vunpack.c.l.b16 %v208_v14  ;;  %v409_v20 = vld [vmem:[%s1379_s20] sm:$0x8]  ;;  %v352_v22 = vunpack.c.l.b16 %v341_v19  ;;  %v410_v23 = vld [vmem:[%s1379_s20 + $0xc] sm:$0x7]  ;;  %v1268_v39 = vld [vmem:[%s1554_s1 + $0xd8] sm:$0xff]  ;;  %v492_v63 = vunpack.c.h.b16 %v1383_v13  ;;  %vm944_vm9 = vcmask 517120  }
  0x12   : > { %393 = vmatpush.bf16.msra.mxu2 %v1251_v6  ;;  %v422_v24 = vunpack.c.l.b16 %v409_v20  ;;  %v1245_v25 = vld [vmem:[%s1554_s1 + $0x20] sm:$0xff]  ;;  %v234_v28 = vrot.slane %v232_v18, 1  ;;  %v423_v29 = vunpack.c.l.b16 %v410_v23  ;;  %v1264_v45 = vld [vmem:[%s1554_s1 + $0xb8] sm:$0xff]  ;;  %v1259_v49 = vld [vmem:[%s1554_s1 + $0x90] sm:$0xff] }
  0x13   : > { %465 = vmatpush.bf16.msra.mxu3 %v1255_v7  ;;  %v1241_v26 = vld [vmem:[%s1554_s1] sm:$0xff]  ;;  %v1401_v27 = vpack.c.b16 %v225_v16, %v1387_v15  ;;  %v353_v32 = vpack.c.b16 %v1391_v21, %v352_v22  ;;  %v1272_v46 = vld [vmem:[%s1554_s1 + $0xf8] sm:$0xff]  ;;  %v1267_v50 = vld [vmem:[%s1554_s1 + $0xd0] sm:$0xff]  ;;  %v293_v7 = vpack.c.b16 %v1387_v15, %v1387_v15  ;;  %v504_v16 = vshrl.u32 %v1383_v13, 16 }
  0x14   : > { %281 = vmatpush.bf16.msra.mxu0 %v1246_v8  ;;  %v1249_v30 = vld [vmem:[%s1554_s1 + $0x40] sm:$0xff]  ;;  %v1411_v33 = vpack.c.b16 %v1391_v21, %v422_v24  ;;  %v235_v34 = vor.u32 %v234_v28, %v230_v17  ;;  %v1416_v37 = vpack.c.b16 %v423_v29, %v1387_v15  ;;  %v1263_v51 = vld [vmem:[%s1554_s1 + $0xb0] sm:$0xff]  ;;  %v1258_v53 = vld [vmem:[%s1554_s1 + $0x88] sm:$0xff]  ;;  %v507_v17 = vshll.u32 %v1383_v13, 16 }
  0x15   : > { %329 = vmatpush.bf16.msra.mxu1 %v1242_v9  ;;  %v1253_v31 = vld [vmem:[%s1554_s1 + $0x60] sm:$0xff]  ;;  %v237_v35 = vshll.u32 %v1401_v27, 16  ;;  %v356_v36 = vrot.slane %v1401_v27, 1  ;;  %v355_v40 = vrot.slane %v353_v32, 1  ;;  %v1271_v52 = vld [vmem:[%s1554_s1 + $0xf0] sm:$0xff]  ;;  %v1266_v54 = vld [vmem:[%s1554_s1 + $0xc8] sm:$0xff] }
  0x16   : > { %394 = vmatpush.bf16.msra.mxu2 %v1250_v10  ;;  %v427_v41 = vrot.slane %v1411_v33, 3  ;;  %v428_v43 = vrot.slane %v1416_v37, 3  ;;  %v1262_v55 = vld [vmem:[%s1554_s1 + $0xa8] sm:$0xff]  ;;  %v1257_v57 = vld [vmem:[%s1554_s1 + $0x80] sm:$0xff]  ;;  %v703_v61 = vld [vmem:[%s1379_s20 + $0x10] sm:$0x7] }
  0x17   : > { %466 = vmatpush.bf16.msra.mxu3 %v1254_v11  ;;  %v239_v42 = vrot.slane %v237_v35, 1  ;;  %v357_v44 = vsel %vm354_vm0, %v355_v40, %v356_v36  ;;  %v1270_v56 = vld [vmem:[%s1554_s1 + $0xe8] sm:$0xff]  ;;  %v1265_v58 = vld [vmem:[%s1554_s1 + $0xc0] sm:$0xff]  ;;  %v241_v62 = vshrl.u32 %v1401_v27, 16  ;;  %v714_v5 = vunpack.c.l.b16 %v703_v61  ;;  %v628_v8 = vld [vmem:[%s1379_s20 + $0x10] sm:$0x3] }
  0x18   : > { %282 = vmatpush.bf16.msra.mxu0 %v1245_v25  ;;  %v429_v48 = vsel %vm426_vm2, %v427_v41, %v428_v43  ;;  %v625_v59 = vld [vmem:[%s1379_s20 + $0x4] sm:$0xc]  ;;  %v1472_v60 = vld [vmem:[%s1379_s20 + $0x8] sm:$0xff]   ;;  %v496_v11 = vshrl.u32 %v1411_v33, 16  ;;  %v499_v14 = vshll.u32 %v1411_v33, 16  ;;  %v645_v18 = vunpack.c.l.b16 %v628_v8  ;;  %v1275_v24 = vld [vmem:[%s1554_s1 + $0x110] sm:$0xff] }
  0x19   : > { %330 = vmatpush.bf16.msra.mxu1 %v1241_v26  ;;  %v240_v47 = vsel %vm228_vm1, %v235_v34, %v239_v42  ;;  %v1261_v0 = vld [vmem:[%s1554_s1 + $0xa0] sm:$0xff]  ;;  %v1283_v2 = vunpack.c.l.b16 %v1472_v60  ;;  %v1284_v3 = vunpack.c.h.b16 %v1472_v60  ;;  %v642_v4 = vunpack.c.l.b16 %v625_v59  ;;  %v1274_v34 = vld [vmem:[%s1554_s1 + $0x108] sm:$0xff] }
  0x1a   : > { %395 = vmatpush.bf16.msra.mxu2 %v1249_v30  ;;  %v1269_v1 = vld [vmem:[%s1554_s1 + $0xe0] sm:$0xff]  ;;  %v243_v6 = vor.u32 %v241_v62, %v239_v42  ;;  %v498_v25 = vrot.slane %v496_v11, 3  ;;  %v501_v26 = vrot.slane %v499_v14, 4  ;;  %v506_v27 = vrot.slane %v504_v16, 3 }
  0x1b   : > { %467 = vmatpush.bf16.msra.mxu3 %v1253_v31  ;;  %1030 = vmatmul.msk.bf16.vlgmr.msra.gmra.mxu0 %vm268_vm3, %v240_v47  ;;  %v646_v9 = vpack.c.b16 %v1283_v2, %v642_v4  ;;  %v715_v10 = vpack.c.b16 %v714_v5, %v1284_v3  ;;  %v509_v28 = vrot.slane %v507_v17, 4  ;;  %v647_v29 = vpack.c.b16 %v645_v18, %v1284_v3  ;;  %v1273_v41 = vld [vmem:[%s1554_s1 + $0x100] sm:$0xff] }
  0x1c   : > { %546 = vmatpush.bf16.msrb.mxu0 %v1260_v38  ;;  %1048 = vmatmul.msk.bf16.vlgmr.msra.gmra.mxu1 %vm268_vm3, %v1278_v12  ;;  %v1276_v12 = vld [vmem:[%s1554_s1 + $0x118] sm:$0xff]  ;;  %v502_v35 = vor.u32 %v501_v26, %v498_v25  ;;  %v572_v42 = vpack.c.b16 %v1387_v15, %v1391_v21  ;;  %v785_v47 = vld [vmem:[%s1379_s20 + $0x4] sm:$0x8] }
  0x1d   : > { %1074 = vmatmul.msk.bf16.vlgmr.msra.gmra.mxu2 %vm268_vm3, %v357_v44  ;;  %608 = vmatpush.bf16.msrb.mxu1 %v1264_v45  ;;  %v718_v19 = vshrl.u32 %v646_v9, 16  ;;  %v721_v20 = vshll.u32 %v646_v9, 16  ;;  %v726_v22 = vshrl.u32 %v715_v10, 16  ;;  %v729_v23 = vshll.u32 %v715_v10, 16 }
  0x1e   : > { %686 = vmatpush.bf16.msrb.mxu2 %v1268_v39  ;;  %1100 = vmatmul.msk.bf16.vlgmr.msra.gmra.mxu3 %vm268_vm3, %v429_v48  ;;  %v649_v37 = vrot.slane %v646_v9, 2  ;;  %v650_v38 = vrot.slane %v647_v29, 2  ;;  %v796_v15 = vunpack.c.l.b16 %v785_v47 }
  0x1f   : > { %768 = vmatpush.bf16.msrb.mxu3 %v1272_v46  ;;  %v720_v30 = vrot.slane %v718_v19, 2  ;;  %v723_v31 = vrot.slane %v721_v20, 3  ;;  %v728_v32 = vrot.slane %v726_v22, 2  ;;  %v731_v33 = vrot.slane %v729_v23, 3 }
  0x20   : > { %547 = vmatpush.bf16.msrb.mxu0 %v1259_v49  ;;  %v651_v44 = vsel %vm648_vm5, %v649_v37, %v650_v38  ;;  %v573_v46 = vpack.c.b16 %v492_v63, %v492_v63  ;;  %v797_v21 = vpack.c.b16 %v1283_v2, %v796_v15  ;;  %v799_v49 = vrot.slane %v715_v10, 3 }
  0x21   : > { %609 = vmatpush.bf16.msrb.mxu1 %v1263_v51  ;;  %v724_v39 = vor.u32 %v723_v31, %v720_v30  ;;  %v732_v40 = vor.u32 %v731_v33, %v728_v32 }
  0x22   : > { %687 = vmatpush.bf16.msrb.mxu2 %v1267_v50  ;;  %v798_v48 = vrot.slane %v797_v21, 3 }
  0x23   : > { %769 = vmatpush.bf16.msrb.mxu3 %v1271_v52  ;;  %v733_v45 = vsel %vm716_vm6, %v724_v39, %v732_v40 }
  0x24   : > { %548 = vmatpush.bf16.msrb.mxu0 %v1258_v53  ;;  %v800_v50 = vsel %vm426_vm2, %v798_v48, %v799_v49 }
  0x25   : > { %610 = vmatpush.bf16.msrb.mxu1 %v1262_v55 }
  0x26   : > { %688 = vmatpush.bf16.msrb.mxu2 %v1266_v54 }
  0x27   : > { %770 = vmatpush.bf16.msrb.mxu3 %v1270_v56 }
  0x28   : > { %549 = vmatpush.bf16.msrb.mxu0 %v1257_v57 }
  0x29   : > { %611 = vmatpush.bf16.msrb.mxu1 %v1261_v0 }
  0x2a   : > { %689 = vmatpush.bf16.msrb.mxu2 %v1265_v58 }
  0x2b   : > { %771 = vmatpush.bf16.msrb.mxu3 %v1269_v1  ;;  %1031 = vmatmul.msk.bf16.gmra.mxu0 %vm268_vm3, %v243_v6 }
  0x2c   : > { %1049 = vmatmul.msk.bf16.gmra.mxu1 %vm268_vm3, %v293_v7  ;;  %835 = vmatpush.bf16.msra.mxu0 %v1276_v12 }
  0x2d   : > { %1075 = vmatmul.msk.bf16.gmra.mxu2 %vm268_vm3, %v356_v36  ;;  %v510_v36 = vor.u32 %v509_v28, %v506_v27 }
  0x2e   : > { %1101 = vmatmul.msk.bf16.gmra.mxu3 %vm268_vm3, %v428_v43 }
  0x2f   : > { %v511_v43 = vsel %vm494_vm4, %v502_v35, %v510_v36 }
  0x30   : > { %836 = vmatpush.bf16.msra.mxu0 %v1275_v24 }
  0x34   : > { %837 = vmatpush.bf16.msra.mxu0 %v1274_v34 }
  0x38   : > { %838 = vmatpush.bf16.msra.mxu0 %v1273_v41 }
  0x3b   : > { %1126 = vmatmul.msk.bf16.vlgmr.msrb.gmra.mxu0 %vm268_vm3, %v511_v43 }
  0x3c   : > { %1152 = vmatmul.msk.bf16.vlgmr.msrb.gmra.mxu1 %vm268_vm3, %v572_v42 }
  0x3d   : > { %1178 = vmatmul.msk.bf16.vlgmr.msrb.gmra.mxu2 %vm268_vm3, %v651_v44 }
  0x3e   : > { %1204 = vmatmul.msk.bf16.vlgmr.msrb.gmra.mxu3 %vm268_vm3, %v733_v45 }
  0x4b   : > { %1127 = vmatmul.msk.bf16.gmra.mxu0 %vm268_vm3, %v510_v36 }
  0x4c   : > { %1153 = vmatmul.msk.bf16.gmra.mxu1 %vm268_vm3, %v573_v46  ;;  %v1295_v46 = vld [vmem:[%s1555_s2] ss:$0 sm:$0xff] }
  0x4d   : > { %1179 = vmatmul.msk.bf16.gmra.mxu2 %vm268_vm3, %v650_v38 }
  0x4e   : > { %1205 = vmatmul.msk.bf16.gmra.mxu3 %vm268_vm3, %v732_v40 }
  0x5b   : > { %1230 = vmatmul.msk.bf16.vlgmr.msra.gmra.mxu0 %vm268_vm3, %v800_v50 }
  0x6b   : > { %1231 = vmatmul.msk.bf16.gmra.mxu0 %vm268_vm3, %v799_v49 }
  0x98   : > { %v284_v13 = vpop.f32.mrf.mxu0 }
  0x99   : > { %v332_v51 = vpop.f32.mrf.mxu1 }
  0x9a   : > { %v333_v52 = vadd.f32 %v332_v51, %v284_v13 }
  0xa0   : > { %v397_v53 = vpop.f32.mrf.mxu2  ;;  %v286_v56 = vpop.f32.mrf.mxu0 }
  0xa1   : > { %v469_v54 = vpop.f32.mrf.mxu3  ;;  %v406_v55 = vadd.f32 %v397_v53, %v333_v52  ;;  %v334_v57 = vpop.f32.mrf.mxu1 }
  0xa2   : > { %v335_v22 = vadd.f32 %v334_v57, %v286_v56  ;;  %v864_v56 = vld [vmem:[%s1556_s3] sm:$0x3]  ;;  %v1233_v57 = vld [vmem:[%s1556_s3 + $0x2] sm:$0x3] }
  0xa3   : > { %v478_v58 = vadd.f32 %v469_v54, %v406_v55 }
  0xa8   : > { %v399_v59 = vpop.f32.mrf.mxu2  ;;  %v289_v61 = vpop.f32.mrf.mxu0 }
  0xa9   : > { %v471_v60 = vpop.f32.mrf.mxu3  ;;  %v337_v62 = vpop.f32.mrf.mxu1  ;;  %v407_v24 = vadd.f32 %v399_v59, %v335_v22  ;;  %v1237_v59 = vld [vmem:[%s1556_s3 + $0x6] sm:$0x3] }
  0xaa   : > { %v338_v23 = vadd.f32 %v337_v62, %v289_v61 }
  0xab   : > { %v479_v29 = vadd.f32 %v471_v60, %v407_v24 }
  0xb0   : > { %v402_v63 = vpop.f32.mrf.mxu2  ;;  %v291_v1 = vpop.f32.mrf.mxu0 }
  0xb1   : > { %v474_v0 = vpop.f32.mrf.mxu3  ;;  %v339_v2 = vpop.f32.mrf.mxu1  ;;  %v408_v25 = vadd.f32 %v402_v63, %v338_v23 }
  0xb3   : > { %v480_v30 = vadd.f32 %v474_v0, %v408_v25 }
  0xb8   : > { %v404_v3 = vpop.f32.mrf.mxu2  ;;  %v551_v5 = vpop.f32.mrf.mxu0 }
  0xb9   : > { %v476_v4 = vpop.f32.mrf.mxu3  ;;  %v613_v6 = vpop.f32.mrf.mxu1  ;;  %v560_v33 = vadd.f32 %v551_v5, %v478_v58  ;;  %v1235_v58 = vld [vmem:[%s1556_s3 + $0x4] sm:$0x3] }
  0xbb   : > { %v622_v37 = vadd.f32 %v613_v6, %v560_v33 }
  0xc0   : > { %v691_v7 = vpop.f32.mrf.mxu2  ;;  %v553_v9 = vpop.f32.mrf.mxu0 }
  0xc1   : > { %v773_v8 = vpop.f32.mrf.mxu3  ;;  %v615_v10 = vpop.f32.mrf.mxu1  ;;  %v561_v31 = vadd.f32 %v553_v9, %v479_v29  ;;  %v700_v40 = vadd.f32 %v691_v7, %v622_v37 }
  0xc3   : > { %v623_v34 = vadd.f32 %v615_v10, %v561_v31  ;;  %v782_v43 = vadd.f32 %v773_v8, %v700_v40 }
  0xc8   : > { %v693_v11 = vpop.f32.mrf.mxu2  ;;  %v556_v14 = vpop.f32.mrf.mxu0 }
  0xc9   : > { %v775_v12 = vpop.f32.mrf.mxu3  ;;  %v618_v16 = vpop.f32.mrf.mxu1  ;;  %v562_v32 = vadd.f32 %v556_v14, %v480_v30  ;;  %v701_v38 = vadd.f32 %v693_v11, %v623_v34 }
  0xcb   : > { %v624_v36 = vadd.f32 %v618_v16, %v562_v32  ;;  %v783_v41 = vadd.f32 %v775_v12, %v701_v38 }
  0xd0   : > { %v696_v17 = vpop.f32.mrf.mxu2  ;;  %v558_v19 = vpop.f32.mrf.mxu0 }
  0xd1   : > { %v778_v18 = vpop.f32.mrf.mxu3  ;;  %v620_v20 = vpop.f32.mrf.mxu1  ;;  %v702_v39 = vadd.f32 %v696_v17, %v624_v36 }
  0xd3   : > { %v784_v42 = vadd.f32 %v778_v18, %v702_v39 }
  0xd8   : > { %v698_v26 = vpop.f32.mrf.mxu2  ;;  %v840_v28 = vpop.f32.mrf.mxu0 }
  0xd9   : > { %v780_v27 = vpop.f32.mrf.mxu3  ;;  %v849_v15 = vadd.f32 %v840_v28, %v782_v43 }
  0xdb   : > { %v856_v50 = vadd.f32 %v1295_v46, %v849_v15 }
  0xdd   : > { %v859_v54 = vmax.f32 %v856_v50, 0.0 }
  0xe0   : > { %v842_v35 = vpop.f32.mrf.mxu0 }
  0xe1   : > { %v850_v44 = vadd.f32 %v842_v35, %v783_v41 }
  0xe3   : > { %v857_v48 = vadd.f32 %v1295_v46, %v850_v44 }
  0xe5   : > { %v860_v51 = vmax.f32 %v857_v48, 0.0 }
  0xe7   : > { %v862_v55 = vpack.c.bf16 %v860_v51, %v859_v54 }
  0xe8   : > { %v845_v45 = vpop.f32.mrf.mxu0 }
  0xe9   : > { %v851_v47 = vadd.f32 %v845_v45, %v784_v42 }
  0xeb   : > { %v858_v21 = vadd.f32 %v1295_v46, %v851_v47 }
  0xed   : > { %v861_v49 = vmax.f32 %v858_v21, 0.0 }
  0xef   : > { %v863_v13 = vpack.c.bf16 %v861_v49, %v861_v49 }
  0xf0   : > { %v847_v52 = vpop.f32.mrf.mxu0 }
  0xf1   : > { %v871_v53 = vsel %vm869_vm7, %v863_v13, 0 }
  0xf2   : > { %879 = vmatpush.bf16.msra.mxu1 %v871_v53  ;;  %897 = vmatpush.bf16.msra.mxu2 %v871_v53 }
  0xf3   : > { %916 = vmatpush.bf16.msra.mxu3 %v871_v53 }
  0xf6   : > { %880 = vmatpush.bf16.msra.mxu1 %v862_v55  ;;  %898 = vmatpush.bf16.msra.mxu2 %v862_v55 }
  0xf7   : > { %917 = vmatpush.bf16.msra.mxu3 %v862_v55 }
  0xf9   : > { %1232 = vmatmul.msk.bf16.vlgmr.msra.gmra.mxu1 %vm865_vm8, %v864_v56  ;;  %1234 = vmatmul.msk.bf16.vlgmr.msra.gmra.mxu2 %vm865_vm8, %v1233_v57 }
  0xfa   : > { %935 = vmatpush.bf16.msrb.mxu1 %v871_v53  ;;  %1236 = vmatmul.msk.bf16.vlgmr.msra.gmra.mxu3 %vm865_vm8, %v1235_v58 }
  0xfe   : > { %936 = vmatpush.bf16.msrb.mxu1 %v862_v55 }
 0x109   : > { %1238 = vmatmul.msk.bf16.vlgmr.msrb.gmra.mxu1 %vm865_vm8, %v1237_v59 }
 0x176   : > { %v882_v60 = vpop.f32.mrf.mxu1 }
 0x17c   : > { %v900_v61 = vpop.f32.mrf.mxu2 }
 0x17d   : > { %v919_v62 = vpop.f32.mrf.mxu3  ;;  %v904_v0 = vmax.f32 %v882_v60, %v900_v61 }
 0x17e   : > { %v884_v63 = vpop.f32.mrf.mxu1 }
 0x17f   : > { %v923_v2 = vmax.f32 %v904_v0, %v919_v62 }
 0x184   : > { %v902_v1 = vpop.f32.mrf.mxu2 }
 0x185   : > { %v921_v3 = vpop.f32.mrf.mxu3 }
 0x186   : > { %v938_v4 = vpop.f32.mrf.mxu1 }
 0x187   : > { %v942_v5 = vmax.f32 %v923_v2, %v938_v4 }
 0x189   : > { %v943_v6 = vpack.c.bf16 %v942_v5, %v942_v5 }
 0x18b   : > { %945 = vst.msk [vmem:[%s195_s9] sm:$0x3] %vm944_vm9, %v943_v6 }
 0x18e   : > { %v940_v7 = vpop.f32.mrf.mxu1 }
 0x18f PF: > { %s14_s15 = sadd.s32 1, %s1302_s15  }
 0x190   : > { %p11_p4 = scmp.ge.s32.totalorder %s14_s15, 4  }
 0x192   :  { %13 = sbr.rel (!%p11_p4) target bundleno = 1 (0x1), region = 77 }

// kernel: forward.4
= control target key start
LH: loop header
LB: loop body
LE: loop exit
PB: predicated region body
PF: predicated region fallthrough
CT: control target
= control target key end

     0   :  { %s3158_s12 = smov 0   ;;  %s4022_s0 = inlined_call_operand.vmem [shape: bf16[2,264,4], index: 0, kind: input, shape index: {}]   ;;  %s4023_s1 = inlined_call_operand.vmem [shape: bf16[9,4,32], index: 1, kind: input, shape index: {}]   ;;  %s4024_s2 = inlined_call_operand.vmem [shape: f32[1,32], index: 2, kind: input, shape index: {}]   ;;  %s4025_s3 = inlined_call_operand.vmem [shape: bf16[2,232,32], index: 3, kind: output, shape index: {}]  }
   0x1 LB: > { %s2613_s13 = sadd.s32 4294967295, %s3135_s12   ;;  %p2617_p0 = scmp.ge.s32.totalorder %s3135_s12, 1  ;;  %s3135_s12 = sphi %s3158_s12, %s13_s12  }
   0x2   : > { %p137_p1 = scmp.lt.s32.totalorder %s3135_s12, 3 }
   0x4   : > { %p138_p2 = pnand %p2617_p0, %p137_p1 }
   0x6   : > { %141 = sbr.rel (%p138_p2) target bundleno = 675 (0x2a3), region = 32 }
   0xb   : > { %v2620_v0 = vld [vmem:[%s4023_s1 + $0x2] sm:$0x3]  ;;  %vm437_vm0 = vcmask 1041408   ;;  %p161_p3 = scmp.lt.s32.totalorder %s2613_s13, 1  ;;  %v2701_v2 = vld [vmem:[%s4023_s1 + $0x4] sm:$0x3] }
   0xc   : > { %v439_v1 = vsel %vm437_vm0, %v2620_v0, 0  ;;  %v200_v3 = vld [vmem:[%s4023_s1] sm:$0x3]  ;;  %v709_v4 = vsel %vm437_vm0, %v2701_v2, 0  ;;  %v2787_v6 = vld [vmem:[%s4023_s1 + $0x8] sm:$0x3] }
   0xd   : > { %3114 = vmatpush.bf16.msra.mxu1 %v439_v1  ;;  %3115 = vmatpush.bf16.msra.mxu2 %v439_v1  ;;  %s4043_s13 = smov (!%p161_p3, %s2613_s13), 1  ;;  %v549_v5 = vsel %vm437_vm0, %v200_v3, 0  ;;  %v1333_v7 = vsel %vm437_vm0, %v2787_v6, 0  ;;  %vm277_vm1 = vsmask.f32 7424  ;;  %vm394_vm2 = vcmask 31744  }
   0xe   : > { %448 = vmatpush.bf16.msra.mxu0 %v439_v1  ;;  %s3117_s22 = smul.u32 132, %s4043_s13  ;;  %3116 = vmatpush.bf16.msra.mxu3 %v439_v1  ;;  %v2716_v45 = vld [vmem:[%s4023_s1 + $0x6] sm:$0x3]  ;;  %vm636_vm3 = vcmask 1046528   ;;  %vm2528_vm4 = vcmask 257024  }
   0xf   : > { %v961_v54 = vsel %vm437_vm0, %v2716_v45, 0  ;;  %s3118_s9 = smul.u32 116, %s4043_s13 }
  0x10   : > { %s3188_s25 = scalar_lea.vmem %s4022_s0, %s3117_s22 }
  0x11   : > { %718 = vmatpush.bf16.msrb.mxu2 %v709_v4  ;;  %558 = vmatpush.bf16.msrb.mxu1 %v549_v5  ;;  %v3191_v8 = vld [vmem:[%s3188_s25 + $0x20] sm:$0xff]  ;;  %v3194_v9 = vld [vmem:[%s3188_s25 + $0x28] sm:$0xff]  ;;  %v3236_v37 = vld [vmem:[%s3188_s25 + $0x30] sm:$0xff]  ;;  %s3796_s14 = scalar_lea.vmem %s4025_s3, %s3118_s9 }
  0x12   : > { %1342 = vmatpush.bf16.msrb.mxu0 %v1333_v7  ;;  %v3197_v10 = vld [vmem:[%s3188_s25 + $0x40] sm:$0xff]  ;;  %v3200_v11 = vld [vmem:[%s3188_s25 + $0x48] sm:$0xff]  ;;  %v310_v14 = vshll.u32 %v3191_v8, 16  ;;  %v314_v15 = vshrl.u32 %v3191_v8, 16  ;;  %v318_v16 = vshll.u32 %v3194_v9, 16  ;;  %v3239_v38 = vld [vmem:[%s3188_s25 + $0x50] sm:$0xff]  ;;  %970 = vmatpush.bf16.msrb.mxu3 %v961_v54 }
  0x13   : > { %v3203_v12 = vld [vmem:[%s3188_s25] sm:$0xff]   ;;  %v3206_v13 = vld [vmem:[%s3188_s25 + $0x8] sm:$0xff]  ;;  %v342_v17 = vshll.u32 %v3197_v10, 16  ;;  %v346_v18 = vshrl.u32 %v3197_v10, 16  ;;  %v350_v19 = vshll.u32 %v3200_v11, 16  ;;  %v3245_v42 = vld [vmem:[%s3188_s25 + $0x10] sm:$0xff] }
  0x14   : > { %v279_v20 = vshrl.u32 %v3203_v12, 16  ;;  %v281_v21 = vshll.u32 %v3203_v12, 16  ;;  %v3216_v22 = vrot.slane %v310_v14, 1  ;;  %v320_v23 = vrot.slane %v318_v16, 1  ;;  %v3224_v31 = vld [vmem:[%s3188_s25 + $0x60] sm:$0xff]  ;;  %v3227_v32 = vld [vmem:[%s3188_s25 + $0x68] sm:$0xff] }
  0x15   : > { %v3218_v24 = vrot.slane %v342_v17, 1  ;;  %v286_v25 = vshll.u32 %v3206_v13, 16  ;;  %v352_v26 = vrot.slane %v350_v19, 1  ;;  %v374_v39 = vshll.u32 %v3224_v31, 16  ;;  %v201_v46 = vld [vmem:[%s3188_s25 + $0x70] sm:$0x1] }
  0x16   : > { %v283_v27 = vrot.slane %v281_v21, 1  ;;  %v316_v28 = vor.u32 %v314_v15, %v3216_v22  ;;  %v378_v40 = vshrl.u32 %v3224_v31, 16  ;;  %v382_v41 = vshll.u32 %v3227_v32, 16  ;;  %v3274_v5 = vld [vmem:[%s3188_s25 + $0x38] sm:$0xff] }
  0x17   : > { %v348_v29 = vor.u32 %v346_v18, %v3218_v24  ;;  %v288_v30 = vrot.slane %v286_v25, 1  ;;  %v3247_v43 = vrot.slane %v374_v39, 1  ;;  %v322_v47 = vshrl.u32 %v3194_v9, 16  ;;  %v3277_v6 = vld [vmem:[%s3188_s25 + $0x58] sm:$0xff] }
  0x18   : > { %v284_v33 = vor.u32 %v283_v27, %v279_v20  ;;  %v321_v34 = vsel %vm277_vm1, %v316_v28, %v320_v23  ;;  %v384_v44 = vrot.slane %v382_v41, 1  ;;  %v326_v48 = vshll.u32 %v3236_v37, 16  ;;  %v3280_v15 = vld [vmem:[%s3188_s25 + $0x18] sm:$0xff]  ;;  %v2854_v41 = vld [vmem:[%s4023_s1 + $0xa] sm:$0x3] }
  0x19   : > { %v353_v35 = vsel %vm277_vm1, %v348_v29, %v352_v26  ;;  %2677 = vmatmul.msk.bf16.vlgmr.msra.gmra.mxu1 %vm394_vm2, %v321_v34  ;;  %v354_v49 = vshrl.u32 %v3200_v11, 16  ;;  %v358_v50 = vshll.u32 %v3239_v38, 16  ;;  %v380_v51 = vor.u32 %v378_v40, %v3247_v43  ;;  %v2940_v40 = vld [vmem:[%s4023_s1 + $0xe] sm:$0x3] }
  0x1a   : > { %2681 = vmatmul.msk.bf16.vlgmr.msra.gmra.mxu2 %vm394_vm2, %v353_v35  ;;  %v289_v36 = vsel %vm277_vm1, %v284_v33, %v288_v30  ;;  %v290_v52 = vshrl.u32 %v3206_v13, 16  ;;  %v294_v53 = vshll.u32 %v3245_v42, 16  ;;  %v261_v55 = vunpack.c.l.b16 %v201_v46  ;;  %v3007_v46 = vld [vmem:[%s4023_s1 + $0x10] sm:$0x3] }
  0x1b   : > { %2673 = vmatmul.msk.bf16.vlgmr.msra.gmra.mxu0 %vm394_vm2, %v289_v36  ;;  %v385_v56 = vsel %vm277_vm1, %v380_v51, %v384_v44  ;;  %v324_v57 = vor.u32 %v322_v47, %v320_v23  ;;  %v328_v58 = vrot.slane %v326_v48, 1  ;;  %v356_v59 = vor.u32 %v354_v49, %v352_v26  ;;  %v2869_v36 = vld [vmem:[%s4023_s1 + $0xc] sm:$0x3] }
  0x1c   : > { %2685 = vmatmul.msk.bf16.vlgmr.msra.gmra.mxu3 %vm394_vm2, %v385_v56  ;;  %v360_v60 = vrot.slane %v358_v50, 1  ;;  %v3263_v61 = vpack.c.b16 %v261_v55, %v261_v55  ;;  %v292_v62 = vor.u32 %v290_v52, %v288_v30  ;;  %v296_v63 = vrot.slane %v294_v53, 1  ;;  %v3037_v48 = vld [vmem:[%s3188_s25 + $0x8] sm:$0xff] }
  0x1d   : > { %v329_v0 = vsel %vm277_vm1, %v324_v57, %v328_v58  ;;  %v386_v2 = vshrl.u32 %v3227_v32, 16  ;;  %v330_v16 = vshrl.u32 %v3236_v37, 16  ;;  %v334_v17 = vshll.u32 %v3274_v5, 16 }
  0x1e   : > { %v361_v1 = vsel %vm277_vm1, %v356_v59, %v360_v60  ;;  %v390_v3 = vshll.u32 %v3263_v61, 16  ;;  %v297_v4 = vsel %vm277_vm1, %v292_v62, %v296_v63  ;;  %v362_v18 = vshrl.u32 %v3239_v38, 16  ;;  %v3103_v59 = vld [vmem:[%s3188_s25] sm:$0xf0]  ;;  %v3330_v62 = vld [vmem:[%s3188_s25 + $0x10] sm:$0xff] }
  0x1f   : > { %v388_v7 = vor.u32 %v386_v2, %v384_v44  ;;  %v366_v19 = vshll.u32 %v3277_v6, 16  ;;  %v298_v21 = vshrl.u32 %v3245_v42, 16  ;;  %v302_v23 = vshll.u32 %v3280_v15, 16 }
  0x20   : > { %v392_v14 = vrot.slane %v390_v3, 1  ;;  %v332_v25 = vor.u32 %v330_v16, %v328_v58  ;;  %v336_v26 = vrot.slane %v334_v17, 1  ;;  %v364_v27 = vor.u32 %v362_v18, %v360_v60  ;;  %v3106_v58 = vld [vmem:[%s3188_s25 + $0x8] sm:$0xff]   ;;  %v3104_v60 = vld [vmem:[%s3188_s25] sm:$0xe]  ;;  %v3343_v17 = vld [vmem:[%s3188_s25 + $0x18] sm:$0xff] }
  0x21   : > { %v368_v28 = vrot.slane %v366_v19, 1  ;;  %v300_v29 = vor.u32 %v298_v21, %v296_v63  ;;  %v304_v30 = vrot.slane %v302_v23, 1  ;;  %v1772_v39 = vsel %vm437_vm0, %v2869_v36, 0  ;;  %v3039_v18 = vld [vmem:[%s3188_s25 + $0x18] sm:$0xff] }
  0x22   : > { %v393_v20 = vsel %vm277_vm1, %v388_v7, %v392_v14  ;;  %v337_v33 = vsel %vm277_vm1, %v332_v25, %v336_v26  ;;  %1781 = vmatpush.bf16.msra.mxu2 %v1772_v39  ;;  %v2144_v44 = vsel %vm437_vm0, %v2940_v40, 0  ;;  %v1520_v45 = vsel %vm437_vm0, %v2854_v41, 0  ;;  %v3371_v39 = vld [vmem:[%s3188_s25 + $0x28] sm:$0xff] }
  0x23   : > { %v369_v34 = vsel %vm277_vm1, %v364_v27, %v368_v28  ;;  %v305_v35 = vsel %vm277_vm1, %v300_v29, %v304_v30  ;;  %2153 = vmatpush.bf16.msra.mxu3 %v2144_v44  ;;  %1529 = vmatpush.bf16.msra.mxu1 %v1520_v45  ;;  %v2331_v47 = vsel %vm437_vm0, %v3007_v46, 0  ;;  %v338_v49 = vshrl.u32 %v3274_v5, 16  ;;  %v3357_v27 = vld [vmem:[%s3188_s25 + $0x20] sm:$0xff]  ;;  %v3041_v40 = vld [vmem:[%s3188_s25 + $0x28] sm:$0xff] }
  0x24   : > { %2340 = vmatpush.bf16.msra.mxu0 %v2331_v47  ;;  %v370_v50 = vshrl.u32 %v3277_v6, 16  ;;  %v306_v51 = vshrl.u32 %v3280_v15, 16  ;;  %v1177_v63 = vshll.u32 %v3106_v58, 16  ;;  %v638_v3 = vrot.slane %v3206_v13, 1 }
  0x25   : > { %v340_v52 = vor.u32 %v338_v49, %v336_v26  ;;  %v1186_v19 = vshrl.u32 %v3330_v62, 16  ;;  %v640_v21 = vrot.slane %v3245_v42, 1  ;;  %v1194_v29 = vshrl.u32 %v3343_v17, 16  ;;  %v3385_v49 = vld [vmem:[%s3188_s25 + $0x30] sm:$0xff] }
  0x26   : > { %v372_v53 = vor.u32 %v370_v50, %v368_v28  ;;  %v308_v54 = vor.u32 %v306_v51, %v304_v30  ;;  %v3040_v28 = vld [vmem:[%s3188_s25 + $0x20] sm:$0xff]  ;;  %v1198_v30 = vshll.u32 %v3357_v27, 16  ;;  %v1202_v41 = vshrl.u32 %v3357_v27, 16  ;;  %v3042_v50 = vld [vmem:[%s3188_s25 + $0x30] sm:$0xff] }
  0x27   : > { %v345_v55 = vsel %vm277_vm1, %v340_v52, %v3218_v24  ;;  %v3105_v24 = vor.u32 %v3104_v60, %v3103_v59  ;;  %v1206_v44 = vshll.u32 %v3371_v39, 16  ;;  %v644_v45 = vrot.slane %v3191_v8, 1  ;;  %v3403_v59 = vld [vmem:[%s3188_s25 + $0x38] sm:$0xff] }
  0x28   : > { %v377_v56 = vsel %vm277_vm1, %v372_v53, %v3247_v43  ;;  %v313_v57 = vsel %vm277_vm1, %v308_v54, %v3216_v22  ;;  %v1175_v43 = vshrl.u32 %v3106_v58, 16  ;;  %v1182_v22 = vshll.u32 %v3330_v62, 16 }
  0x29   : > { %2678 = vmatmul.msk.bf16.gmra.mxu1 %vm394_vm2, %v329_v0  ;;  %v3038_v0 = vld [vmem:[%s3188_s25 + $0x10] sm:$0xff]  ;;  %v637_v2 = vrot.slane %v3105_v24, 1  ;;  %v1208_v47 = vrot.slane %v1206_v44, 1  ;;  %v1210_v51 = vshrl.u32 %v3371_v39, 16  ;;  %v1214_v52 = vshll.u32 %v3385_v49, 16 }
  0x2a   : > { %2682 = vmatmul.msk.bf16.gmra.mxu2 %vm394_vm2, %v361_v1  ;;  %v1179_v1 = vrot.slane %v1177_v63, 1  ;;  %v1184_v7 = vrot.slane %v1182_v22, 1  ;;  %v646_v53 = vrot.slane %v3194_v9, 1  ;;  %v3043_v63 = vld [vmem:[%s3188_s25 + $0x38] sm:$0xff] }
  0x2b   : > { %2674 = vmatmul.msk.bf16.gmra.mxu0 %vm394_vm2, %v297_v4  ;;  %v639_v14 = vsel %vm636_vm3, %v637_v2, %v638_v3  ;;  %v1212_v54 = vor.u32 %v1210_v51, %v1208_v47 }
  0x2c   : > { %2686 = vmatmul.msk.bf16.gmra.mxu3 %vm394_vm2, %v393_v20  ;;  %v1180_v4 = vor.u32 %v1179_v1, %v1175_v43  ;;  %v1190_v20 = vshll.u32 %v3343_v17, 16  ;;  %v1188_v23 = vor.u32 %v1186_v19, %v1184_v7  ;;  %v1218_v43 = vshrl.u32 %v3385_v49, 16  ;;  %v3431_v19 = vld [vmem:[%s3188_s25 + $0x40] sm:$0xff] }
  0x2d   : > { %v1222_v1 = vshll.u32 %v3403_v59, 16 }
  0x2e   : > { %v1185_v16 = vsel %vm277_vm1, %v1180_v4, %v1184_v7  ;;  %v1192_v25 = vrot.slane %v1190_v20, 1 }
  0x2f   : > { %v1224_v2 = vrot.slane %v1222_v1, 1 }
  0x30   : > { %v1193_v26 = vsel %vm277_vm1, %v1188_v23, %v1192_v25  ;;  %v3044_v23 = vld [vmem:[%s3188_s25 + $0x40] sm:$0xff] }
  0x39   : > { %2679 = vmatmul.msk.bf16.gmra.mxu1 %vm394_vm2, %v337_v33  ;;  %v642_v33 = vrot.slane %v3280_v15, 1 }
  0x3a   : > { %2683 = vmatmul.msk.bf16.gmra.mxu2 %vm394_vm2, %v369_v34  ;;  %v1196_v34 = vor.u32 %v1194_v29, %v1192_v25 }
  0x3b   : > { %2675 = vmatmul.msk.bf16.gmra.mxu0 %vm394_vm2, %v305_v35  ;;  %v1200_v35 = vrot.slane %v1198_v30, 1 }
  0x3c   : > { %2773 = vmatmul.msk.bf16.vlgmr.msrb.gmra.mxu3 %vm394_vm2, %v3037_v48 }
  0x3d   : > { %v1201_v36 = vsel %vm277_vm1, %v1196_v34, %v1200_v35  ;;  %v1204_v46 = vor.u32 %v1202_v41, %v1200_v35  ;;  %v3461_v41 = vld [vmem:[%s3188_s25 + $0x48] sm:$0xff] }
  0x3f   : > { %v1209_v48 = vsel %vm277_vm1, %v1204_v46, %v1208_v47  ;;  %v3045_v46 = vld [vmem:[%s3188_s25 + $0x48] sm:$0xff] }
  0x49   : > { %2680 = vmatmul.msk.bf16.gmra.mxu1 %vm394_vm2, %v345_v55  ;;  %v1216_v55 = vrot.slane %v1214_v52, 1 }
  0x4a   : > { %2684 = vmatmul.msk.bf16.gmra.mxu2 %vm394_vm2, %v377_v56  ;;  %v647_v56 = vsel %vm636_vm3, %v644_v45, %v646_v53 }
  0x4b   : > { %2676 = vmatmul.msk.bf16.gmra.mxu0 %vm394_vm2, %v313_v57  ;;  %v1217_v58 = vsel %vm277_vm1, %v1212_v54, %v1216_v55  ;;  %v1220_v22 = vor.u32 %v1218_v43, %v1216_v55  ;;  %v3489_v43 = vld [vmem:[%s3188_s25 + $0x50] sm:$0xff] }
  0x4c   : > { %2774 = vmatmul.msk.bf16.gmra.mxu3 %vm394_vm2, %v3038_v0  ;;  %4029 = vst [vmem:[#allocation3_spill] sm:$0xff] %v3489_v43 }
  0x59   : > { %2687 = vmatmul.msk.bf16.vlgmr.msrb.gmra.mxu1 %vm394_vm2, %v3203_v12  ;;  %v641_v12 = vsel %vm636_vm3, %v638_v3, %v640_v21 }
  0x5a   : > { %2702 = vmatmul.msk.bf16.vlgmr.msrb.gmra.mxu2 %vm394_vm2, %v639_v14 }
  0x5b   : > { %2840 = vmatmul.msk.bf16.vlgmr.msrb.gmra.mxu0 %vm394_vm2, %v1185_v16 }
  0x5c   : > { %2775 = vmatmul.msk.bf16.gmra.mxu3 %vm394_vm2, %v3039_v18  ;;  %v1225_v18 = vsel %vm277_vm1, %v1220_v22, %v1224_v2  ;;  %v3046_v22 = vld [vmem:[%s3188_s25 + $0x50] sm:$0xff] }
  0x69   : > { %2688 = vmatmul.msk.bf16.gmra.mxu1 %vm394_vm2, %v3206_v13  ;;  %v643_v13 = vsel %vm636_vm3, %v640_v21, %v642_v33 }
  0x6a   : > { %2703 = vmatmul.msk.bf16.gmra.mxu2 %vm394_vm2, %v641_v12 }
  0x6b   : > { %2841 = vmatmul.msk.bf16.gmra.mxu0 %vm394_vm2, %v1193_v26  ;;  %v1226_v26 = vshrl.u32 %v3403_v59, 16 }
  0x6c   : > { %2776 = vmatmul.msk.bf16.gmra.mxu3 %vm394_vm2, %v3040_v28  ;;  %v650_v28 = vrot.slane %v3274_v5, 1 }
  0x6d   : > { %v1228_v29 = vor.u32 %v1226_v26, %v1224_v2 }
  0x79   : > { %2689 = vmatmul.msk.bf16.gmra.mxu1 %vm394_vm2, %v3245_v42  ;;  %v645_v42 = vsel %vm636_vm3, %v642_v33, %v644_v45 }
  0x7a   : > { %2704 = vmatmul.msk.bf16.gmra.mxu2 %vm394_vm2, %v643_v13 }
  0x7b   : > { %2842 = vmatmul.msk.bf16.gmra.mxu0 %vm394_vm2, %v1201_v36 }
  0x7c   : > { %2777 = vmatmul.msk.bf16.gmra.mxu3 %vm394_vm2, %v3041_v40 }
  0x89   : > { %2690 = vmatmul.msk.bf16.gmra.mxu1 %vm394_vm2, %v3280_v15 }
  0x8a   : > { %2705 = vmatmul.msk.bf16.gmra.mxu2 %vm394_vm2, %v645_v42 }
  0x8b   : > { %2843 = vmatmul.msk.bf16.gmra.mxu0 %vm394_vm2, %v1209_v48  ;;  %v1234_v48 = vshrl.u32 %v3431_v19, 16 }
  0x8c   : > { %2778 = vmatmul.msk.bf16.gmra.mxu3 %vm394_vm2, %v3042_v50  ;;  %v652_v50 = vrot.slane %v3197_v10, 1 }
  0x96   : > { %v3392_v15 = vpop.f32.mrf.mxu1 }
  0x98   : > { %v3395_v57 = vpop.f32.mrf.mxu0 }
  0x99   : > { %2691 = vmatmul.msk.bf16.gmra.mxu1 %vm394_vm2, %v3191_v8  ;;  %v648_v8 = vrot.slane %v3236_v37, 1 }
  0x9a   : > { %2706 = vmatmul.msk.bf16.gmra.mxu2 %vm394_vm2, %v647_v56  ;;  %v653_v56 = vsel %vm636_vm3, %v650_v28, %v652_v50 }
  0x9b   : > { %2844 = vmatmul.msk.bf16.gmra.mxu0 %vm394_vm2, %v1217_v58  ;;  %v649_v14 = vsel %vm636_vm3, %v646_v53, %v648_v8  ;;  %v651_v13 = vsel %vm636_vm3, %v648_v8, %v650_v28 }
  0x9c   : > { %2779 = vmatmul.msk.bf16.gmra.mxu3 %vm394_vm2, %v3043_v63 }
  0x9d   : > { %v3405_v60 = vpop.f32.mrf.mxu2 }
  0x9e   : > { %v3408_v0 = vpop.f32.mrf.mxu1 }
  0x9f   : > { %v3418_v4 = vpop.f32.mrf.mxu3 }
  0xa0   : > { %v3410_v24 = vpop.f32.mrf.mxu0 }
  0xa5   : > { %v3416_v3 = vpop.f32.mrf.mxu2 }
  0xa6   : > { %v3420_v7 = vpop.f32.mrf.mxu1 }
  0xa7   : > { %v3435_v21 = vpop.f32.mrf.mxu3 }
  0xa8   : > { %v3423_v16 = vpop.f32.mrf.mxu0 }
  0xa9   : > { %2692 = vmatmul.msk.bf16.gmra.mxu1 %vm394_vm2, %v3194_v9  ;;  %v1230_v9 = vshll.u32 %v3431_v19, 16 }
  0xaa   : > { %2707 = vmatmul.msk.bf16.gmra.mxu2 %vm394_vm2, %v649_v14 }
  0xab   : > { %2845 = vmatmul.msk.bf16.gmra.mxu0 %vm394_vm2, %v1225_v18  ;;  %v1232_v30 = vrot.slane %v1230_v9, 1  ;;  %v1242_v18 = vshrl.u32 %v3461_v41, 16 }
  0xac   : > { %2780 = vmatmul.msk.bf16.gmra.mxu3 %vm394_vm2, %v3044_v23  ;;  %v1246_v23 = vshll.u32 %v3489_v43, 16 }
  0xad   : > { %v3433_v20 = vpop.f32.mrf.mxu2  ;;  %v1233_v40 = vsel %vm277_vm1, %v1228_v29, %v1232_v30  ;;  %v1236_v51 = vor.u32 %v1234_v48, %v1232_v30 }
  0xae   : > { %v3438_v25 = vpop.f32.mrf.mxu1  ;;  %v1248_v9 = vrot.slane %v1246_v23, 1  ;;  %v1250_v23 = vshrl.u32 %v3489_v43, 16 }
  0xaf   : > { %v3448_v34 = vpop.f32.mrf.mxu3 }
  0xb0   : > { %v3440_v12 = vpop.f32.mrf.mxu0 }
  0xb5   : > { %v3446_v33 = vpop.f32.mrf.mxu2 }
  0xb6   : > { %v3450_v35 = vpop.f32.mrf.mxu1 }
  0xb7   : > { %v3465_v45 = vpop.f32.mrf.mxu3 }
  0xb8   : > { %v3453_v36 = vpop.f32.mrf.mxu0  ;;  %4028 = vst [vmem:[#allocation2_spill] sm:$0xff] %v3465_v45 }
  0xb9   : > { %2693 = vmatmul.msk.bf16.gmra.mxu1 %vm394_vm2, %v3236_v37  ;;  %v1238_v37 = vshll.u32 %v3461_v41, 16 }
  0xba   : > { %2708 = vmatmul.msk.bf16.gmra.mxu2 %vm394_vm2, %v651_v13 }
  0xbb   : > { %2846 = vmatmul.msk.bf16.gmra.mxu0 %vm394_vm2, %v1233_v40  ;;  %v1240_v52 = vrot.slane %v1238_v37, 1  ;;  %v3512_v37 = vld [vmem:[%s3188_s25 + $0x58] sm:$0xff] }
  0xbc   : > { %2781 = vmatmul.msk.bf16.gmra.mxu3 %vm394_vm2, %v3045_v46 }
  0xbd   : > { %v3463_v44 = vpop.f32.mrf.mxu2  ;;  %v1241_v63 = vsel %vm277_vm1, %v1236_v51, %v1240_v52  ;;  %v1244_v26 = vor.u32 %v1242_v18, %v1240_v52 }
  0xbe   : > { %v3468_v47 = vpop.f32.mrf.mxu1 }
  0xbf   : > { %v972_v54 = vpop.f32.mrf.mxu3  ;;  %v1249_v48 = vsel %vm277_vm1, %v1244_v26, %v1248_v9  ;;  %v1254_v26 = vshll.u32 %v3512_v37, 16 }
  0xc0   : > { %v3470_v42 = vpop.f32.mrf.mxu0 }
  0xc5   : > { %v3476_v53 = vpop.f32.mrf.mxu2 }
  0xc6   : > { %v3478_v55 = vpop.f32.mrf.mxu1 }
  0xc7   : > { %v974_v8 = vpop.f32.mrf.mxu3 }
  0xc8   : > { %v3481_v58 = vpop.f32.mrf.mxu0 }
  0xc9   : > { %2694 = vmatmul.msk.bf16.gmra.mxu1 %vm394_vm2, %v3274_v5  ;;  %v654_v5 = vrot.slane %v3200_v11, 1 }
  0xca   : > { %2709 = vmatmul.msk.bf16.gmra.mxu2 %vm394_vm2, %v653_v56 }
  0xcb   : > { %2847 = vmatmul.msk.bf16.gmra.mxu0 %vm394_vm2, %v1241_v63  ;;  %v655_v13 = vsel %vm636_vm3, %v652_v50, %v654_v5  ;;  %v3047_v63 = vld [vmem:[%s3188_s25 + $0x58] sm:$0xff] }
  0xcc   : > { %2782 = vmatmul.msk.bf16.gmra.mxu3 %vm394_vm2, %v3046_v22 }
  0xcd   : > { %v3491_v1 = vpop.f32.mrf.mxu2 }
  0xce   : > { %v3494_v2 = vpop.f32.mrf.mxu1 }
  0xcf   : > { %v977_v29 = vpop.f32.mrf.mxu3 }
  0xd0   : > { %v3496_v14 = vpop.f32.mrf.mxu0 }
  0xd5   : > { %v3502_v28 = vpop.f32.mrf.mxu2 }
  0xd6   : > { %v560_v30 = vpop.f32.mrf.mxu1 }
  0xd7   : > { %v561_v40 = vadd.f32 %v560_v30, %v3395_v57  ;;  %v979_v52 = vpop.f32.mrf.mxu3  ;;  %v656_v30 = vrot.slane %v3239_v38, 1 }
  0xd8   : > { %v1344_v46 = vpop.f32.mrf.mxu0 }
  0xd9   : > { %2695 = vmatmul.msk.bf16.gmra.mxu1 %vm394_vm2, %v3197_v10 }
  0xda   : > { %2710 = vmatmul.msk.bf16.gmra.mxu2 %vm394_vm2, %v655_v13  ;;  %v1252_v13 = vor.u32 %v1250_v23, %v1248_v9 }
  0xdb   : > { %2848 = vmatmul.msk.bf16.gmra.mxu0 %vm394_vm2, %v1249_v48  ;;  %v1256_v48 = vrot.slane %v1254_v26, 1 }
  0xdc   : > { %2783 = vmatmul.msk.bf16.gmra.mxu3 %vm394_vm2, %v3047_v63 }
  0xdd   : > { %v720_v51 = vpop.f32.mrf.mxu2  ;;  %v1257_v63 = vsel %vm277_vm1, %v1252_v13, %v1256_v48 }
  0xde   : > { %v790_v56 = vadd.f32 %v720_v51, %v561_v40  ;;  %v562_v22 = vpop.f32.mrf.mxu1 }
  0xdf   : > { %v563_v57 = vadd.f32 %v562_v22, %v3410_v24  ;;  %v982_v51 = vpop.f32.mrf.mxu3  ;;  %v657_v24 = vsel %vm636_vm3, %v654_v5, %v656_v30 }
  0xe0   : > { %v1042_v50 = vadd.f32 %v972_v54, %v790_v56  ;;  %v1346_v18 = vpop.f32.mrf.mxu0 }
  0xe2   : > { %v3519_v10 = vadd.f32 %v1344_v46, %v1042_v50  ;;  %v3532_v46 = vld [vmem:[%s3188_s25 + $0x60] sm:$0xff] }
  0xe5   : > { %v722_v40 = vpop.f32.mrf.mxu2 }
  0xe6   : > { %v791_v54 = vadd.f32 %v722_v40, %v563_v57  ;;  %v565_v56 = vpop.f32.mrf.mxu1  ;;  %v1258_v40 = vshrl.u32 %v3512_v37, 16 }
  0xe7   : > { %v566_v45 = vadd.f32 %v565_v56, %v3423_v16  ;;  %v984_v57 = vpop.f32.mrf.mxu3 }
  0xe8   : > { %v1043_v22 = vadd.f32 %v974_v8, %v791_v54  ;;  %v1349_v43 = vpop.f32.mrf.mxu0  ;;  %v3048_v8 = vld [vmem:[%s3188_s25 + $0x60] sm:$0xff]  ;;  %v658_v54 = vrot.slane %v3277_v6, 1  ;;  %v1260_v56 = vor.u32 %v1258_v40, %v1256_v48  ;;  %v3552_v48 = vld [vmem:[%s3188_s25 + $0x68] sm:$0xff] }
  0xe9   : > { %2696 = vmatmul.msk.bf16.gmra.mxu1 %vm394_vm2, %v3200_v11  ;;  %v1262_v11 = vshll.u32 %v3532_v46, 16  ;;  %4031 = vst [vmem:[#allocation5_spill] sm:$0xff] %v3552_v48 }
  0xea   : > { %2711 = vmatmul.msk.bf16.gmra.mxu2 %vm394_vm2, %v657_v24  ;;  %v3528_v9 = vadd.f32 %v1346_v18, %v1043_v22 }
  0xeb   : > { %2849 = vmatmul.msk.bf16.gmra.mxu0 %vm394_vm2, %v1257_v63  ;;  %v1264_v24 = vrot.slane %v1262_v11, 1 }
  0xec   : > { %2784 = vmatmul.msk.bf16.gmra.mxu3 %vm394_vm2, %v3048_v8 }
  0xed   : > { %v725_v50 = vpop.f32.mrf.mxu2  ;;  %v1265_v8 = vsel %vm277_vm1, %v1260_v56, %v1264_v24 }
  0xee   : > { %v792_v5 = vadd.f32 %v725_v50, %v566_v45  ;;  %v567_v23 = vpop.f32.mrf.mxu1 }
  0xef   : > { %v568_v26 = vadd.f32 %v567_v23, %v3440_v12  ;;  %v987_v22 = vpop.f32.mrf.mxu3  ;;  %v659_v12 = vsel %vm636_vm3, %v656_v30, %v658_v54 }
  0xf0   : > { %v1044_v16 = vadd.f32 %v977_v29, %v792_v5  ;;  %v1351_v13 = vpop.f32.mrf.mxu0 }
  0xf2   : > { %v3539_v18 = vadd.f32 %v1349_v43, %v1044_v16 }
  0xf5   : > { %v727_v45 = vpop.f32.mrf.mxu2 }
  0xf6   : > { %v793_v29 = vadd.f32 %v727_v45, %v568_v26  ;;  %v570_v63 = vpop.f32.mrf.mxu1  ;;  %v1266_v45 = vshrl.u32 %v3532_v46, 16 }
  0xf7   : > { %v571_v5 = vadd.f32 %v570_v63, %v3453_v36  ;;  %v989_v26 = vpop.f32.mrf.mxu3 }
  0xf8   : > { %v1045_v50 = vadd.f32 %v979_v52, %v793_v29  ;;  %v1354_v23 = vpop.f32.mrf.mxu0  ;;  %v3049_v52 = vld [vmem:[%s3188_s25 + $0x68] sm:$0xff]  ;;  %v660_v29 = vrot.slane %v3224_v31, 1  ;;  %v1268_v63 = vor.u32 %v1266_v45, %v1264_v24 }
  0xf9   : > { %2697 = vmatmul.msk.bf16.gmra.mxu1 %vm394_vm2, %v3239_v38  ;;  %v1270_v38 = vshll.u32 %v3552_v48, 16 }
  0xfa   : > { %2712 = vmatmul.msk.bf16.gmra.mxu2 %vm394_vm2, %v659_v12  ;;  %v3548_v43 = vadd.f32 %v1351_v13, %v1045_v50 }
  0xfb   : > { %2850 = vmatmul.msk.bf16.gmra.mxu0 %vm394_vm2, %v1265_v8  ;;  %v1272_v12 = vrot.slane %v1270_v38, 1 }
  0xfc   : > { %4030 = vst [vmem:[#allocation4_spill] sm:$0xff] %v3548_v43  ;;  %2785 = vmatmul.msk.bf16.gmra.mxu3 %vm394_vm2, %v3049_v52 }
  0xfd   : > { %v730_v16 = vpop.f32.mrf.mxu2  ;;  %v1273_v52 = vsel %vm277_vm1, %v1268_v63, %v1272_v12 }
  0xfe   : > { %v794_v30 = vadd.f32 %v730_v16, %v571_v5  ;;  %v572_v40 = vpop.f32.mrf.mxu1 }
  0xff   : > { %v573_v11 = vadd.f32 %v572_v40, %v3470_v42  ;;  %v992_v5 = vpop.f32.mrf.mxu3  ;;  %v661_v42 = vsel %vm636_vm3, %v658_v54, %v660_v29 }
 0x100   : > { %v1046_v36 = vadd.f32 %v982_v51, %v794_v30  ;;  %v1356_v56 = vpop.f32.mrf.mxu0 }
 0x102   : > { %v3559_v13 = vadd.f32 %v1354_v23, %v1046_v36  ;;  %v3572_v23 = vld [vmem:[%s3188_s25 + $0x70] sm:$0xff] }
 0x104   : > { %4032 = vst [vmem:[#allocation6_spill] sm:$0xff] %v3559_v13 }
 0x105   : > { %v732_v50 = vpop.f32.mrf.mxu2 }
 0x106   : > { %v795_v51 = vadd.f32 %v732_v50, %v573_v11  ;;  %v575_v8 = vpop.f32.mrf.mxu1  ;;  %v3110_v50 = vld [vmem:[%s3188_s25 + $0x10] sm:$0xff]  }
 0x107   : > { %v576_v30 = vadd.f32 %v575_v8, %v3481_v58  ;;  %v3050_v58 = vld [vmem:[%s3188_s25 + $0x70] sm:$0xff]  ;;  %v662_v8 = vrot.slane %v3227_v32, 1 }
 0x108   : > { %v1047_v16 = vadd.f32 %v984_v57, %v795_v51  ;;  %v1359_v40 = vpop.f32.mrf.mxu0  ;;  %v994_v57 = vpop.f32.mrf.mxu3 }
 0x109   : > { %2698 = vmatmul.msk.bf16.gmra.mxu1 %vm394_vm2, %v3277_v6  ;;  %v1274_v6 = vshrl.u32 %v3552_v48, 16  ;;  %v1986_v48 = vshrl.u32 %v3110_v50, 16 }
 0x10a   : > { %2713 = vmatmul.msk.bf16.gmra.mxu2 %vm394_vm2, %v661_v42  ;;  %v3568_v24 = vadd.f32 %v1356_v56, %v1047_v16  ;;  %v1278_v56 = vshll.u32 %v3572_v23, 16  ;;  %v3584_v42 = vld [vmem:[%s3188_s25 + $0x18] sm:$0xff]  ;;  %v1988_v16 = vshll.u32 %v3110_v50, 16 }
 0x10b   : > { %2851 = vmatmul.msk.bf16.gmra.mxu0 %vm394_vm2, %v1273_v52 }
 0x10c   : > { %4033 = vst [vmem:[#allocation7_spill] sm:$0xff] %v3568_v24  ;;  %2786 = vmatmul.msk.bf16.gmra.mxu3 %vm394_vm2, %v3050_v58  ;;  %v1280_v52 = vrot.slane %v1278_v56, 1  ;;  %v663_v24 = vsel %vm636_vm3, %v660_v29, %v662_v8  ;;  %v1990_v13 = vrot.slane %v1988_v16, 1 }
 0x10d   : > { %v735_v54 = vpop.f32.mrf.mxu2 }
 0x10e   : > { %v796_v36 = vadd.f32 %v735_v54, %v576_v30  ;;  %v577_v11 = vpop.f32.mrf.mxu1  ;;  %v1276_v30 = vor.u32 %v1274_v6, %v1272_v12 }
 0x10f   : > { %v578_v38 = vadd.f32 %v577_v11, %v3496_v14  ;;  %v1098_v14 = vld [vmem:[%s3188_s25 + $0x78] sm:$0x1] }
 0x110   : > { %v1048_v45 = vadd.f32 %v987_v22, %v796_v36  ;;  %v1361_v63 = vpop.f32.mrf.mxu0  ;;  %v3586_v54 = vpop.f32.mrf.mxu3  ;;  %v1158_v43 = vunpack.c.l.b16 %v1098_v14 }
 0x112   : > { %v3580_v51 = vadd.f32 %v1359_v40, %v1048_v45  ;;  %v1993_v40 = vshll.u32 %v3584_v42, 16  ;;  %v3599_v56 = vpack.c.b16 %v1158_v43, %v1158_v43  ;;  %v3609_v43 = vld [vmem:[%s3188_s25 + $0x20] sm:$0xff] }
 0x114   : > { %4034 = vst [vmem:[#allocation8_spill] sm:$0xff] %v3580_v51  ;;  %v1281_v51 = vsel %vm277_vm1, %v1276_v30, %v1280_v52  ;;  %v1995_v29 = vrot.slane %v1993_v40, 1 }
 0x115   : > { %v737_v22 = vpop.f32.mrf.mxu2 }
 0x116   : > { %v797_v36 = vadd.f32 %v737_v22, %v578_v38  ;;  %v580_v11 = vpop.f32.mrf.mxu1  ;;  %v1991_v38 = vor.u32 %v1990_v13, %v1986_v48 }
 0x117   : > { %v581_v6 = vadd.f32 %v580_v11, %v3392_v15  ;;  %v664_v15 = vrot.slane %v3263_v61, 1  ;;  %v2001_v61 = vshll.u32 %v3609_v43, 16 }
 0x118   : > { %v1049_v58 = vadd.f32 %v989_v26, %v797_v36  ;;  %v1364_v45 = vpop.f32.mrf.mxu0  ;;  %v999_v50 = vpop.f32.mrf.mxu3  ;;  %v1996_v22 = vsel %vm277_vm1, %v1991_v38, %v1995_v29 }
 0x119   : > { %2699 = vmatmul.msk.bf16.gmra.mxu1 %vm394_vm2, %v3224_v31  ;;  %v665_v38 = vsel %vm636_vm3, %v662_v8, %v664_v15 }
 0x11a   : > { %2714 = vmatmul.msk.bf16.gmra.mxu2 %vm394_vm2, %v663_v24  ;;  %v3595_v12 = vadd.f32 %v1361_v63, %v1049_v58  ;;  %v1282_v24 = vshrl.u32 %v3572_v23, 16  ;;  %v1286_v63 = vshll.u32 %v3599_v56, 16 }
 0x11b   : > { %2852 = vmatmul.msk.bf16.gmra.mxu0 %vm394_vm2, %v1281_v51 }
 0x11c   : > { %2993 = vmatmul.msk.bf16.vlgmr.msra.gmra.mxu3 %vm394_vm2, %v1996_v22  ;;  %v1284_v51 = vor.u32 %v1282_v24, %v1280_v52  ;;  %v1288_v36 = vrot.slane %v1286_v63, 1  ;;  %v3107_v22 = vld [vmem:[%s3188_s25 + $0x8] sm:$0xf0]  ;;  %v3111_v24 = vld [vmem:[%s3188_s25 + $0x10] sm:$0xf0] }
 0x11d   : > { %v740_v26 = vpop.f32.mrf.mxu2  ;;  %v3112_v63 = vld [vmem:[%s3188_s25 + $0x10] sm:$0xe] }
 0x11e   : > { %v798_v16 = vadd.f32 %v740_v26, %v581_v6  ;;  %v582_v30 = vpop.f32.mrf.mxu1 }
 0x11f   : > { %v583_v13 = vadd.f32 %v582_v30, %v3408_v0  ;;  %v1289_v0 = vsel %vm277_vm1, %v1284_v51, %v1288_v36 }
 0x120   : > { %v1050_v31 = vadd.f32 %v992_v5, %v798_v16  ;;  %v1366_v14 = vpop.f32.mrf.mxu0  ;;  %v1002_v40 = vpop.f32.mrf.mxu3  ;;  %v2003_v16 = vrot.slane %v2001_v61, 1 }
 0x122   : > { %v3605_v48 = vadd.f32 %v1364_v45, %v1050_v31  ;;  %v1997_v45 = vshrl.u32 %v3584_v42, 16  ;;  %v3108_v31 = vld [vmem:[%s3188_s25 + $0x8] sm:$0xe] }
 0x124   : > { %v1999_v8 = vor.u32 %v1997_v45, %v1995_v29  ;;  %v3113_v29 = vor.u32 %v3112_v63, %v3111_v24 }
 0x125   : > { %v742_v11 = vpop.f32.mrf.mxu2 }
 0x126   : > { %v799_v5 = vadd.f32 %v742_v11, %v583_v13  ;;  %v585_v58 = vpop.f32.mrf.mxu1  ;;  %v2259_v61 = vrot.slane %v3113_v29, 1 }
 0x127   : > { %v586_v30 = vadd.f32 %v585_v58, %v3420_v7  ;;  %v1449_v58 = vrot.slane %v3330_v62, 1 }
 0x128   : > { %v1051_v6 = vadd.f32 %v994_v57, %v799_v5  ;;  %v1369_v26 = vpop.f32.mrf.mxu0  ;;  %v1004_v15 = vpop.f32.mrf.mxu3 }
 0x129   : > { %2700 = vmatmul.msk.bf16.gmra.mxu1 %vm394_vm2, %v3227_v32  ;;  %v3109_v32 = vor.u32 %v3108_v31, %v3107_v22 }
 0x12a   : > { %2715 = vmatmul.msk.bf16.gmra.mxu2 %vm394_vm2, %v665_v38  ;;  %v3619_v52 = vadd.f32 %v1366_v14, %v1051_v6  ;;  %v2004_v14 = vsel %vm277_vm1, %v1999_v8, %v2003_v16  ;;  %v3634_v38 = vld [vmem:[%s3188_s25 + $0x28] sm:$0xff]  ;;  %v2260_v6 = vrot.slane %v3584_v42, 1 }
 0x12b   : > { %2853 = vmatmul.msk.bf16.gmra.mxu0 %vm394_vm2, %v1289_v0  ;;  %v1448_v5 = vrot.slane %v3109_v32, 1 }
 0x12c   : > { %2994 = vmatmul.msk.bf16.gmra.mxu3 %vm394_vm2, %v2004_v14  ;;  %v2261_v63 = vsel %vm636_vm3, %v2259_v61, %v2260_v6 }
 0x12d   : > { %v745_v57 = vpop.f32.mrf.mxu2  ;;  %v1450_v31 = vsel %vm636_vm3, %v1448_v5, %v1449_v58 }
 0x12e   : > { %v800_v13 = vadd.f32 %v745_v57, %v586_v30  ;;  %v587_v51 = vpop.f32.mrf.mxu1  ;;  %v2009_v57 = vshll.u32 %v3634_v38, 16 }
 0x12f   : > { %v588_v45 = vadd.f32 %v587_v51, %v3438_v25 }
 0x130   : > { %v1052_v36 = vadd.f32 %v3586_v54, %v800_v13  ;;  %v1371_v11 = vpop.f32.mrf.mxu0  ;;  %v1007_v8 = vpop.f32.mrf.mxu3  ;;  %v3064_v54 = vld [vmem:[%s3188_s25 + $0x10] sm:$0xff]  ;;  %v2011_v13 = vrot.slane %v2009_v57, 1  ;;  %v2013_v57 = vshrl.u32 %v3634_v38, 16 }
 0x132   : > { %v3630_v7 = vadd.f32 %v1369_v26, %v1052_v36  ;;  %v2005_v26 = vshrl.u32 %v3609_v43, 16 }
 0x134   : > { %v2007_v42 = vor.u32 %v2005_v26, %v2003_v16 }
 0x135   : > { %v747_v0 = vpop.f32.mrf.mxu2 }
 0x136   : > { %v801_v30 = vadd.f32 %v747_v0, %v588_v45  ;;  %v590_v22 = vpop.f32.mrf.mxu1  ;;  %v2012_v29 = vsel %vm277_vm1, %v2007_v42, %v2011_v13  ;;  %v3655_v0 = vld [vmem:[%s3188_s25 + $0x30] sm:$0xff] }
 0x137   : > { %v591_v51 = vadd.f32 %v590_v22, %v3450_v35  ;;  %v2262_v35 = vrot.slane %v3609_v43, 1  ;;  %v2015_v43 = vor.u32 %v2013_v57, %v2011_v13  ;;  %v2021_v57 = vshrl.u32 %v3655_v0, 16 }
 0x138   : > { %v1053_v24 = vadd.f32 %v999_v50, %v801_v30  ;;  %v1374_v62 = vpop.f32.mrf.mxu0  ;;  %v1009_v14 = vpop.f32.mrf.mxu3 }
 0x139   : > { %2855 = vmatmul.msk.bf16.vlgmr.msra.gmra.mxu1 %vm394_vm2, %v1450_v31  ;;  %v3065_v31 = vld [vmem:[%s3188_s25 + $0x18] sm:$0xff] }
 0x13a   : > { %2926 = vmatmul.msk.bf16.vlgmr.msra.gmra.mxu2 %vm394_vm2, %v3064_v54  ;;  %v3645_v25 = vadd.f32 %v1371_v11, %v1053_v24  ;;  %v1451_v11 = vrot.slane %v3343_v17, 1  ;;  %v2017_v24 = vshll.u32 %v3655_v0, 16  ;;  %v2263_v17 = vsel %vm636_vm3, %v2260_v6, %v2262_v35 }
 0x13b   : > { %3008 = vmatmul.msk.bf16.vlgmr.msra.gmra.mxu0 %vm394_vm2, %v2261_v63 }
 0x13c   : > { %2995 = vmatmul.msk.bf16.gmra.mxu3 %vm394_vm2, %v2012_v29  ;;  %v2019_v42 = vrot.slane %v2017_v24, 1 }
 0x13d   : > { %v750_v32 = vpop.f32.mrf.mxu2 }
 0x13e   : > { %v802_v50 = vadd.f32 %v750_v32, %v591_v51  ;;  %v592_v36 = vpop.f32.mrf.mxu1  ;;  %v2020_v6 = vsel %vm277_vm1, %v2015_v43, %v2019_v42 }
 0x13f   : > { %v593_v16 = vadd.f32 %v592_v36, %v3468_v47 }
 0x140   : > { %v1054_v5 = vadd.f32 %v1002_v40, %v802_v50  ;;  %v1376_v45 = vpop.f32.mrf.mxu0  ;;  %v1012_v54 = vpop.f32.mrf.mxu3  ;;  %v1452_v40 = vsel %vm636_vm3, %v1449_v58, %v1451_v11 }
 0x142   : > { %v3651_v61 = vadd.f32 %v1374_v62, %v1054_v5 }
 0x145   : > { %v752_v30 = vpop.f32.mrf.mxu2 }
 0x146   : > { %v803_v22 = vadd.f32 %v752_v30, %v593_v16  ;;  %v595_v26 = vpop.f32.mrf.mxu1  ;;  %v3676_v16 = vld [vmem:[%s3188_s25 + $0x38] sm:$0xff] }
 0x147   : > { %v596_v58 = vadd.f32 %v595_v26, %v3478_v55  ;;  %v2264_v55 = vrot.slane %v3634_v38, 1  ;;  %v3066_v26 = vld [vmem:[%s3188_s25 + $0x20] sm:$0xff]  ;;  %v2025_v24 = vshll.u32 %v3676_v16, 16  ;;  %v2023_v38 = vor.u32 %v2021_v57, %v2019_v42 }
 0x148   : > { %v1055_v62 = vadd.f32 %v1004_v15, %v803_v22  ;;  %v1379_v63 = vpop.f32.mrf.mxu0  ;;  %v1014_v32 = vpop.f32.mrf.mxu3 }
 0x149   : > { %2856 = vmatmul.msk.bf16.gmra.mxu1 %vm394_vm2, %v1452_v40 }
 0x14a   : > { %2927 = vmatmul.msk.bf16.gmra.mxu2 %vm394_vm2, %v3065_v31  ;;  %v3666_v47 = vadd.f32 %v1376_v45, %v1055_v62  ;;  %v1453_v45 = vrot.slane %v3357_v27, 1  ;;  %v2265_v27 = vsel %vm636_vm3, %v2262_v35, %v2264_v55 }
 0x14b   : > { %3009 = vmatmul.msk.bf16.gmra.mxu0 %vm394_vm2, %v2263_v17  ;;  %v2027_v17 = vrot.slane %v2025_v24, 1 }
 0x14c   : > { %2996 = vmatmul.msk.bf16.gmra.mxu3 %vm394_vm2, %v2020_v6 }
 0x14d   : > { %v755_v51 = vpop.f32.mrf.mxu2  ;;  %v2028_v35 = vsel %vm277_vm1, %v2023_v38, %v2027_v17 }
 0x14e   : > { %v804_v15 = vadd.f32 %v755_v51, %v596_v58  ;;  %v597_v50 = vpop.f32.mrf.mxu1 }
 0x14f   : > { %v598_v13 = vadd.f32 %v597_v50, %v3494_v2 }
 0x150   : > { %v1056_v36 = vadd.f32 %v1007_v8, %v804_v15  ;;  %v1381_v29 = vpop.f32.mrf.mxu0  ;;  %v1017_v22 = vpop.f32.mrf.mxu3  ;;  %v1454_v8 = vsel %vm636_vm3, %v1451_v11, %v1453_v45 }
 0x152   : > { %v3672_v5 = vadd.f32 %v1379_v63, %v1056_v36  ;;  %v1455_v36 = vrot.slane %v3371_v39, 1 }
 0x155   : > { %v757_v30 = vpop.f32.mrf.mxu2 }
 0x156   : > { %v805_v31 = vadd.f32 %v757_v30, %v598_v13  ;;  %v600_v40 = vpop.f32.mrf.mxu1 }
 0x157   : > { %v601_v11 = vadd.f32 %v600_v40, %v3405_v60  ;;  %v2266_v60 = vrot.slane %v3655_v0, 1 }
 0x158   : > { %v1057_v62 = vadd.f32 %v1009_v14, %v805_v31  ;;  %v1384_v63 = vpop.f32.mrf.mxu0  ;;  %v1019_v58 = vpop.f32.mrf.mxu3 }
 0x159   : > { %2857 = vmatmul.msk.bf16.gmra.mxu1 %vm394_vm2, %v1454_v8  ;;  %v2029_v8 = vshrl.u32 %v3676_v16, 16  ;;  %v2267_v39 = vsel %vm636_vm3, %v2264_v55, %v2266_v60 }
 0x15a   : > { %2928 = vmatmul.msk.bf16.gmra.mxu2 %vm394_vm2, %v3066_v26  ;;  %v3687_v2 = vadd.f32 %v1381_v29, %v1057_v62  ;;  %v3697_v29 = vld [vmem:[%s3188_s25 + $0x40] sm:$0xff]  ;;  %v3067_v26 = vld [vmem:[%s3188_s25 + $0x28] sm:$0xff] }
 0x15b   : > { %3010 = vmatmul.msk.bf16.gmra.mxu0 %vm394_vm2, %v2265_v27  ;;  %v2033_v57 = vshll.u32 %v3697_v29, 16  ;;  %v2031_v0 = vor.u32 %v2029_v8, %v2027_v17 }
 0x15c   : > { %2997 = vmatmul.msk.bf16.gmra.mxu3 %vm394_vm2, %v2028_v35  ;;  %v1457_v35 = vrot.slane %v3385_v49, 1 }
 0x15d   : > { %v760_v43 = vpop.f32.mrf.mxu2 }
 0x15e   : > { %v806_v14 = vadd.f32 %v760_v43, %v601_v11  ;;  %v602_v51 = vpop.f32.mrf.mxu1 }
 0x15f   : > { %v603_v42 = vadd.f32 %v602_v51, %v3416_v3 }
 0x160   : > { %v1058_v15 = vadd.f32 %v1012_v54, %v806_v14  ;;  %v1386_v50 = vpop.f32.mrf.mxu0  ;;  %v1022_v30 = vpop.f32.mrf.mxu3  ;;  %v1456_v54 = vsel %vm636_vm3, %v1453_v45, %v1455_v36 }
 0x162   : > { %v3693_v6 = vadd.f32 %v1384_v63, %v1058_v15  ;;  %v2035_v63 = vrot.slane %v2033_v57, 1  ;;  %v3718_v15 = vld [vmem:[%s3188_s25 + $0x48] sm:$0xff] }
 0x164   : > { %v2036_v55 = vsel %vm277_vm1, %v2031_v0, %v2035_v63 }
 0x165   : > { %v762_v13 = vpop.f32.mrf.mxu2 }
 0x166   : > { %v807_v31 = vadd.f32 %v762_v13, %v603_v42  ;;  %v605_v40 = vpop.f32.mrf.mxu1 }
 0x167   : > { %v606_v45 = vadd.f32 %v605_v40, %v3433_v20  ;;  %v2268_v20 = vrot.slane %v3676_v16, 1  ;;  %v2037_v40 = vshrl.u32 %v3697_v29, 16 }
 0x168   : > { %v1059_v24 = vadd.f32 %v1014_v32, %v807_v31  ;;  %v1389_v62 = vpop.f32.mrf.mxu0  ;;  %v1024_v38 = vpop.f32.mrf.mxu3  ;;  %v3068_v31 = vld [vmem:[%s3188_s25 + $0x30] sm:$0xff] }
 0x169   : > { %2858 = vmatmul.msk.bf16.gmra.mxu1 %vm394_vm2, %v1456_v54  ;;  %v2041_v54 = vshll.u32 %v3718_v15, 16  ;;  %v2269_v49 = vsel %vm636_vm3, %v2266_v60, %v2268_v20  ;;  %v2039_v16 = vor.u32 %v2037_v40, %v2035_v63 }
 0x16a   : > { %2929 = vmatmul.msk.bf16.gmra.mxu2 %vm394_vm2, %v3067_v26  ;;  %v3708_v3 = vadd.f32 %v1386_v50, %v1059_v24 }
 0x16b   : > { %3011 = vmatmul.msk.bf16.gmra.mxu0 %vm394_vm2, %v2267_v39  ;;  %v2043_v24 = vrot.slane %v2041_v54, 1 }
 0x16c   : > { %2998 = vmatmul.msk.bf16.gmra.mxu3 %vm394_vm2, %v2036_v55  ;;  %v3739_v55 = vld [vmem:[%s3188_s25 + $0x50] sm:$0xff] }
 0x16d   : > { %v765_v27 = vpop.f32.mrf.mxu2  ;;  %v2044_v60 = vsel %vm277_vm1, %v2039_v16, %v2043_v24 }
 0x16e   : > { %v808_v32 = vadd.f32 %v765_v27, %v606_v45  ;;  %v607_v11 = vpop.f32.mrf.mxu1 }
 0x16f   : > { %v608_v17 = vadd.f32 %v607_v11, %v3446_v33  ;;  %v1459_v11 = vrot.slane %v3403_v59, 1 }
 0x170   : > { %v1060_v43 = vadd.f32 %v1017_v22, %v808_v32  ;;  %v1391_v14 = vpop.f32.mrf.mxu0  ;;  %v1027_v42 = vpop.f32.mrf.mxu3  ;;  %v1458_v22 = vsel %vm636_vm3, %v1455_v36, %v1457_v35 }
 0x172   : > { %v3714_v51 = vadd.f32 %v1389_v62, %v1060_v43 }
 0x175   : > { %v767_v50 = vpop.f32.mrf.mxu2 }
 0x176   : > { %v809_v13 = vadd.f32 %v767_v50, %v608_v17  ;;  %v610_v26 = vpop.f32.mrf.mxu1  ;;  %v3069_v50 = vld [vmem:[%s3188_s25 + $0x38] sm:$0xff] }
 0x177   : > { %v611_v36 = vadd.f32 %v610_v26, %v3463_v44  ;;  %v2270_v44 = vrot.slane %v3697_v29, 1  ;;  %v2049_v26 = vshll.u32 %v3739_v55, 16 }
 0x178   : > { %v1061_v8 = vadd.f32 %v1019_v58, %v809_v13  ;;  %v1394_v57 = vpop.f32.mrf.mxu0  ;;  %v1029_v39 = vpop.f32.mrf.mxu3 }
 0x179   : > { %2859 = vmatmul.msk.bf16.gmra.mxu1 %vm394_vm2, %v1458_v22  ;;  %v2271_v59 = vsel %vm636_vm3, %v2268_v20, %v2270_v44  ;;  %v2051_v54 = vrot.slane %v2049_v26, 1 }
 0x17a   : > { %2930 = vmatmul.msk.bf16.gmra.mxu2 %vm394_vm2, %v3068_v31  ;;  %v3729_v33 = vadd.f32 %v1391_v14, %v1061_v8  ;;  %v2045_v31 = vshrl.u32 %v3718_v15, 16 }
 0x17b   : > { %3012 = vmatmul.msk.bf16.gmra.mxu0 %vm394_vm2, %v2269_v49 }
 0x17c   : > { %2999 = vmatmul.msk.bf16.gmra.mxu3 %vm394_vm2, %v2044_v60  ;;  %v2047_v29 = vor.u32 %v2045_v31, %v2043_v24 }
 0x17d   : > { %v770_v62 = vpop.f32.mrf.mxu2 }
 0x17e   : > { %v810_v58 = vadd.f32 %v770_v62, %v611_v36  ;;  %v612_v0 = vpop.f32.mrf.mxu1  ;;  %v2052_v20 = vsel %vm277_vm1, %v2047_v29, %v2051_v54 }
 0x17f   : > { %v613_v63 = vadd.f32 %v612_v0, %v3476_v53  ;;  %v3760_v0 = vld [vmem:[%s3188_s25 + $0x58] sm:$0xff] }
 0x180   : > { %v1062_v45 = vadd.f32 %v1022_v30, %v810_v58  ;;  %v1396_v27 = vpop.f32.mrf.mxu0  ;;  %v1032_v14 = vpop.f32.mrf.mxu3  ;;  %v1460_v30 = vsel %vm636_vm3, %v1457_v35, %v1459_v11  ;;  %v1461_v58 = vrot.slane %v3431_v19, 1 }
 0x182   : > { %v3735_v32 = vadd.f32 %v1394_v57, %v1062_v45 }
 0x185   : > { %v772_v43 = vpop.f32.mrf.mxu2 }
 0x186   : > { %v811_v17 = vadd.f32 %v772_v43, %v613_v63  ;;  %v615_v13 = vpop.f32.mrf.mxu1  ;;  %v3070_v63 = vld [vmem:[%s3188_s25 + $0x40] sm:$0xff] }
 0x187   : > { %v616_v35 = vadd.f32 %v615_v13, %v3491_v1  ;;  %v2272_v1 = vrot.slane %v3718_v15, 1 }
 0x188   : > { %v1063_v22 = vadd.f32 %v1024_v38, %v811_v17  ;;  %v1399_v40 = vpop.f32.mrf.mxu0  ;;  %v1034_v57 = vpop.f32.mrf.mxu3  ;;  %v2053_v17 = vshrl.u32 %v3739_v55, 16 }
 0x189   : > { %2860 = vmatmul.msk.bf16.gmra.mxu1 %vm394_vm2, %v1460_v30  ;;  %v2273_v19 = vsel %vm636_vm3, %v2270_v44, %v2272_v1 }
 0x18a   : > { %2931 = vmatmul.msk.bf16.gmra.mxu2 %vm394_vm2, %v3069_v50  ;;  %v3750_v53 = vadd.f32 %v1396_v27, %v1063_v22  ;;  %v2057_v50 = vshll.u32 %v3760_v0, 16  ;;  %v2055_v15 = vor.u32 %v2053_v17, %v2051_v54  ;;  %v3781_v54 = vld [vmem:[%s3188_s25 + $0x60] sm:$0xff] }
 0x18b   : > { %3013 = vmatmul.msk.bf16.gmra.mxu0 %vm394_vm2, %v2271_v59 }
 0x18c   : > { %3000 = vmatmul.msk.bf16.gmra.mxu3 %vm394_vm2, %v2052_v20  ;;  %v2059_v31 = vrot.slane %v2057_v50, 1 }
 0x18d   : > { %v775_v8 = vpop.f32.mrf.mxu2 }
 0x18e   : > { %v812_v38 = vadd.f32 %v775_v8, %v616_v35  ;;  %v617_v49 = vpop.f32.mrf.mxu1  ;;  %v2060_v44 = vsel %vm277_vm1, %v2055_v15, %v2059_v31  ;;  %v1463_v8 = vrot.slane %v3461_v41, 1 }
 0x18f   : > { %v618_v24 = vadd.f32 %v617_v49, %v3502_v28 }
 0x190   : > { %v1064_v16 = vadd.f32 %v1027_v42, %v812_v38  ;;  %v1401_v36 = vpop.f32.mrf.mxu0  ;;  %v1037_v45 = vpop.f32.mrf.mxu3  ;;  %v1462_v42 = vsel %vm636_vm3, %v1459_v11, %v1461_v58  ;;  %v2274_v38 = vrot.slane %v3739_v55, 1  ;;  %v3137_v55 = vmov 0  }
 0x191   : > { %2557 = vst.msk [vmem:[%s3796_s14 + $0x70] sm:$0xf] %vm2528_vm4, %v3137_v55 }
 0x192   : > { %v3756_v62 = vadd.f32 %v1399_v40, %v1064_v16 }
 0x195   : > { %v777_v60 = vpop.f32.mrf.mxu2 }
 0x196   : > { %v813_v27 = vadd.f32 %v777_v60, %v618_v24  ;;  %v620_v43 = vpop.f32.mrf.mxu1  ;;  %v2061_v60 = vshrl.u32 %v3760_v0, 16 }
 0x197   : > { %v621_v11 = vadd.f32 %v620_v43, %v3418_v4  ;;  %v2275_v43 = vsel %vm636_vm3, %v2272_v1, %v2274_v38 }
 0x198   : > { %v1065_v13 = vadd.f32 %v1029_v39, %v813_v27  ;;  %v1404_v30 = vpop.f32.mrf.mxu0  ;;  %v1039_v22 = vpop.f32.mrf.mxu3  ;;  %v2065_v27 = vshll.u32 %v3781_v54, 16 }
 0x199   : > { %2861 = vmatmul.msk.bf16.gmra.mxu1 %vm394_vm2, %v1462_v42 }
 0x19a   : > { %2932 = vmatmul.msk.bf16.gmra.mxu2 %vm394_vm2, %v3070_v63  ;;  %v3771_v28 = vadd.f32 %v1401_v36, %v1065_v13  ;;  %v3071_v36 = vld [vmem:[%s3188_s25 + $0x48] sm:$0xff] }
 0x19b   : > { %3014 = vmatmul.msk.bf16.gmra.mxu0 %vm394_vm2, %v2273_v19 }
 0x19c   : > { %3001 = vmatmul.msk.bf16.gmra.mxu3 %vm394_vm2, %v2060_v44 }
 0x19d   : > { %v780_v26 = vpop.f32.mrf.mxu2 }
 0x19e   : > { %v814_v39 = vadd.f32 %v780_v26, %v621_v11  ;;  %v622_v40 = vpop.f32.mrf.mxu1  ;;  %v4035_v26 = vld [vmem:[#allocation3_spill] sm:$0xff] }
 0x19f   : > { %v623_v4 = vadd.f32 %v622_v40, %v3435_v21  ;;  %v3810_v40 = vld [vmem:[%s3188_s25 + $0x68] sm:$0xff] }
 0x1a0   : > { %v1066_v59 = vadd.f32 %v1032_v14, %v814_v39  ;;  %v1406_v29 = vpop.f32.mrf.mxu0  ;;  %v2155_v20 = vpop.f32.mrf.mxu3  ;;  %v1464_v14 = vsel %vm636_vm3, %v1461_v58, %v1463_v8  ;;  %v2067_v58 = vrot.slane %v2065_v27, 1  ;;  %v1465_v39 = vrot.slane %v4035_v26, 1 }
 0x1a2   : > { %v3777_v35 = vadd.f32 %v1404_v30, %v1066_v59 }
 0x1a5   : > { %v782_v49 = vpop.f32.mrf.mxu2 }
 0x1a6   : > { %v815_v16 = vadd.f32 %v782_v49, %v623_v4  ;;  %v625_v24 = vpop.f32.mrf.mxu1  ;;  %v3072_v49 = vld [vmem:[%s3188_s25 + $0x50] sm:$0xff] }
 0x1a7   : > { %v626_v1 = vadd.f32 %v625_v24, %v3448_v34  ;;  %v2276_v34 = vrot.slane %v3760_v0, 1  ;;  %v2073_v24 = vshll.u32 %v3810_v40, 16 }
 0x1a8   : > { %v1067_v63 = vadd.f32 %v1034_v57, %v815_v16  ;;  %v1409_v41 = vpop.f32.mrf.mxu0  ;;  %v2063_v57 = vor.u32 %v2061_v60, %v2059_v31  ;;  %v2157_v17 = vpop.f32.mrf.mxu3  ;;  %v4036_v31 = vld [vmem:[#allocation2_spill] sm:$0xff] }
 0x1a9   : > { %2862 = vmatmul.msk.bf16.gmra.mxu1 %vm394_vm2, %v1464_v14  ;;  %v2277_v27 = vsel %vm636_vm3, %v2274_v38, %v2276_v34 }
 0x1aa   : > { %2933 = vmatmul.msk.bf16.gmra.mxu2 %vm394_vm2, %v3071_v36  ;;  %v3798_v21 = vadd.f32 %v1406_v29, %v1067_v63  ;;  %v2068_v30 = vsel %vm277_vm1, %v2063_v57, %v2067_v58  ;;  %v2069_v36 = vshrl.u32 %v3781_v54, 16 }
 0x1ab   : > { %3015 = vmatmul.msk.bf16.gmra.mxu0 %vm394_vm2, %v2275_v43 }
 0x1ac   : > { %3002 = vmatmul.msk.bf16.gmra.mxu3 %vm394_vm2, %v2068_v30  ;;  %v2071_v63 = vor.u32 %v2069_v36, %v2067_v58  ;;  %v3836_v58 = vld [vmem:[%s3188_s25 + $0x70] sm:$0xff] }
 0x1ad   : > { %v785_v42 = vpop.f32.mrf.mxu2 }
 0x1ae   : > { %v816_v50 = vadd.f32 %v785_v42, %v626_v1  ;;  %v627_v13 = vpop.f32.mrf.mxu1  ;;  %v3831_v42 = vld [vmem:[%s4024_s2] ss:$0 sm:$0xff] }
 0x1af   : > { %v628_v44 = vadd.f32 %v627_v13, %v4036_v31 }
 0x1b0   : > { %v1068_v19 = vadd.f32 %v1037_v45, %v816_v50  ;;  %v1411_v15 = vpop.f32.mrf.mxu0  ;;  %v2160_v29 = vpop.f32.mrf.mxu3  ;;  %v1466_v45 = vsel %vm636_vm3, %v1463_v8, %v1465_v39 }
 0x1b2   : > { %v3806_v11 = vadd.f32 %v1409_v41, %v1068_v19  ;;  %v2075_v41 = vrot.slane %v2073_v24, 1 }
 0x1b4   : > { %v2076_v38 = vsel %vm277_vm1, %v2071_v63, %v2075_v41 }
 0x1b5   : > { %v787_v59 = vpop.f32.mrf.mxu2 }
 0x1b6   : > { %v817_v4 = vadd.f32 %v787_v59, %v628_v44  ;;  %v1531_v16 = vpop.f32.mrf.mxu1  ;;  %v3073_v59 = vld [vmem:[%s3188_s25 + $0x58] sm:$0xff] }
 0x1b7   : > { %v1601_v8 = vadd.f32 %v1531_v16, %v3519_v10  ;;  %v1467_v10 = vrot.slane %v3512_v37, 1  ;;  %v2077_v37 = vshrl.u32 %v3810_v40, 16  ;;  %v2081_v16 = vshll.u32 %v3836_v58, 16 }
 0x1b8   : > { %v1069_v14 = vadd.f32 %v1039_v22, %v817_v4  ;;  %v2342_v60 = vpop.f32.mrf.mxu0  ;;  %v3825_v55 = vpop.f32.mrf.mxu3 }
 0x1b9   : > { %2863 = vmatmul.msk.bf16.gmra.mxu1 %vm394_vm2, %v1466_v45 }
 0x1ba   : > { %2934 = vmatmul.msk.bf16.gmra.mxu2 %vm394_vm2, %v3072_v49  ;;  %v3821_v0 = vadd.f32 %v1411_v15, %v1069_v14  ;;  %v1468_v49 = vsel %vm636_vm3, %v1465_v39, %v1467_v10  ;;  %v2079_v39 = vor.u32 %v2077_v37, %v2075_v41  ;;  %v2083_v14 = vrot.slane %v2081_v16, 1 }
 0x1bb   : > { %3016 = vmatmul.msk.bf16.gmra.mxu0 %vm394_vm2, %v2277_v27 }
 0x1bc   : > { %3003 = vmatmul.msk.bf16.gmra.mxu3 %vm394_vm2, %v2076_v38 }
 0x1bd   : > { %v1783_v43 = vpop.f32.mrf.mxu2 }
 0x1be   : > { %v1853_v22 = vadd.f32 %v1783_v43, %v1601_v8  ;;  %v1533_v57 = vpop.f32.mrf.mxu1 }
 0x1bf   : > { %v1602_v19 = vadd.f32 %v1533_v57, %v3528_v9 }
 0x1c0   : > { %v2225_v1 = vadd.f32 %v2155_v20, %v1853_v22  ;;  %v2344_v50 = vpop.f32.mrf.mxu0  ;;  %v2278_v20 = vrot.slane %v3781_v54, 1  ;;  %v3841_v26 = vpop.f32.mrf.mxu3  ;;  %v2084_v22 = vsel %vm277_vm1, %v2079_v39, %v2083_v14 }
 0x1c2   : > { %v2412_v13 = vadd.f32 %v2342_v60, %v2225_v1  ;;  %v2279_v9 = vsel %vm636_vm3, %v2276_v34, %v2278_v20 }
 0x1c4   : > { %v2444_v30 = vadd.f32 %v3831_v42, %v2412_v13 }
 0x1c5   : > { %v1785_v15 = vpop.f32.mrf.mxu2 }
 0x1c6   : > { %v2472_v31 = vmax.f32 %v2444_v30, 0.0  ;;  %v1854_v44 = vadd.f32 %v1785_v15, %v1602_v19  ;;  %v1536_v4 = vpop.f32.mrf.mxu1  ;;  %v4037_v30 = vld [vmem:[#allocation4_spill] sm:$0xff]  ;;  %v2280_v15 = vrot.slane %v3810_v40, 1 }
 0x1c8   : > { %v2500_v45 = vpack.c.bf16 %v2472_v31, %v2472_v31  ;;  %v2226_v36 = vadd.f32 %v2157_v17, %v1854_v44  ;;  %v2347_v24 = vpop.f32.mrf.mxu0  ;;  %v1603_v17 = vadd.f32 %v1536_v4, %v3539_v18  ;;  %v3855_v63 = vpop.f32.mrf.mxu3  ;;  %v3863_v18 = vld [vmem:[%s3188_s25 + $0x78] sm:$0xff]  ;;  %v3074_v4 = vld [vmem:[%s3188_s25 + $0x60] sm:$0xff]  ;;  %v2281_v40 = vsel %vm636_vm3, %v2278_v20, %v2280_v15 }
 0x1c9   : > { %2864 = vmatmul.msk.bf16.gmra.mxu1 %vm394_vm2, %v1468_v49  ;;  %v2089_v16 = vshll.u32 %v3863_v18, 16 }
 0x1ca   : > { %2529 = vst.msk [vmem:[%s3796_s14] sm:$0xf] %vm2528_vm4, %v2500_v45  ;;  %v2413_v54 = vadd.f32 %v2344_v50, %v2226_v36  ;;  %2935 = vmatmul.msk.bf16.gmra.mxu2 %vm394_vm2, %v3073_v59  ;;  %v1469_v50 = vrot.slane %v3532_v46, 1  ;;  %v2085_v46 = vshrl.u32 %v3836_v58, 16 }
 0x1cb   : > { %3017 = vmatmul.msk.bf16.gmra.mxu0 %vm394_vm2, %v2279_v9 }
 0x1cc   : > { %v2445_v60 = vadd.f32 %v3831_v42, %v2413_v54  ;;  %3004 = vmatmul.msk.bf16.gmra.mxu3 %vm394_vm2, %v2084_v22  ;;  %v1470_v37 = vsel %vm636_vm3, %v1467_v10, %v1469_v50  ;;  %v2087_v10 = vor.u32 %v2085_v46, %v2083_v14  ;;  %v2091_v54 = vrot.slane %v2089_v16, 1  ;;  %v3075_v16 = vld [vmem:[%s3188_s25 + $0x68] sm:$0xff] }
 0x1cd   : > { %v1788_v27 = vpop.f32.mrf.mxu2 }
 0x1ce   : > { %v2473_v34 = vmax.f32 %v2445_v60, 0.0  ;;  %v1855_v8 = vadd.f32 %v1788_v27, %v1603_v17  ;;  %v1538_v43 = vpop.f32.mrf.mxu1  ;;  %v4038_v60 = vld [vmem:[#allocation6_spill] sm:$0xff]  ;;  %v2092_v22 = vsel %vm277_vm1, %v2087_v10, %v2091_v54 }
 0x1cf   : > { %v1604_v19 = vadd.f32 %v1538_v43, %v4037_v30 }
 0x1d0   : > { %v2501_v57 = vpack.c.bf16 %v2473_v34, %v2473_v34  ;;  %v2227_v38 = vadd.f32 %v2160_v29, %v1855_v8  ;;  %v2349_v1 = vpop.f32.mrf.mxu0  ;;  %v3868_v44 = vpop.f32.mrf.mxu3 }
 0x1d2   : > { %2530 = vst.msk [vmem:[%s3796_s14 + $0x4] sm:$0xf] %vm2528_vm4, %v2501_v57  ;;  %v2414_v41 = vadd.f32 %v2347_v24, %v2227_v38 }
 0x1d4   : > { %v2446_v13 = vadd.f32 %v3831_v42, %v2414_v41 }
 0x1d5   : > { %v1790_v31 = vpop.f32.mrf.mxu2 }
 0x1d6   : > { %v2474_v29 = vmax.f32 %v2446_v13, 0.0  ;;  %v1856_v59 = vadd.f32 %v1790_v31, %v1604_v19  ;;  %v1541_v49 = vpop.f32.mrf.mxu1  ;;  %v4039_v13 = vld [vmem:[#allocation5_spill] sm:$0xff] }
 0x1d7   : > { %v1605_v17 = vadd.f32 %v1541_v49, %v4038_v60  ;;  %v1471_v30 = vrot.slane %v4039_v13, 1 }
 0x1d8   : > { %v2502_v45 = vpack.c.bf16 %v2474_v29, %v2474_v29  ;;  %v2228_v36 = vadd.f32 %v3825_v55, %v1856_v59  ;;  %v2352_v24 = vpop.f32.mrf.mxu0  ;;  %v1909_v55 = vld [vmem:[%s3188_s25 + $0x80] sm:$0x1]  ;;  %v3884_v34 = vpop.f32.mrf.mxu3  ;;  %v4040_v29 = vld [vmem:[#allocation7_spill] sm:$0xff] }
 0x1d9   : > { %2865 = vmatmul.msk.bf16.gmra.mxu1 %vm394_vm2, %v1470_v37  ;;  %v1969_v57 = vunpack.c.l.b16 %v1909_v55 }
 0x1da   : > { %2531 = vst.msk [vmem:[%s3796_s14 + $0x8] sm:$0xf] %vm2528_vm4, %v2502_v45  ;;  %v2415_v9 = vadd.f32 %v2349_v1, %v2228_v36  ;;  %2936 = vmatmul.msk.bf16.gmra.mxu2 %vm394_vm2, %v3074_v4  ;;  %v2282_v4 = vrot.slane %v3836_v58, 1  ;;  %v1472_v36 = vsel %vm636_vm3, %v1469_v50, %v1471_v30 }
 0x1db   : > { %3018 = vmatmul.msk.bf16.gmra.mxu0 %vm394_vm2, %v2281_v40  ;;  %v3892_v19 = vpack.c.b16 %v1969_v57, %v1969_v57 }
 0x1dc   : > { %v2447_v39 = vadd.f32 %v3831_v42, %v2415_v9  ;;  %3005 = vmatmul.msk.bf16.gmra.mxu3 %vm394_vm2, %v2092_v22  ;;  %v2283_v60 = vsel %vm636_vm3, %v2280_v15, %v2282_v4 }
 0x1dd   : > { %v1793_v27 = vpop.f32.mrf.mxu2  ;;  %v2097_v40 = vshll.u32 %v3892_v19, 16 }
 0x1de   : > { %v2475_v20 = vmax.f32 %v2447_v39, 0.0  ;;  %v1857_v8 = vadd.f32 %v1793_v27, %v1605_v17  ;;  %v1543_v43 = vpop.f32.mrf.mxu1  ;;  %v4041_v27 = vld [vmem:[#allocation8_spill] sm:$0xff] }
 0x1df   : > { %v1606_v59 = vadd.f32 %v1543_v43, %v4040_v29  ;;  %v2099_v17 = vrot.slane %v2097_v40, 1  ;;  %v2284_v29 = vrot.slane %v3863_v18, 1 }
 0x1e0   : > { %v2503_v38 = vpack.c.bf16 %v2475_v20, %v2475_v20  ;;  %v2229_v1 = vadd.f32 %v3841_v26, %v1857_v8  ;;  %v2354_v14 = vpop.f32.mrf.mxu0  ;;  %v2175_v37 = vpop.f32.mrf.mxu3 }
 0x1e2   : > { %2532 = vst.msk [vmem:[%s3796_s14 + $0xc] sm:$0xf] %vm2528_vm4, %v2503_v38  ;;  %v2416_v41 = vadd.f32 %v2352_v24, %v2229_v1  ;;  %v2093_v24 = vshrl.u32 %v3863_v18, 16 }
 0x1e4   : > { %v2448_v31 = vadd.f32 %v3831_v42, %v2416_v41  ;;  %v2095_v50 = vor.u32 %v2093_v24, %v2091_v54  ;;  %v1473_v41 = vrot.slane %v3572_v23, 1  ;;  %v2285_v23 = vsel %vm636_vm3, %v2282_v4, %v2284_v29 }
 0x1e5   : > { %v1795_v49 = vpop.f32.mrf.mxu2 }
 0x1e6   : > { %v2476_v26 = vmax.f32 %v2448_v31, 0.0  ;;  %v1858_v46 = vadd.f32 %v1795_v49, %v1606_v59  ;;  %v1546_v45 = vpop.f32.mrf.mxu1  ;;  %v2100_v57 = vsel %vm277_vm1, %v2095_v50, %v2099_v17 }
 0x1e7   : > { %v1607_v20 = vadd.f32 %v1546_v45, %v4041_v27  ;;  %v1474_v45 = vsel %vm636_vm3, %v1471_v30, %v1473_v41 }
 0x1e8   : > { %v2504_v9 = vpack.c.bf16 %v2476_v26, %v2476_v26  ;;  %v2230_v10 = vadd.f32 %v3855_v63, %v1858_v46  ;;  %v2357_v39 = vpop.f32.mrf.mxu0  ;;  %v2177_v8 = vpop.f32.mrf.mxu3 }
 0x1e9   : > { %2866 = vmatmul.msk.bf16.gmra.mxu1 %vm394_vm2, %v1472_v36 }
 0x1ea   : > { %2533 = vst.msk [vmem:[%s3796_s14 + $0x10] sm:$0xf] %vm2528_vm4, %v2504_v9  ;;  %v2417_v58 = vadd.f32 %v2354_v14, %v2230_v10  ;;  %2937 = vmatmul.msk.bf16.gmra.mxu2 %vm394_vm2, %v3075_v16 }
 0x1eb   : > { %3019 = vmatmul.msk.bf16.gmra.mxu0 %vm394_vm2, %v2283_v60 }
 0x1ec   : > { %v2449_v55 = vadd.f32 %v3831_v42, %v2417_v58  ;;  %3006 = vmatmul.msk.bf16.gmra.mxu3 %vm394_vm2, %v2100_v57  ;;  %v3077_v57 = vld [vmem:[%s3188_s25 + $0x78] sm:$0xff] }
 0x1ed   : > { %v1798_v63 = vpop.f32.mrf.mxu2 }
 0x1ee   : > { %v2477_v43 = vmax.f32 %v2449_v55, 0.0  ;;  %v1859_v15 = vadd.f32 %v1798_v63, %v1607_v20  ;;  %v1548_v22 = vpop.f32.mrf.mxu1  ;;  %v1475_v55 = vrot.slane %v3599_v56, 1 }
 0x1ef   : > { %v1608_v31 = vadd.f32 %v1548_v22, %v3595_v12 }
 0x1f0   : > { %v2505_v38 = vpack.c.bf16 %v2477_v43, %v2477_v43  ;;  %v2231_v1 = vadd.f32 %v3868_v44, %v1859_v15  ;;  %v2359_v14 = vpop.f32.mrf.mxu0  ;;  %v2180_v49 = vpop.f32.mrf.mxu3  ;;  %v3076_v44 = vld [vmem:[%s3188_s25 + $0x70] sm:$0xff] }
 0x1f2   : > { %2534 = vst.msk [vmem:[%s3796_s14 + $0x14] sm:$0xf] %vm2528_vm4, %v2505_v38  ;;  %v2418_v54 = vadd.f32 %v2357_v39, %v2231_v1 }
 0x1f4   : > { %v2450_v13 = vadd.f32 %v3831_v42, %v2418_v54 }
 0x1f5   : > { %v1800_v59 = vpop.f32.mrf.mxu2 }
 0x1f6   : > { %v2478_v26 = vmax.f32 %v2450_v13, 0.0  ;;  %v1860_v46 = vadd.f32 %v1800_v59, %v1608_v31  ;;  %v1551_v16 = vpop.f32.mrf.mxu1 }
 0x1f7   : > { %v1609_v30 = vadd.f32 %v1551_v16, %v3605_v48  ;;  %v2286_v48 = vrot.slane %v3892_v19, 1 }
 0x1f8   : > { %v2506_v36 = vpack.c.bf16 %v2478_v26, %v2478_v26  ;;  %v2232_v24 = vadd.f32 %v3884_v34, %v1860_v46  ;;  %v2362_v40 = vpop.f32.mrf.mxu0  ;;  %v2182_v10 = vpop.f32.mrf.mxu3 }
 0x1f9   : > { %2867 = vmatmul.msk.bf16.gmra.mxu1 %vm394_vm2, %v1474_v45  ;;  %v2287_v13 = vsel %vm636_vm3, %v2284_v29, %v2286_v48 }
 0x1fa   : > { %2535 = vst.msk [vmem:[%s3796_s14 + $0x18] sm:$0xf] %vm2528_vm4, %v2506_v36  ;;  %v2419_v12 = vadd.f32 %v2359_v14, %v2232_v24  ;;  %2938 = vmatmul.msk.bf16.gmra.mxu2 %vm394_vm2, %v3076_v44 }
 0x1fb   : > { %3020 = vmatmul.msk.bf16.gmra.mxu0 %vm394_vm2, %v2285_v23 }
 0x1fc   : > { %v2451_v18 = vadd.f32 %v3831_v42, %v2419_v12 }
 0x1fd   : > { %v1803_v9 = vpop.f32.mrf.mxu2 }
 0x1fe   : > { %v2479_v34 = vmax.f32 %v2451_v18, 0.0  ;;  %v1861_v39 = vadd.f32 %v1803_v9, %v1609_v30  ;;  %v1553_v4 = vpop.f32.mrf.mxu1 }
 0x1ff   : > { %v1610_v20 = vadd.f32 %v1553_v4, %v3619_v52 }
 0x200   : > { %v2507_v60 = vpack.c.bf16 %v2479_v34, %v2479_v34  ;;  %v2233_v58 = vadd.f32 %v2175_v37, %v1861_v39  ;;  %v2364_v50 = vpop.f32.mrf.mxu0  ;;  %v2185_v43 = vpop.f32.mrf.mxu3  ;;  %v1476_v37 = vsel %vm636_vm3, %v1473_v41, %v1475_v55 }
 0x202   : > { %2536 = vst.msk [vmem:[%s3796_s14 + $0x1c] sm:$0xf] %vm2528_vm4, %v2507_v60  ;;  %v2420_v17 = vadd.f32 %v2362_v40, %v2233_v58 }
 0x204   : > { %v2452_v27 = vadd.f32 %v3831_v42, %v2420_v17 }
 0x205   : > { %v1805_v63 = vpop.f32.mrf.mxu2 }
 0x206   : > { %v2480_v15 = vmax.f32 %v2452_v27, 0.0  ;;  %v1862_v22 = vadd.f32 %v1805_v63, %v1610_v20  ;;  %v1556_v38 = vpop.f32.mrf.mxu1 }
 0x207   : > { %v1611_v19 = vadd.f32 %v1556_v38, %v3630_v7 }
 0x208   : > { %v2508_v1 = vpack.c.bf16 %v2480_v15, %v2480_v15  ;;  %v2234_v14 = vadd.f32 %v2177_v8, %v1862_v22  ;;  %v2367_v54 = vpop.f32.mrf.mxu0  ;;  %v2187_v31 = vpop.f32.mrf.mxu3 }
 0x209   : > { %2868 = vmatmul.msk.bf16.gmra.mxu1 %vm394_vm2, %v1476_v37 }
 0x20a   : > { %2537 = vst.msk [vmem:[%s3796_s14 + $0x20] sm:$0xf] %vm2528_vm4, %v2508_v1  ;;  %v2421_v56 = vadd.f32 %v2364_v50, %v2234_v14  ;;  %2939 = vmatmul.msk.bf16.gmra.mxu2 %vm394_vm2, %v3077_v57 }
 0x20b   : > { %3021 = vmatmul.msk.bf16.gmra.mxu0 %vm394_vm2, %v2287_v13 }
 0x20c   : > { %v2453_v52 = vadd.f32 %v3831_v42, %v2421_v56 }
 0x20d   : > { %v1808_v41 = vpop.f32.mrf.mxu2 }
 0x20e   : > { %v2481_v8 = vmax.f32 %v2453_v52, 0.0  ;;  %v1863_v59 = vadd.f32 %v1808_v41, %v1611_v19  ;;  %v1558_v26 = vpop.f32.mrf.mxu1 }
 0x20f   : > { %v1612_v36 = vadd.f32 %v1558_v26, %v3645_v25 }
 0x210   : > { %v2509_v29 = vpack.c.bf16 %v2481_v8, %v2481_v8  ;;  %v2235_v46 = vadd.f32 %v2180_v49, %v1863_v59  ;;  %v2369_v44 = vpop.f32.mrf.mxu0  ;;  %v2190_v40 = vpop.f32.mrf.mxu3 }
 0x212   : > { %2538 = vst.msk [vmem:[%s3796_s14 + $0x24] sm:$0xf] %vm2528_vm4, %v2509_v29  ;;  %v2422_v16 = vadd.f32 %v2367_v54, %v2235_v46 }
 0x214   : > { %v2454_v45 = vadd.f32 %v3831_v42, %v2422_v16 }
 0x215   : > { %v1810_v24 = vpop.f32.mrf.mxu2 }
 0x216   : > { %v2482_v23 = vmax.f32 %v2454_v45, 0.0  ;;  %v1864_v7 = vadd.f32 %v1810_v24, %v1612_v36  ;;  %v1561_v12 = vpop.f32.mrf.mxu1 }
 0x217   : > { %v1613_v39 = vadd.f32 %v1561_v12, %v3651_v61 }
 0x218   : > { %v2510_v18 = vpack.c.bf16 %v2482_v23, %v2482_v23  ;;  %v2236_v30 = vadd.f32 %v2182_v10, %v1864_v7  ;;  %v2372_v9 = vpop.f32.mrf.mxu0  ;;  %v2192_v50 = vpop.f32.mrf.mxu3 }
 0x21a   : > { %2539 = vst.msk [vmem:[%s3796_s14 + $0x28] sm:$0xf] %vm2528_vm4, %v2510_v18  ;;  %v2423_v49 = vadd.f32 %v2369_v44, %v2236_v30 }
 0x21c   : > { %v2455_v34 = vadd.f32 %v3831_v42, %v2423_v49 }
 0x21d   : > { %v1813_v4 = vpop.f32.mrf.mxu2 }
 0x21e   : > { %v2483_v60 = vmax.f32 %v2455_v34, 0.0  ;;  %v1865_v58 = vadd.f32 %v1813_v4, %v1613_v39  ;;  %v1563_v25 = vpop.f32.mrf.mxu1 }
 0x21f   : > { %v1614_v48 = vadd.f32 %v1563_v25, %v3666_v47 }
 0x220   : > { %v2511_v17 = vpack.c.bf16 %v2483_v60, %v2483_v60  ;;  %v2237_v55 = vadd.f32 %v2185_v43, %v1865_v58  ;;  %v2374_v27 = vpop.f32.mrf.mxu0  ;;  %v2195_v1 = vpop.f32.mrf.mxu3 }
 0x222   : > { %2540 = vst.msk [vmem:[%s3796_s14 + $0x2c] sm:$0xf] %vm2528_vm4, %v2511_v17  ;;  %v2424_v10 = vadd.f32 %v2372_v9, %v2237_v55 }
 0x224   : > { %v2456_v20 = vadd.f32 %v3831_v42, %v2424_v10 }
 0x225   : > { %v1815_v63 = vpop.f32.mrf.mxu2 }
 0x226   : > { %v2484_v15 = vmax.f32 %v2456_v20, 0.0  ;;  %v1866_v22 = vadd.f32 %v1815_v63, %v1614_v48  ;;  %v1566_v61 = vpop.f32.mrf.mxu1 }
 0x227   : > { %v1615_v54 = vadd.f32 %v1566_v61, %v3672_v5 }
 0x228   : > { %v2512_v57 = vpack.c.bf16 %v2484_v15, %v2484_v15  ;;  %v2238_v38 = vadd.f32 %v2187_v31, %v1866_v22  ;;  %v2377_v37 = vpop.f32.mrf.mxu0  ;;  %v2197_v59 = vpop.f32.mrf.mxu3 }
 0x22a   : > { %2541 = vst.msk [vmem:[%s3796_s14 + $0x30] sm:$0xf] %vm2528_vm4, %v2512_v57  ;;  %v2425_v43 = vadd.f32 %v2374_v27, %v2238_v38 }
 0x22c   : > { %v2457_v14 = vadd.f32 %v3831_v42, %v2425_v43 }
 0x22d   : > { %v1818_v13 = vpop.f32.mrf.mxu2 }
 0x22e   : > { %v2485_v56 = vmax.f32 %v2457_v14, 0.0  ;;  %v1867_v52 = vadd.f32 %v1818_v13, %v1615_v54  ;;  %v1568_v47 = vpop.f32.mrf.mxu1 }
 0x22f   : > { %v1616_v29 = vadd.f32 %v1568_v47, %v3687_v2 }
 0x230   : > { %v2513_v19 = vpack.c.bf16 %v2485_v56, %v2485_v56  ;;  %v2239_v41 = vadd.f32 %v2190_v40, %v1867_v52  ;;  %v2379_v8 = vpop.f32.mrf.mxu0  ;;  %v2200_v18 = vpop.f32.mrf.mxu3 }
 0x232   : > { %2542 = vst.msk [vmem:[%s3796_s14 + $0x34] sm:$0xf] %vm2528_vm4, %v2513_v19  ;;  %v2426_v31 = vadd.f32 %v2377_v37, %v2239_v41 }
 0x234   : > { %v2458_v26 = vadd.f32 %v3831_v42, %v2426_v31 }
 0x235   : > { %v1820_v46 = vpop.f32.mrf.mxu2 }
 0x236   : > { %v2486_v44 = vmax.f32 %v2458_v26, 0.0  ;;  %v1868_v16 = vadd.f32 %v1820_v46, %v1616_v29  ;;  %v1571_v5 = vpop.f32.mrf.mxu1 }
 0x237   : > { %v1617_v7 = vadd.f32 %v1571_v5, %v3693_v6 }
 0x238   : > { %v2514_v45 = vpack.c.bf16 %v2486_v44, %v2486_v44  ;;  %v2240_v36 = vadd.f32 %v2192_v50, %v1868_v16  ;;  %v2382_v24 = vpop.f32.mrf.mxu0  ;;  %v2202_v55 = vpop.f32.mrf.mxu3 }
 0x23a   : > { %2543 = vst.msk [vmem:[%s3796_s14 + $0x38] sm:$0xf] %vm2528_vm4, %v2514_v45  ;;  %v2427_v40 = vadd.f32 %v2379_v8, %v2240_v36 }
 0x23c   : > { %v2459_v23 = vadd.f32 %v3831_v42, %v2427_v40 }
 0x23d   : > { %v1823_v12 = vpop.f32.mrf.mxu2 }
 0x23e   : > { %v2487_v30 = vmax.f32 %v2459_v23, 0.0  ;;  %v1869_v9 = vadd.f32 %v1823_v12, %v1617_v7  ;;  %v1573_v2 = vpop.f32.mrf.mxu1 }
 0x23f   : > { %v1618_v58 = vadd.f32 %v1573_v2, %v3708_v3 }
 0x240   : > { %v2515_v49 = vpack.c.bf16 %v2487_v30, %v2487_v30  ;;  %v2241_v34 = vadd.f32 %v2195_v1, %v1869_v9  ;;  %v2384_v39 = vpop.f32.mrf.mxu0  ;;  %v2205_v43 = vpop.f32.mrf.mxu3 }
 0x242   : > { %2544 = vst.msk [vmem:[%s3796_s14 + $0x3c] sm:$0xf] %vm2528_vm4, %v2515_v49  ;;  %v2428_v4 = vadd.f32 %v2382_v24, %v2241_v34 }
 0x244   : > { %v2460_v60 = vadd.f32 %v3831_v42, %v2428_v4 }
 0x245   : > { %v1825_v25 = vpop.f32.mrf.mxu2 }
 0x246   : > { %v2488_v50 = vmax.f32 %v2460_v60, 0.0  ;;  %v1870_v17 = vadd.f32 %v1825_v25, %v1618_v58  ;;  %v1576_v6 = vpop.f32.mrf.mxu1 }
 0x247   : > { %v1619_v15 = vadd.f32 %v1576_v6, %v3714_v51 }
 0x248   : > { %v2516_v27 = vpack.c.bf16 %v2488_v50, %v2488_v50  ;;  %v2242_v10 = vadd.f32 %v2197_v59, %v1870_v17  ;;  %v2387_v20 = vpop.f32.mrf.mxu0  ;;  %v2207_v59 = vpop.f32.mrf.mxu3 }
 0x24a   : > { %2545 = vst.msk [vmem:[%s3796_s14 + $0x40] sm:$0xf] %vm2528_vm4, %v2516_v27  ;;  %v2429_v48 = vadd.f32 %v2384_v39, %v2242_v10 }
 0x24c   : > { %v2461_v63 = vadd.f32 %v3831_v42, %v2429_v48 }
 0x24d   : > { %v1828_v22 = vpop.f32.mrf.mxu2 }
 0x24e   : > { %v2489_v61 = vmax.f32 %v2461_v63, 0.0  ;;  %v1871_v57 = vadd.f32 %v1828_v22, %v1619_v15  ;;  %v1578_v3 = vpop.f32.mrf.mxu1 }
 0x24f   : > { %v1620_v13 = vadd.f32 %v1578_v3, %v3729_v33 }
 0x250   : > { %v2517_v38 = vpack.c.bf16 %v2489_v61, %v2489_v61  ;;  %v2243_v37 = vadd.f32 %v2200_v18, %v1871_v57  ;;  %v2389_v1 = vpop.f32.mrf.mxu0  ;;  %v2210_v12 = vpop.f32.mrf.mxu3 }
 0x252   : > { %2546 = vst.msk [vmem:[%s3796_s14 + $0x44] sm:$0xf] %vm2528_vm4, %v2517_v38  ;;  %v2430_v14 = vadd.f32 %v2387_v20, %v2243_v37 }
 0x254   : > { %v2462_v54 = vadd.f32 %v3831_v42, %v2430_v14 }
 0x255   : > { %v1830_v56 = vpop.f32.mrf.mxu2 }
 0x256   : > { %v2490_v52 = vmax.f32 %v2462_v54, 0.0  ;;  %v1872_v47 = vadd.f32 %v1830_v56, %v1620_v13  ;;  %v1581_v51 = vpop.f32.mrf.mxu1 }
 0x257   : > { %v1621_v29 = vadd.f32 %v1581_v51, %v3735_v32 }
 0x258   : > { %v2518_v19 = vpack.c.bf16 %v2490_v52, %v2490_v52  ;;  %v2244_v41 = vadd.f32 %v2202_v55, %v1872_v47  ;;  %v2392_v8 = vpop.f32.mrf.mxu0  ;;  %v2212_v50 = vpop.f32.mrf.mxu3 }
 0x25a   : > { %2547 = vst.msk [vmem:[%s3796_s14 + $0x48] sm:$0xf] %vm2528_vm4, %v2518_v19  ;;  %v2431_v31 = vadd.f32 %v2389_v1, %v2244_v41 }
 0x25c   : > { %v2463_v26 = vadd.f32 %v3831_v42, %v2431_v31 }
 0x25d   : > { %v1833_v46 = vpop.f32.mrf.mxu2 }
 0x25e   : > { %v2491_v44 = vmax.f32 %v2463_v26, 0.0  ;;  %v1873_v16 = vadd.f32 %v1833_v46, %v1621_v29  ;;  %v1583_v33 = vpop.f32.mrf.mxu1 }
 0x25f   : > { %v1622_v23 = vadd.f32 %v1583_v33, %v3750_v53 }
 0x260   : > { %v2519_v5 = vpack.c.bf16 %v2491_v44, %v2491_v44  ;;  %v2245_v45 = vadd.f32 %v2205_v43, %v1873_v16  ;;  %v2394_v36 = vpop.f32.mrf.mxu0  ;;  %v2215_v57 = vpop.f32.mrf.mxu3 }
 0x262   : > { %2548 = vst.msk [vmem:[%s3796_s14 + $0x4c] sm:$0xf] %vm2528_vm4, %v2519_v5  ;;  %v2432_v24 = vadd.f32 %v2392_v8, %v2245_v45 }
 0x264   : > { %v2464_v40 = vadd.f32 %v3831_v42, %v2432_v24 }
 0x265   : > { %v1835_v7 = vpop.f32.mrf.mxu2 }
 0x266   : > { %v2492_v18 = vmax.f32 %v2464_v40, 0.0  ;;  %v1874_v30 = vadd.f32 %v1835_v7, %v1622_v23  ;;  %v1586_v32 = vpop.f32.mrf.mxu1 }
 0x267   : > { %v1623_v4 = vadd.f32 %v1586_v32, %v3756_v62 }
 0x268   : > { %v2520_v9 = vpack.c.bf16 %v2492_v18, %v2492_v18  ;;  %v2246_v2 = vadd.f32 %v2207_v59, %v1874_v30  ;;  %v2397_v49 = vpop.f32.mrf.mxu0  ;;  %v2217_v47 = vpop.f32.mrf.mxu3 }
 0x26a   : > { %2549 = vst.msk [vmem:[%s3796_s14 + $0x50] sm:$0xf] %vm2528_vm4, %v2520_v9  ;;  %v2433_v34 = vadd.f32 %v2394_v36, %v2246_v2 }
 0x26c   : > { %v2465_v39 = vadd.f32 %v3831_v42, %v2433_v34 }
 0x26d   : > { %v1838_v60 = vpop.f32.mrf.mxu2 }
 0x26e   : > { %v2493_v58 = vmax.f32 %v2465_v39, 0.0  ;;  %v1875_v25 = vadd.f32 %v1838_v60, %v1623_v4  ;;  %v1588_v53 = vpop.f32.mrf.mxu1 }
 0x26f   : > { %v1624_v20 = vadd.f32 %v1588_v53, %v3771_v28 }
 0x270   : > { %v2521_v17 = vpack.c.bf16 %v2493_v58, %v2493_v58  ;;  %v2247_v6 = vadd.f32 %v2210_v12, %v1875_v25  ;;  %v2399_v55 = vpop.f32.mrf.mxu0  ;;  %v2220_v33 = vpop.f32.mrf.mxu3 }
 0x272   : > { %2550 = vst.msk [vmem:[%s3796_s14 + $0x54] sm:$0xf] %vm2528_vm4, %v2521_v17  ;;  %v2434_v27 = vadd.f32 %v2397_v49, %v2247_v6 }
 0x274   : > { %v2466_v10 = vadd.f32 %v3831_v42, %v2434_v27 }
 0x275   : > { %v1840_v48 = vpop.f32.mrf.mxu2 }
 0x276   : > { %v2494_v63 = vmax.f32 %v2466_v10, 0.0  ;;  %v1876_v15 = vadd.f32 %v1840_v48, %v1624_v20  ;;  %v1591_v62 = vpop.f32.mrf.mxu1 }
 0x277   : > { %v1625_v1 = vadd.f32 %v1591_v62, %v3777_v35 }
 0x278   : > { %v2522_v22 = vpack.c.bf16 %v2494_v63, %v2494_v63  ;;  %v2248_v61 = vadd.f32 %v2212_v50, %v1876_v15  ;;  %v2402_v38 = vpop.f32.mrf.mxu0  ;;  %v2222_v9 = vpop.f32.mrf.mxu3 }
 0x27a   : > { %2551 = vst.msk [vmem:[%s3796_s14 + $0x58] sm:$0xf] %vm2528_vm4, %v2522_v22  ;;  %v2435_v3 = vadd.f32 %v2399_v55, %v2248_v61 }
 0x27c   : > { %v2467_v37 = vadd.f32 %v3831_v42, %v2435_v3 }
 0x27d   : > { %v1843_v43 = vpop.f32.mrf.mxu2 }
 0x27e   : > { %v2495_v14 = vmax.f32 %v2467_v37, 0.0  ;;  %v1877_v54 = vadd.f32 %v1843_v43, %v1625_v1  ;;  %v1593_v28 = vpop.f32.mrf.mxu1 }
 0x27f   : > { %v1626_v19 = vadd.f32 %v1593_v28, %v3798_v21 }
 0x280   : > { %v2523_v13 = vpack.c.bf16 %v2495_v14, %v2495_v14  ;;  %v2249_v56 = vadd.f32 %v2215_v57, %v1877_v54  ;;  %v2404_v41 = vpop.f32.mrf.mxu0 }
 0x282   : > { %2552 = vst.msk [vmem:[%s3796_s14 + $0x5c] sm:$0xf] %vm2528_vm4, %v2523_v13  ;;  %v2436_v52 = vadd.f32 %v2402_v38, %v2249_v56 }
 0x284   : > { %v2468_v51 = vadd.f32 %v3831_v42, %v2436_v52 }
 0x285   : > { %v1845_v8 = vpop.f32.mrf.mxu2 }
 0x286   : > { %v2496_v31 = vmax.f32 %v2468_v51, 0.0  ;;  %v1878_v59 = vadd.f32 %v1845_v8, %v1626_v19  ;;  %v1596_v35 = vpop.f32.mrf.mxu1 }
 0x287   : > { %v1627_v16 = vadd.f32 %v1596_v35, %v3806_v11 }
 0x288   : > { %v2524_v26 = vpack.c.bf16 %v2496_v31, %v2496_v31  ;;  %v2250_v29 = vadd.f32 %v2217_v47, %v1878_v59  ;;  %v2407_v21 = vpop.f32.mrf.mxu0 }
 0x28a   : > { %2553 = vst.msk [vmem:[%s3796_s14 + $0x60] sm:$0xf] %vm2528_vm4, %v2524_v26  ;;  %v2437_v46 = vadd.f32 %v2404_v41, %v2250_v29 }
 0x28c   : > { %v2469_v44 = vadd.f32 %v3831_v42, %v2437_v46 }
 0x28d   : > { %v1848_v5 = vpop.f32.mrf.mxu2 }
 0x28e   : > { %v2497_v45 = vmax.f32 %v2469_v44, 0.0  ;;  %v1879_v36 = vadd.f32 %v1848_v5, %v1627_v16  ;;  %v1598_v23 = vpop.f32.mrf.mxu1 }
 0x28f   : > { %v1628_v18 = vadd.f32 %v1598_v23, %v3821_v0 }
 0x290   : > { %v2525_v24 = vpack.c.bf16 %v2497_v45, %v2497_v45  ;;  %v2251_v40 = vadd.f32 %v2220_v33, %v1879_v36  ;;  %v2409_v34 = vpop.f32.mrf.mxu0 }
 0x292   : > { %2554 = vst.msk [vmem:[%s3796_s14 + $0x64] sm:$0xf] %vm2528_vm4, %v2525_v24  ;;  %v2438_v7 = vadd.f32 %v2407_v21, %v2251_v40 }
 0x294   : > { %v2470_v12 = vadd.f32 %v3831_v42, %v2438_v7 }
 0x295   : > { %v1850_v30 = vpop.f32.mrf.mxu2 }
 0x296   : > { %v2498_v32 = vmax.f32 %v2470_v12, 0.0  ;;  %v1880_v11 = vadd.f32 %v1850_v30, %v1628_v18 }
 0x298   : > { %v2526_v2 = vpack.c.bf16 %v2498_v32, %v2498_v32  ;;  %v2252_v49 = vadd.f32 %v2222_v9, %v1880_v11 }
 0x29a   : > { %2555 = vst.msk [vmem:[%s3796_s14 + $0x68] sm:$0xf] %vm2528_vm4, %v2526_v2  ;;  %v2439_v39 = vadd.f32 %v2409_v34, %v2252_v49 }
 0x29c   : > { %v2471_v4 = vadd.f32 %v3831_v42, %v2439_v39 }
 0x29e   : > { %v2499_v60 = vmax.f32 %v2471_v4, 0.0 }
 0x2a0   : > { %v2527_v58 = vpack.c.bf16 %v2499_v60, %v2499_v60 }
 0x2a2   : > { %2556 = vst.msk [vmem:[%s3796_s14 + $0x6c] sm:$0xf] %vm2528_vm4, %v2527_v58 }
 0x2a3 PF: > { %s13_s12 = sadd.s32 1, %s3135_s12  }
 0x2a4   : > { %p10_p4 = scmp.ge.s32.totalorder %s13_s12, 4  }
 0x2a6   :  { %12 = sbr.rel (!%p10_p4) target bundleno = 1 (0x1), region = 70 }

// kernel: forward.5
= control target key start
LH: loop header
LB: loop body
LE: loop exit
PB: predicated region body
PF: predicated region fallthrough
CT: control target
= control target key end

     0   :  { %s3465_s15 = smov 0   ;;  %s4520_s0 = inlined_call_operand.vmem [shape: bf16[2,232,32], index: 0, kind: input, shape index: {}]   ;;  %s4521_s1 = inlined_call_operand.vmem [shape: bf16[9,32,64], index: 1, kind: input, shape index: {}]   ;;  %s4522_s2 = inlined_call_operand.vmem [shape: f32[1,64], index: 2, kind: input, shape index: {}]   ;;  %s4523_s3 = inlined_call_operand.vmem [shape: bf16[4,36,192], index: 3, kind: input, shape index: {}]   ;;  %s4524_s4 = inlined_call_operand.vmem [shape: bf16[2,44,64], index: 4, kind: output, shape index: {}]  }
   0x1 LB: > { %s2763_s16 = sadd.s32 4294967295, %s3437_s15   ;;  %p2767_p0 = scmp.ge.s32.totalorder %s3437_s15, 1  ;;  %s3437_s15 = sphi %s3465_s15, %s14_s15  }
   0x2   : > { %p162_p1 = scmp.lt.s32.totalorder %s3437_s15, 3 }
   0x4   : > { %p163_p2 = pnand %p2767_p0, %p162_p1 }
   0x6   : > { %166 = sbr.rel (%p163_p2) target bundleno = 962 (0x3c2), region = 36 }
   0xb   : > { %v3315_v0 = vld [vmem:[%s4521_s1 + $0x8] sm:$0xff]  ;;  %p188_p3 = scmp.lt.s32.totalorder %s2763_s16, 1  ;;  %v3317_v2 = vld [vmem:[%s4521_s1 + $0x18] sm:$0xff]  ;;  %v3314_v3 = vld [vmem:[%s4521_s1] sm:$0xff]  ;;  %vm409_vm0 = vcmask 261120   ;;  %vm629_vm1 = vcmask 1046528  }
   0xc   : > { %v3319_v1 = vld [vmem:[%s4521_s1 + $0x28] sm:$0xff]  ;;  %557 = vmatpush.bf16.msra.mxu1 %v3315_v0  ;;  %v3318_v4 = vld [vmem:[%s4521_s1 + $0x20] sm:$0xff]  ;;  %452 = vmatpush.bf16.msra.mxu0 %v3317_v2  ;;  %v3316_v5 = vld [vmem:[%s4521_s1 + $0x10] sm:$0xff]  ;;  %vm296_vm2 = vsmask.f32 7424  ;;  %vm2367_vm3 = vcmask 523264  }
   0xd   : > { %709 = vmatpush.bf16.msra.mxu2 %v3319_v1  ;;  %s4536_s16 = smov (!%p188_p3, %s2763_s16), 1  ;;  %3417 = vmatpush.bf16.msra.mxu3 %v3317_v2  ;;  %v3333_v39 = vld [vmem:[%s4521_s1 + $0x38] sm:$0xff]  ;;  %v3332_v45 = vld [vmem:[%s4521_s1 + $0x30] sm:$0xff]  ;;  %vm2698_vm4 = vcmask 519168   ;;  %vm2703_vm5 = vcmask 517120   ;;  %vm2705_vm6 = vcmask 519170  }
   0xe   : > { %s3419_s29 = smul.u32 116, %s4536_s16 }
   0xf   : > { %s3420_s9 = smul.u32 24, %s4536_s16 }
  0x10   : > { %558 = vmatpush.bf16.msra.mxu1 %v3314_v3  ;;  %s3497_s6 = scalar_lea.vmem %s4520_s0, %s3419_s29  ;;  %453 = vmatpush.bf16.msra.mxu0 %v3316_v5 }
  0x11   : > { %710 = vmatpush.bf16.msra.mxu2 %v3318_v4  ;;  %v3395_v6 = vld [vmem:[%s3497_s6] sm:$0xff]   ;;  %v3303_v8 = vld [vmem:[%s3497_s6 + $0x8] sm:$0xff]  ;;  %3418 = vmatpush.bf16.msra.mxu3 %v3316_v5  ;;  %v3507_v13 = vld [vmem:[%s3497_s6 + $0x50] sm:$0xff]  ;;  %s197_s12 = scalar_lea.vmem %s4524_s4, %s3420_s9 }
  0x12   : > { %v3406_v7 = vld [vmem:[%s3497_s6] sm:$0xf0]  ;;  %v298_v9 = vshrl.u32 %v3395_v6, 16  ;;  %v300_v10 = vshll.u32 %v3395_v6, 16  ;;  %v3407_v11 = vld [vmem:[%s3497_s6] sm:$0xe] }
  0x13   : > { %v3504_v12 = vld [vmem:[%s3497_s6 + $0x48] sm:$0xff]  ;;  %2846 = vmatmul.msk.bf16.vlgmr.msra.gmra.mxu1 %vm409_vm0, %v3395_v6  ;;  %v3408_v14 = vor.u32 %v3407_v11, %v3406_v7  ;;  %v631_v15 = vrot.slane %v3303_v8, 1  ;;  %v305_v16 = vshll.u32 %v3303_v8, 16  ;;  %v377_v20 = vshll.u32 %v3507_v13, 16  ;;  %v3304_v30 = vld [vmem:[%s3497_s6 + $0x10] sm:$0xff]  ;;  %v3524_v31 = vld [vmem:[%s3497_s6 + $0x58] sm:$0xff] }
  0x14   : > { %v302_v17 = vrot.slane %v300_v10, 1  ;;  %v369_v18 = vshll.u32 %v3504_v12, 16  ;;  %v373_v19 = vshrl.u32 %v3504_v12, 16  ;;  %v309_v32 = vshrl.u32 %v3303_v8, 16  ;;  %v227_v43 = vld [vmem:[%s3497_s6 + $0x60] sm:$0x1] }
  0x15   : > { %v630_v21 = vrot.slane %v3408_v14, 1  ;;  %v307_v22 = vrot.slane %v305_v16, 1  ;;  %v379_v25 = vrot.slane %v377_v20, 1  ;;  %v313_v33 = vshll.u32 %v3304_v30, 16  ;;  %939 = vmatpush.bf16.msrb.mxu3 %v3333_v39  ;;  %v3305_v48 = vld [vmem:[%s3497_s6 + $0x18] sm:$0xff]  ;;  %v3306_v62 = vld [vmem:[%s3497_s6 + $0x20] sm:$0xff] }
  0x16   : > { %v303_v23 = vor.u32 %v302_v17, %v298_v9  ;;  %v3513_v24 = vrot.slane %v369_v18, 1  ;;  %v381_v34 = vshrl.u32 %v3507_v13, 16  ;;  %v385_v35 = vshll.u32 %v3524_v31, 16  ;;  %v3320_v6 = vld [vmem:[%s3497_s6 + $0x8] sm:$0xff]  ;;  %v3321_v17 = vld [vmem:[%s3497_s6 + $0x10] sm:$0xff] }
  0x17   : > { %v632_v26 = vsel %vm629_vm1, %v630_v21, %v631_v15  ;;  %v633_v36 = vrot.slane %v3304_v30, 1  ;;  %v311_v37 = vor.u32 %v309_v32, %v307_v22  ;;  %v315_v38 = vrot.slane %v313_v33, 1  ;;  %v3307_v7 = vld [vmem:[%s3497_s6 + $0x28] sm:$0xff]  ;;  %v3308_v18 = vld [vmem:[%s3497_s6 + $0x30] sm:$0xff] }
  0x18   : > { %2870 = vmatmul.msk.bf16.vlgmr.msra.gmra.mxu2 %vm409_vm0, %v632_v26  ;;  %v308_v27 = vsel %vm296_vm2, %v303_v23, %v307_v22  ;;  %v375_v28 = vor.u32 %v373_v19, %v3513_v24  ;;  %v383_v40 = vor.u32 %v381_v34, %v379_v25  ;;  %v387_v41 = vrot.slane %v385_v35, 1 }
  0x19   : > { %2826 = vmatmul.msk.bf16.vlgmr.msra.gmra.mxu0 %vm409_vm0, %v308_v27  ;;  %v634_v42 = vsel %vm629_vm1, %v631_v15, %v633_v36  ;;  %v316_v44 = vsel %vm296_vm2, %v311_v37, %v315_v38  ;;  %v282_v47 = vunpack.c.l.b16 %v227_v43  ;;  %940 = vmatpush.bf16.msrb.mxu3 %v3332_v45  ;;  %v317_v50 = vshrl.u32 %v3304_v30, 16  ;;  %v3322_v27 = vld [vmem:[%s3497_s6 + $0x18] sm:$0xff]  ;;  %v3323_v37 = vld [vmem:[%s3497_s6 + $0x20] sm:$0xff] }
  0x1a   : > { %v380_v29 = vsel %vm296_vm2, %v375_v28, %v379_v25  ;;  %v388_v46 = vsel %vm296_vm2, %v383_v40, %v387_v41  ;;  %v321_v51 = vshll.u32 %v3305_v48, 16  ;;  %v389_v52 = vshrl.u32 %v3524_v31, 16  ;;  %v3309_v28 = vld [vmem:[%s3497_s6 + $0x38] sm:$0xff] }
  0x1b   : > { %2835 = vmatmul.msk.bf16.vlgmr.msra.gmra.mxu3 %vm409_vm0, %v380_v29  ;;  %v3543_v49 = vpack.c.b16 %v282_v47, %v282_v47  ;;  %v635_v54 = vrot.slane %v3305_v48, 1  ;;  %v319_v55 = vor.u32 %v317_v50, %v315_v38  ;;  %v325_v63 = vshrl.u32 %v3305_v48, 16  ;;  %v3310_v38 = vld [vmem:[%s3497_s6 + $0x40] sm:$0xff] }
  0x1c   : > { %v323_v56 = vrot.slane %v321_v51, 1  ;;  %v391_v57 = vor.u32 %v389_v52, %v387_v41  ;;  %v329_v0 = vshll.u32 %v3306_v62, 16  ;;  %v637_v1 = vrot.slane %v3306_v62, 1 }
  0x1d   : > { %v393_v53 = vshll.u32 %v3543_v49, 16  ;;  %v636_v59 = vsel %vm629_vm1, %v633_v36, %v635_v54  ;;  %v337_v9 = vshll.u32 %v3307_v7, 16  ;;  %v639_v10 = vrot.slane %v3307_v7, 1 }
  0x1e   : > { %v324_v60 = vsel %vm296_vm2, %v319_v55, %v323_v56  ;;  %v327_v2 = vor.u32 %v325_v63, %v323_v56  ;;  %v331_v3 = vrot.slane %v329_v0, 1  ;;  %v638_v4 = vsel %vm629_vm1, %v635_v54, %v637_v1 }
  0x1f   : > { %v395_v58 = vrot.slane %v393_v53, 1  ;;  %v339_v14 = vrot.slane %v337_v9, 1  ;;  %v640_v15 = vsel %vm629_vm1, %v637_v1, %v639_v10  ;;  %v341_v19 = vshrl.u32 %v3307_v7, 16 }
  0x20   : > { %v332_v5 = vsel %vm296_vm2, %v327_v2, %v331_v3  ;;  %v345_v20 = vshll.u32 %v3308_v18, 16  ;;  %v641_v21 = vrot.slane %v3308_v18, 1  ;;  %v349_v29 = vshrl.u32 %v3308_v18, 16 }
  0x21   : > { %v396_v61 = vsel %vm296_vm2, %v391_v57, %v395_v58  ;;  %v343_v22 = vor.u32 %v341_v19, %v339_v14  ;;  %v643_v32 = vrot.slane %v3309_v28, 1  ;;  %v357_v39 = vshrl.u32 %v3309_v28, 16  ;;  %v3325_v58 = vld [vmem:[%s3497_s6 + $0x30] sm:$0xff]  ;;  %v3326_v19 = vld [vmem:[%s3497_s6 + $0x38] sm:$0xff] }
  0x22   : > { %v347_v23 = vrot.slane %v345_v20, 1  ;;  %v642_v25 = vsel %vm629_vm1, %v639_v10, %v641_v21  ;;  %v361_v40 = vshll.u32 %v3310_v38, 16  ;;  %v645_v41 = vrot.slane %v3310_v38, 1 }
  0x23   : > { %2847 = vmatmul.msk.bf16.gmra.mxu1 %vm409_vm0, %v3303_v8  ;;  %v333_v8 = vshrl.u32 %v3306_v62, 16  ;;  %v644_v35 = vsel %vm629_vm1, %v641_v21, %v643_v32  ;;  %v365_v50 = vshrl.u32 %v3310_v38, 16  ;;  %v647_v52 = vrot.slane %v3504_v12, 1  ;;  %v3631_v21 = vld [vmem:[%s3497_s6 + $0x18] sm:$0xff] }
  0x24   : > { %v348_v26 = vsel %vm296_vm2, %v343_v22, %v347_v23  ;;  %v351_v33 = vor.u32 %v349_v29, %v347_v23  ;;  %v646_v45 = vsel %vm629_vm1, %v643_v32, %v645_v41  ;;  %v3347_v32 = vld [vmem:[%s4521_s1 + $0x50] sm:$0xff] }
  0x25   : > { %v335_v11 = vor.u32 %v333_v8, %v331_v3  ;;  %v648_v54 = vsel %vm629_vm1, %v645_v41, %v647_v52 }
  0x27   : > { %v340_v16 = vsel %vm296_vm2, %v335_v11, %v339_v14 }
  0x28   : > { %2871 = vmatmul.msk.bf16.gmra.mxu2 %vm409_vm0, %v634_v42  ;;  %v3346_v42 = vld [vmem:[%s4521_s1 + $0x48] sm:$0xff] }
  0x29   : > { %2827 = vmatmul.msk.bf16.gmra.mxu0 %vm409_vm0, %v316_v44  ;;  %v363_v44 = vrot.slane %v361_v40, 1 }
  0x2a   : > { %1273 = vmatpush.bf16.msrb.mxu0 %v3346_v42 }
  0x2b   : > { %2836 = vmatmul.msk.bf16.gmra.mxu3 %vm409_vm0, %v388_v46  ;;  %v3345_v46 = vld [vmem:[%s4521_s1 + $0x40] sm:$0xff]  ;;  %v367_v53 = vor.u32 %v365_v50, %v363_v44 }
  0x2d   : > { %v372_v56 = vsel %vm296_vm2, %v367_v53, %v3513_v24 }
  0x2e   : > { %1274 = vmatpush.bf16.msrb.mxu0 %v3345_v46 }
  0x33   : > { %2848 = vmatmul.msk.bf16.gmra.mxu1 %vm409_vm0, %v3304_v30  ;;  %v353_v30 = vshll.u32 %v3309_v28, 16 }
  0x35   : > { %v355_v34 = vrot.slane %v353_v30, 1  ;;  %v3362_v30 = vld [vmem:[%s4521_s1 + $0x68] sm:$0xff] }
  0x36   : > { %1678 = vmatpush.bf16.msrb.mxu2 %v3362_v30  ;;  %v3349_v30 = vld [vmem:[%s3497_s6 + $0x10] sm:$0xff] }
  0x37   : > { %v356_v36 = vsel %vm296_vm2, %v351_v33, %v355_v34  ;;  %v359_v43 = vor.u32 %v357_v39, %v355_v34  ;;  %v651_v34 = vrot.slane %v3524_v31, 1 }
  0x38   : > { %2872 = vmatmul.msk.bf16.gmra.mxu2 %vm409_vm0, %v636_v59  ;;  %v3409_v59 = vld [vmem:[%s3497_s6 + $0x8] sm:$0xff]  }
  0x39   : > { %2828 = vmatmul.msk.bf16.gmra.mxu0 %vm409_vm0, %v324_v60  ;;  %v364_v47 = vsel %vm296_vm2, %v359_v43, %v363_v44  ;;  %v1120_v24 = vshrl.u32 %v3409_v59, 16 }
  0x3b   : > { %2837 = vmatmul.msk.bf16.gmra.mxu3 %vm409_vm0, %v396_v61  ;;  %v3610_v61 = vld [vmem:[%s3497_s6 + $0x10] sm:$0xff] }
  0x43   : > { %2849 = vmatmul.msk.bf16.gmra.mxu1 %vm409_vm0, %v3305_v48  ;;  %v3324_v48 = vld [vmem:[%s3497_s6 + $0x28] sm:$0xff] }
  0x48   : > { %2873 = vmatmul.msk.bf16.gmra.mxu2 %vm409_vm0, %v638_v4  ;;  %v1127_v4 = vshll.u32 %v3610_v61, 16 }
  0x49   : > { %2829 = vmatmul.msk.bf16.gmra.mxu0 %vm409_vm0, %v332_v5 }
  0x4a   : > { %v1129_v9 = vrot.slane %v1127_v4, 1 }
  0x4b   : > { %2942 = vmatmul.msk.bf16.vlgmr.msrb.gmra.mxu3 %vm409_vm0, %v3320_v6 }
  0x53   : > { %2850 = vmatmul.msk.bf16.gmra.mxu1 %vm409_vm0, %v3306_v62  ;;  %v1122_v62 = vshll.u32 %v3409_v59, 16 }
  0x55   : > { %v1124_v3 = vrot.slane %v1122_v62, 1 }
  0x57   : > { %v1125_v8 = vor.u32 %v1124_v3, %v1120_v24 }
  0x58   : > { %2874 = vmatmul.msk.bf16.gmra.mxu2 %vm409_vm0, %v640_v15 }
  0x59   : > { %2830 = vmatmul.msk.bf16.gmra.mxu0 %vm409_vm0, %v340_v16 }
  0x5b   : > { %2943 = vmatmul.msk.bf16.gmra.mxu3 %vm409_vm0, %v3321_v17  ;;  %v1130_v17 = vsel %vm296_vm2, %v1125_v8, %v1129_v9 }
  0x63   : > { %2851 = vmatmul.msk.bf16.gmra.mxu1 %vm409_vm0, %v3307_v7  ;;  %v649_v7 = vrot.slane %v3507_v13, 1 }
  0x65   : > { %v650_v14 = vsel %vm629_vm1, %v647_v52, %v649_v7  ;;  %v652_v40 = vsel %vm629_vm1, %v649_v7, %v651_v34  ;;  %v1139_v52 = vshrl.u32 %v3631_v21, 16 }
  0x68   : > { %2875 = vmatmul.msk.bf16.gmra.mxu2 %vm409_vm0, %v642_v25 }
  0x69   : > { %2831 = vmatmul.msk.bf16.gmra.mxu0 %vm409_vm0, %v348_v26 }
  0x6b   : > { %2944 = vmatmul.msk.bf16.gmra.mxu3 %vm409_vm0, %v3322_v27  ;;  %v1131_v27 = vshrl.u32 %v3610_v61, 16 }
  0x73   : > { %2852 = vmatmul.msk.bf16.gmra.mxu1 %vm409_vm0, %v3308_v18 }
  0x78   : > { %2876 = vmatmul.msk.bf16.gmra.mxu2 %vm409_vm0, %v644_v35  ;;  %v1133_v35 = vor.u32 %v1131_v27, %v1129_v9 }
  0x79   : > { %2832 = vmatmul.msk.bf16.gmra.mxu0 %vm409_vm0, %v356_v36 }
  0x7b   : > { %2945 = vmatmul.msk.bf16.gmra.mxu3 %vm409_vm0, %v3323_v37 }
  0x83   : > { %2853 = vmatmul.msk.bf16.gmra.mxu1 %vm409_vm0, %v3309_v28  ;;  %v1135_v28 = vshll.u32 %v3631_v21, 16 }
  0x85   : > { %v1137_v36 = vrot.slane %v1135_v28, 1 }
  0x87   : > { %v1138_v43 = vsel %vm296_vm2, %v1133_v35, %v1137_v36 }
  0x88   : > { %2877 = vmatmul.msk.bf16.gmra.mxu2 %vm409_vm0, %v646_v45  ;;  %v3327_v45 = vld [vmem:[%s3497_s6 + $0x40] sm:$0xff] }
  0x89   : > { %2833 = vmatmul.msk.bf16.gmra.mxu0 %vm409_vm0, %v364_v47 }
  0x8b   : > { %2946 = vmatmul.msk.bf16.gmra.mxu3 %vm409_vm0, %v3324_v48 }
  0x90   : > { %v560_v51 = vpop.f32.mrf.mxu1 }
  0x93   : > { %2854 = vmatmul.msk.bf16.gmra.mxu1 %vm409_vm0, %v3310_v38  ;;  %v3361_v38 = vld [vmem:[%s4521_s1 + $0x60] sm:$0xff] }
  0x94   : > { %1679 = vmatpush.bf16.msrb.mxu2 %v3361_v38  ;;  %v3713_v38 = vld [vmem:[%s3497_s6 + $0x30] sm:$0xff] }
  0x96   : > { %v455_v55 = vpop.f32.mrf.mxu0 }
  0x97   : > { %v561_v57 = vadd.f32 %v560_v51, %v455_v55 }
  0x98   : > { %2878 = vmatmul.msk.bf16.gmra.mxu2 %vm409_vm0, %v648_v54  ;;  %v562_v60 = vpop.f32.mrf.mxu1 }
  0x99   : > { %2834 = vmatmul.msk.bf16.gmra.mxu0 %vm409_vm0, %v372_v56  ;;  %v653_v56 = vrot.slane %v3543_v49, 1  ;;  %v3328_v49 = vld [vmem:[%s3497_s6 + $0x48] sm:$0xff] }
  0x9b   : > { %v712_v63 = vpop.f32.mrf.mxu2  ;;  %2947 = vmatmul.msk.bf16.gmra.mxu3 %vm409_vm0, %v3325_v58  ;;  %v654_v62 = vsel %vm629_vm1, %v651_v34, %v653_v56 }
  0x9c   : > { %v3613_v0 = vadd.f32 %v712_v63, %v561_v57  ;;  %v1141_v57 = vor.u32 %v1139_v52, %v1137_v36  ;;  %v3410_v63 = vld [vmem:[%s3497_s6 + $0x8] sm:$0xf0]  ;;  %v3329_v36 = vld [vmem:[%s3497_s6 + $0x50] sm:$0xff] }
  0x9e   : > { %v457_v1 = vpop.f32.mrf.mxu0  ;;  %v3615_v2 = vpop.f32.mrf.mxu3 }
  0x9f   : > { %v563_v5 = vadd.f32 %v562_v60, %v457_v1  ;;  %v3411_v1 = vld [vmem:[%s3497_s6 + $0x8] sm:$0xe] }
  0xa0   : > { %v565_v6 = vpop.f32.mrf.mxu1  ;;  %v3412_v7 = vor.u32 %v3411_v1, %v3410_v63  ;;  %v3374_v63 = vld [vmem:[%s4521_s1 + $0x70] sm:$0xff] }
  0xa3   : > { %v714_v10 = vpop.f32.mrf.mxu2  ;;  %2855 = vmatmul.msk.bf16.gmra.mxu1 %vm409_vm0, %v3504_v12  ;;  %v3348_v12 = vld [vmem:[%s4521_s1 + $0x58] sm:$0xff] }
  0xa4   : > { %v3621_v11 = vadd.f32 %v714_v10, %v563_v5  ;;  %1448 = vmatpush.bf16.msrb.mxu1 %v3348_v12  ;;  %v1369_v10 = vrot.slane %v3412_v7, 1 }
  0xa6   : > { %v460_v15 = vpop.f32.mrf.mxu0  ;;  %v3624_v16 = vpop.f32.mrf.mxu3 }
  0xa7   : > { %v566_v18 = vadd.f32 %v565_v6, %v460_v15 }
  0xa8   : > { %2879 = vmatmul.msk.bf16.gmra.mxu2 %vm409_vm0, %v650_v14  ;;  %v567_v20 = vpop.f32.mrf.mxu1  ;;  %1449 = vmatpush.bf16.msrb.mxu1 %v3347_v32  ;;  %v1370_v14 = vrot.slane %v3610_v61, 1 }
  0xa9   : > { %3010 = vmatmul.msk.bf16.vlgmr.msrb.gmra.mxu0 %vm409_vm0, %v1130_v17 }
  0xab   : > { %v717_v22 = vpop.f32.mrf.mxu2  ;;  %2948 = vmatmul.msk.bf16.gmra.mxu3 %vm409_vm0, %v3326_v19 }
  0xac   : > { %v3637_v23 = vadd.f32 %v717_v22, %v566_v18 }
  0xae   : > { %v462_v25 = vpop.f32.mrf.mxu0  ;;  %v3639_v26 = vpop.f32.mrf.mxu3 }
  0xaf   : > { %v568_v29 = vadd.f32 %v567_v20, %v462_v25  ;;  %v1371_v25 = vsel %vm629_vm1, %v1369_v10, %v1370_v14 }
  0xb0   : > { %v570_v33 = vpop.f32.mrf.mxu1 }
  0xb3   : > { %v719_v37 = vpop.f32.mrf.mxu2  ;;  %2856 = vmatmul.msk.bf16.gmra.mxu1 %vm409_vm0, %v3507_v13  ;;  %v3665_v13 = vld [vmem:[%s3497_s6 + $0x20] sm:$0xff] }
  0xb4   : > { %v3655_v39 = vadd.f32 %v719_v37, %v568_v29  ;;  %v1143_v53 = vshll.u32 %v3665_v13, 16  ;;  %v1147_v18 = vshrl.u32 %v3665_v13, 16 }
  0xb6   : > { %v465_v41 = vpop.f32.mrf.mxu0  ;;  %v3658_v42 = vpop.f32.mrf.mxu3  ;;  %v1145_v58 = vrot.slane %v1143_v53, 1 }
  0xb7   : > { %v571_v44 = vadd.f32 %v570_v33, %v465_v41 }
  0xb8   : > { %2880 = vmatmul.msk.bf16.gmra.mxu2 %vm409_vm0, %v652_v40  ;;  %v572_v46 = vpop.f32.mrf.mxu1  ;;  %v1146_v4 = vsel %vm296_vm2, %v1141_v57, %v1145_v58  ;;  %v1149_v27 = vor.u32 %v1147_v18, %v1145_v58  ;;  %v3350_v58 = vld [vmem:[%s3497_s6 + $0x18] sm:$0xff] }
  0xb9   : > { %3011 = vmatmul.msk.bf16.gmra.mxu0 %vm409_vm0, %v1138_v43  ;;  %v1372_v43 = vrot.slane %v3631_v21, 1  ;;  %v3375_v21 = vld [vmem:[%s4521_s1 + $0x78] sm:$0xff] }
  0xba   : > { %2012 = vmatpush.bf16.msra.mxu3 %v3375_v21 }
  0xbb   : > { %v722_v47 = vpop.f32.mrf.mxu2  ;;  %2949 = vmatmul.msk.bf16.gmra.mxu3 %vm409_vm0, %v3327_v45  ;;  %v1373_v53 = vsel %vm629_vm1, %v1370_v14, %v1372_v43  ;;  %v1163_v14 = vshrl.u32 %v3713_v38, 16 }
  0xbc   : > { %v3668_v48 = vadd.f32 %v722_v47, %v571_v44 }
  0xbe   : > { %v467_v50 = vpop.f32.mrf.mxu0  ;;  %v3670_v51 = vpop.f32.mrf.mxu3  ;;  %2013 = vmatpush.bf16.msra.mxu3 %v3374_v63 }
  0xbf   : > { %v573_v54 = vadd.f32 %v572_v46, %v467_v50  ;;  %v1159_v46 = vshll.u32 %v3713_v38, 16 }
  0xc0   : > { %v575_v55 = vpop.f32.mrf.mxu1 }
  0xc3   : > { %v724_v59 = vpop.f32.mrf.mxu2  ;;  %2857 = vmatmul.msk.bf16.gmra.mxu1 %vm409_vm0, %v3524_v31  ;;  %v3689_v31 = vld [vmem:[%s3497_s6 + $0x28] sm:$0xff] }
  0xc4   : > { %v3677_v60 = vadd.f32 %v724_v59, %v573_v54  ;;  %v1151_v19 = vshll.u32 %v3689_v31, 16 }
  0xc6   : > { %v470_v24 = vpop.f32.mrf.mxu0  ;;  %v3682_v3 = vpop.f32.mrf.mxu3  ;;  %v1153_v28 = vrot.slane %v1151_v19, 1 }
  0xc7   : > { %v576_v5 = vadd.f32 %v575_v55, %v470_v24  ;;  %v1161_v55 = vrot.slane %v1159_v46, 1 }
  0xc8   : > { %2881 = vmatmul.msk.bf16.gmra.mxu2 %vm409_vm0, %v654_v62  ;;  %v577_v6 = vpop.f32.mrf.mxu1  ;;  %v1154_v34 = vsel %vm296_vm2, %v1149_v27, %v1153_v28 }
  0xc9   : > { %3012 = vmatmul.msk.bf16.gmra.mxu0 %vm409_vm0, %v1146_v4  ;;  %v3330_v4 = vld [vmem:[%s3497_s6 + $0x58] sm:$0xff] }
  0xcb   : > { %v727_v8 = vpop.f32.mrf.mxu2  ;;  %2950 = vmatmul.msk.bf16.gmra.mxu3 %vm409_vm0, %v3328_v49  ;;  %v3743_v49 = vld [vmem:[%s3497_s6 + $0x38] sm:$0xff] }
  0xcc   : > { %v3692_v9 = vadd.f32 %v727_v8, %v576_v5  ;;  %v1374_v8 = vrot.slane %v3665_v13, 1 }
  0xce   : > { %v472_v15 = vpop.f32.mrf.mxu0  ;;  %v942_v17 = vpop.f32.mrf.mxu3 }
  0xcf   : > { %v578_v20 = vadd.f32 %v577_v6, %v472_v15  ;;  %v3698_v22 = vadd.f32 %v942_v17, %v3613_v0  ;;  %v1167_v15 = vshll.u32 %v3743_v49, 16 }
  0xd0   : > { %v580_v12 = vpop.f32.mrf.mxu1 }
  0xd3   : > { %v729_v29 = vpop.f32.mrf.mxu2  ;;  %3034 = vmatmul.msk.bf16.vlgmr.msrb.gmra.mxu1 %vm409_vm0, %v1371_v25  ;;  %v1169_v25 = vrot.slane %v1167_v15, 1 }
  0xd4   : > { %v3702_v61 = vadd.f32 %v729_v29, %v578_v20  ;;  %v1375_v20 = vsel %vm629_vm1, %v1372_v43, %v1374_v8 }
  0xd6   : > { %v475_v32 = vpop.f32.mrf.mxu0  ;;  %v944_v33 = vpop.f32.mrf.mxu3 }
  0xd7   : > { %v581_v35 = vadd.f32 %v580_v12, %v475_v32  ;;  %v3707_v0 = vadd.f32 %v944_v33, %v3621_v11  ;;  %v1155_v11 = vshrl.u32 %v3689_v31, 16  ;;  %v1165_v12 = vor.u32 %v1163_v14, %v1161_v55 }
  0xd8   : > { %3106 = vmatmul.msk.bf16.vlgmr.msrb.gmra.mxu2 %vm409_vm0, %v3349_v30  ;;  %v582_v37 = vpop.f32.mrf.mxu1 }
  0xd9   : > { %3013 = vmatmul.msk.bf16.gmra.mxu0 %vm409_vm0, %v1154_v34  ;;  %v1157_v54 = vor.u32 %v1155_v11, %v1153_v28  ;;  %v3351_v28 = vld [vmem:[%s3497_s6 + $0x20] sm:$0xff]  ;;  %v1170_v32 = vsel %vm296_vm2, %v1165_v12, %v1169_v25  ;;  %v1378_v12 = vrot.slane %v3713_v38, 1 }
  0xda   : > { %v3331_v34 = vld [vmem:[%s3497_s6 + $0x60] sm:$0xff] }
  0xdb   : > { %v732_v40 = vpop.f32.mrf.mxu2  ;;  %2951 = vmatmul.msk.bf16.gmra.mxu3 %vm409_vm0, %v3329_v36  ;;  %v1162_v62 = vsel %vm296_vm2, %v1157_v54, %v1161_v55  ;;  %v3413_v36 = vld [vmem:[%s3497_s6 + $0x10] sm:$0xff]  }
  0xdc   : > { %v3716_v41 = vadd.f32 %v732_v40, %v581_v35 }
  0xde   : > { %v477_v44 = vpop.f32.mrf.mxu0  ;;  %v947_v45 = vpop.f32.mrf.mxu3 }
  0xdf   : > { %v583_v47 = vadd.f32 %v582_v37, %v477_v44  ;;  %v3722_v50 = vadd.f32 %v947_v45, %v3637_v23  ;;  %v3768_v37 = vld [vmem:[%s3497_s6 + $0x40] sm:$0xff]  ;;  %v1376_v44 = vrot.slane %v3689_v31, 1  ;;  %v3775_v45 = vld [vmem:[%s3497_s6 + $0x18] sm:$0xff] }
  0xe0   : > { %v585_v52 = vpop.f32.mrf.mxu1  ;;  %v1866_v31 = vshll.u32 %v3775_v45, 16 }
  0xe1   : > { %v1377_v21 = vsel %vm629_vm1, %v1374_v8, %v1376_v44 }
  0xe3   : > { %v734_v56 = vpop.f32.mrf.mxu2  ;;  %3035 = vmatmul.msk.bf16.gmra.mxu1 %vm409_vm0, %v1373_v53 }
  0xe4   : > { %v3729_v57 = vadd.f32 %v734_v56, %v583_v47  ;;  %v1171_v47 = vshrl.u32 %v3743_v49, 16  ;;  %v1859_v56 = vshrl.u32 %v3413_v36, 16 }
  0xe6   : > { %v480_v23 = vpop.f32.mrf.mxu0  ;;  %v949_v59 = vpop.f32.mrf.mxu3 }
  0xe7   : > { %v586_v1 = vadd.f32 %v585_v52, %v480_v23  ;;  %v3737_v24 = vadd.f32 %v949_v59, %v3655_v39  ;;  %v1175_v52 = vshll.u32 %v3768_v37, 16  ;;  %v1173_v23 = vor.u32 %v1171_v47, %v1169_v25  ;;  %v3803_v25 = vld [vmem:[%s3497_s6 + $0x20] sm:$0xff] }
  0xe8   : > { %3107 = vmatmul.msk.bf16.gmra.mxu2 %vm409_vm0, %v3350_v58  ;;  %v587_v5 = vpop.f32.mrf.mxu1  ;;  %v1874_v38 = vshll.u32 %v3803_v25, 16 }
  0xe9   : > { %3014 = vmatmul.msk.bf16.gmra.mxu0 %vm409_vm0, %v1162_v62  ;;  %v1177_v59 = vrot.slane %v1175_v52, 1 }
  0xeb   : > { %v737_v6 = vpop.f32.mrf.mxu2  ;;  %2952 = vmatmul.msk.bf16.gmra.mxu3 %vm409_vm0, %v3330_v4  ;;  %v1178_v8 = vsel %vm296_vm2, %v1173_v23, %v1177_v59 }
  0xec   : > { %v3746_v7 = vadd.f32 %v737_v6, %v586_v1  ;;  %v3352_v1 = vld [vmem:[%s3497_s6 + $0x28] sm:$0xff] }
  0xee   : > { %v482_v10 = vpop.f32.mrf.mxu0  ;;  %v952_v39 = vpop.f32.mrf.mxu3 }
  0xef   : > { %v588_v17 = vadd.f32 %v587_v5, %v482_v10  ;;  %v3752_v18 = vadd.f32 %v952_v39, %v3668_v48 }
  0xf0   : > { %v590_v19 = vpop.f32.mrf.mxu1 }
  0xf3   : > { %v739_v27 = vpop.f32.mrf.mxu2  ;;  %3036 = vmatmul.msk.bf16.gmra.mxu1 %vm409_vm0, %v1375_v20 }
  0xf4   : > { %v3756_v13 = vadd.f32 %v739_v27, %v588_v17  ;;  %v3796_v17 = vld [vmem:[%s3497_s6 + $0x48] sm:$0xff] }
  0xf6   : > { %v485_v29 = vpop.f32.mrf.mxu0  ;;  %v954_v30 = vpop.f32.mrf.mxu3 }
  0xf7   : > { %v591_v48 = vadd.f32 %v590_v19, %v485_v29  ;;  %v3761_v33 = vadd.f32 %v954_v30, %v3677_v60  ;;  %v1861_v60 = vshll.u32 %v3413_v36, 16  ;;  %v1183_v29 = vshll.u32 %v3796_v17, 16 }
  0xf8   : > { %3108 = vmatmul.msk.bf16.gmra.mxu2 %vm409_vm0, %v3351_v28  ;;  %v592_v35 = vpop.f32.mrf.mxu1  ;;  %v1179_v28 = vshrl.u32 %v3768_v37, 16 }
  0xf9   : > { %3015 = vmatmul.msk.bf16.gmra.mxu0 %vm409_vm0, %v1170_v32  ;;  %v1863_v58 = vrot.slane %v1861_v60, 1 }
  0xfa   : > { %v1181_v36 = vor.u32 %v1179_v28, %v1177_v59 }
  0xfb   : > { %v742_v40 = vpop.f32.mrf.mxu2  ;;  %2953 = vmatmul.msk.bf16.gmra.mxu3 %vm409_vm0, %v3331_v34  ;;  %v1864_v4 = vor.u32 %v1863_v58, %v1859_v56  ;;  %v1379_v34 = vsel %vm629_vm1, %v1376_v44, %v1378_v12 }
  0xfc   : > { %v3771_v43 = vadd.f32 %v742_v40, %v591_v48  ;;  %v1185_v40 = vrot.slane %v1183_v29, 1  ;;  %v3354_v29 = vld [vmem:[%s3497_s6 + $0x38] sm:$0xff] }
  0xfe   : > { %v487_v11 = vpop.f32.mrf.mxu0  ;;  %v957_v46 = vpop.f32.mrf.mxu3  ;;  %v1186_v44 = vsel %vm296_vm2, %v1181_v36, %v1185_v40 }
  0xff   : > { %v593_v53 = vadd.f32 %v592_v35, %v487_v11  ;;  %v3780_v54 = vadd.f32 %v957_v46, %v3692_v9  ;;  %v1868_v9 = vrot.slane %v1866_v31, 1  ;;  %v1870_v35 = vshrl.u32 %v3775_v45, 16  ;;  %v3353_v46 = vld [vmem:[%s3497_s6 + $0x30] sm:$0xff] }
 0x100   : > { %v595_v55 = vpop.f32.mrf.mxu1  ;;  %v3825_v31 = vld [vmem:[%s3497_s6 + $0x50] sm:$0xff] }
 0x101   : > { %v1869_v15 = vsel %vm296_vm2, %v1864_v4, %v1868_v9  ;;  %v1872_v47 = vor.u32 %v1870_v35, %v1868_v9  ;;  %v1187_v9 = vshrl.u32 %v3796_v17, 16 }
 0x103   : > { %v744_v62 = vpop.f32.mrf.mxu2  ;;  %3037 = vmatmul.msk.bf16.gmra.mxu1 %vm409_vm0, %v1377_v21 }
 0x104   : > { %v3785_v63 = vadd.f32 %v744_v62, %v593_v53  ;;  %v1380_v62 = vrot.slane %v3743_v49, 1 }
 0x106   : > { %v490_v5 = vpop.f32.mrf.mxu0  ;;  %v959_v6 = vpop.f32.mrf.mxu3 }
 0x107   : > { %v596_v10 = vadd.f32 %v595_v55, %v490_v5  ;;  %v3790_v39 = vadd.f32 %v959_v6, %v3702_v61  ;;  %v1191_v5 = vshll.u32 %v3825_v31, 16 }
 0x108   : > { %3109 = vmatmul.msk.bf16.gmra.mxu2 %vm409_vm0, %v3352_v1  ;;  %v597_v14 = vpop.f32.mrf.mxu1  ;;  %v3832_v1 = vld [vmem:[%s3497_s6 + $0x28] sm:$0xff] }
 0x109   : > { %3016 = vmatmul.msk.bf16.gmra.mxu0 %vm409_vm0, %v1178_v8  ;;  %v1882_v49 = vshll.u32 %v3832_v1, 16 }
 0x10b   : > { %v747_v19 = vpop.f32.mrf.mxu2  ;;  %3174 = vmatmul.msk.bf16.vlgmr.msra.gmra.mxu3 %vm409_vm0, %v1869_v15  ;;  %v1878_v15 = vshrl.u32 %v3803_v25, 16 }
 0x10c   : > { %v3799_v20 = vadd.f32 %v747_v19, %v596_v10  ;;  %v1189_v19 = vor.u32 %v1187_v9, %v1185_v40 }
 0x10e   : > { %v492_v61 = vpop.f32.mrf.mxu0  ;;  %v962_v27 = vpop.f32.mrf.mxu3 }
 0x10f   : > { %v598_v30 = vadd.f32 %v597_v14, %v492_v61  ;;  %v3808_v32 = vadd.f32 %v962_v27, %v3716_v41  ;;  %v1876_v41 = vrot.slane %v1874_v38, 1  ;;  %v1381_v14 = vsel %vm629_vm1, %v1378_v12, %v1380_v62 }
 0x110   : > { %v600_v48 = vpop.f32.mrf.mxu1  ;;  %v1193_v61 = vrot.slane %v1191_v5, 1 }
 0x111   : > { %v1877_v58 = vsel %vm296_vm2, %v1872_v47, %v1876_v41 }
 0x112   : > { %v1194_v12 = vsel %vm296_vm2, %v1189_v19, %v1193_v61 }
 0x113   : > { %v749_v60 = vpop.f32.mrf.mxu2  ;;  %3038 = vmatmul.msk.bf16.gmra.mxu1 %vm409_vm0, %v1379_v34 }
 0x114   : > { %v3814_v11 = vadd.f32 %v749_v60, %v598_v30  ;;  %v1880_v30 = vor.u32 %v1878_v15, %v1876_v41 }
 0x116   : > { %v495_v52 = vpop.f32.mrf.mxu0  ;;  %v964_v53 = vpop.f32.mrf.mxu3 }
 0x117   : > { %v601_v55 = vadd.f32 %v600_v48, %v495_v52  ;;  %v3819_v21 = vadd.f32 %v964_v53, %v3729_v57  ;;  %v1884_v48 = vrot.slane %v1882_v49, 1 }
 0x118   : > { %3110 = vmatmul.msk.bf16.gmra.mxu2 %vm409_vm0, %v3353_v46  ;;  %v602_v56 = vpop.f32.mrf.mxu1  ;;  %v3858_v46 = vld [vmem:[%s3497_s6 + $0x58] sm:$0xff] }
 0x119   : > { %3017 = vmatmul.msk.bf16.gmra.mxu0 %vm409_vm0, %v1186_v44  ;;  %v1885_v40 = vsel %vm296_vm2, %v1880_v30, %v1884_v48  ;;  %v1195_v44 = vshrl.u32 %v3825_v31, 16  ;;  %v3895_v30 = vld [vmem:[%s3497_s6 + $0x60] sm:$0xff] }
 0x11b   : > { %v752_v23 = vpop.f32.mrf.mxu2  ;;  %3175 = vmatmul.msk.bf16.gmra.mxu3 %vm409_vm0, %v1877_v58  ;;  %v1197_v9 = vor.u32 %v1195_v44, %v1193_v61 }
 0x11c   : > { %v3828_v59 = vadd.f32 %v752_v23, %v601_v55  ;;  %v1199_v55 = vshll.u32 %v3858_v46, 16 }
 0x11e   : > { %v497_v57 = vpop.f32.mrf.mxu0  ;;  %v967_v4 = vpop.f32.mrf.mxu3  ;;  %v1201_v5 = vrot.slane %v1199_v55, 1 }
 0x11f   : > { %v603_v6 = vadd.f32 %v602_v56, %v497_v57  ;;  %v3837_v8 = vadd.f32 %v967_v4, %v3746_v7 }
 0x120   : > { %v605_v10 = vpop.f32.mrf.mxu1  ;;  %v1202_v49 = vsel %vm296_vm2, %v1197_v9, %v1201_v5 }
 0x121   : > { %v606_v60 = vadd.f32 %v605_v10, %v3615_v2  ;;  %v3355_v10 = vld [vmem:[%s3497_s6 + $0x40] sm:$0xff] }
 0x123   : > { %v754_v27 = vpop.f32.mrf.mxu2  ;;  %3039 = vmatmul.msk.bf16.gmra.mxu1 %vm409_vm0, %v1381_v14 }
 0x124   : > { %v3843_v28 = vadd.f32 %v754_v27, %v603_v6 }
 0x126   : > { %v969_v7 = vpop.f32.mrf.mxu3  ;;  %v1276_v34 = vpop.f32.mrf.mxu0 }
 0x127   : > { %v3848_v35 = vadd.f32 %v969_v7, %v3756_v13  ;;  %v3851_v38 = vadd.f32 %v1276_v34, %v3698_v22  ;;  %v1382_v13 = vrot.slane %v3768_v37, 1  ;;  %v3865_v22 = vld [vmem:[%s3497_s6 + $0x30] sm:$0xff]  ;;  %v1886_v37 = vshrl.u32 %v3832_v1, 16  ;;  %v3377_v34 = vld [vmem:[%s4521_s1 + $0x88] sm:$0xff] }
 0x128   : > { %3111 = vmatmul.msk.bf16.gmra.mxu2 %vm409_vm0, %v3354_v29  ;;  %v607_v36 = vpop.f32.mrf.mxu1  ;;  %v1890_v57 = vshll.u32 %v3865_v22, 16  ;;  %2187 = vmatpush.bf16.msra.mxu0 %v3377_v34 }
 0x129   : > { %3018 = vmatmul.msk.bf16.gmra.mxu0 %vm409_vm0, %v1194_v12  ;;  %v1383_v23 = vsel %vm629_vm1, %v1380_v62, %v1382_v13  ;;  %v608_v4 = vadd.f32 %v607_v36, %v3624_v16 }
 0x12a   : > { %v1892_v14 = vrot.slane %v1890_v57, 1  ;;  %v1050_v57 = vld [vmem:[%s3497_s6 + $0x68] sm:$0x1] }
 0x12b   : > { %v757_v47 = vpop.f32.mrf.mxu2  ;;  %3176 = vmatmul.msk.bf16.gmra.mxu3 %vm409_vm0, %v1885_v40  ;;  %v1207_v40 = vshll.u32 %v3895_v30, 16 }
 0x12c   : > { %v3861_v41 = vadd.f32 %v757_v47, %v606_v60 }
 0x12e   : > { %v972_v52 = vpop.f32.mrf.mxu3  ;;  %v1278_v53 = vpop.f32.mrf.mxu0 }
 0x12f   : > { %v3870_v2 = vadd.f32 %v972_v52, %v3771_v43  ;;  %v3873_v56 = vadd.f32 %v1278_v53, %v3707_v0  ;;  %v1888_v0 = vor.u32 %v1886_v37, %v1884_v48  ;;  %v1894_v53 = vshrl.u32 %v3865_v22, 16 }
 0x130   : > { %v610_v58 = vpop.f32.mrf.mxu1 }
 0x131   : > { %v1893_v27 = vsel %vm296_vm2, %v1888_v0, %v1892_v14  ;;  %v611_v29 = vadd.f32 %v610_v58, %v3639_v26  ;;  %v1203_v26 = vshrl.u32 %v3858_v46, 16 }
 0x133   : > { %v759_v6 = vpop.f32.mrf.mxu2  ;;  %3040 = vmatmul.msk.bf16.gmra.mxu1 %vm409_vm0, %v1383_v23  ;;  %v1205_v58 = vor.u32 %v1203_v26, %v1201_v5  ;;  %v1209_v23 = vrot.slane %v1207_v40, 1  ;;  %v1105_v5 = vunpack.c.l.b16 %v1050_v57 }
 0x134   : > { %v3880_v43 = vadd.f32 %v759_v6, %v608_v4  ;;  %v3356_v4 = vld [vmem:[%s3497_s6 + $0x48] sm:$0xff] }
 0x136   : > { %v974_v15 = vpop.f32.mrf.mxu3  ;;  %v1281_v62 = vpop.f32.mrf.mxu0 }
 0x137   : > { %v3885_v19 = vadd.f32 %v974_v15, %v3785_v63  ;;  %v3888_v16 = vadd.f32 %v1281_v62, %v3722_v50  ;;  %v1384_v63 = vrot.slane %v3796_v17, 1  ;;  %v3902_v50 = vld [vmem:[%s3497_s6 + $0x38] sm:$0xff] }
 0x138   : > { %3112 = vmatmul.msk.bf16.gmra.mxu2 %vm409_vm0, %v3355_v10  ;;  %v612_v61 = vpop.f32.mrf.mxu1  ;;  %v1898_v44 = vshll.u32 %v3902_v50, 16 }
 0x139   : > { %3019 = vmatmul.msk.bf16.gmra.mxu0 %vm409_vm0, %v1202_v49  ;;  %v1385_v52 = vsel %vm629_vm1, %v1382_v13, %v1384_v63  ;;  %v613_v55 = vadd.f32 %v612_v61, %v3658_v42  ;;  %v3376_v13 = vld [vmem:[%s4521_s1 + $0x80] sm:$0xff]  ;;  %v1210_v42 = vsel %vm296_vm2, %v1205_v58, %v1209_v23  ;;  %v3938_v61 = vpack.c.b16 %v1105_v5, %v1105_v5 }
 0x13a   : > { %v1900_v9 = vrot.slane %v1898_v44, 1  ;;  %2188 = vmatpush.bf16.msra.mxu0 %v3376_v13 }
 0x13b   : > { %v762_v48 = vpop.f32.mrf.mxu2  ;;  %3177 = vmatmul.msk.bf16.gmra.mxu3 %vm409_vm0, %v1893_v27 }
 0x13c   : > { %v3898_v7 = vadd.f32 %v762_v48, %v611_v29  ;;  %v3945_v29 = vld [vmem:[%s3497_s6 + $0x40] sm:$0xff] }
 0x13e   : > { %v977_v12 = vpop.f32.mrf.mxu3  ;;  %v1283_v36 = vpop.f32.mrf.mxu0 }
 0x13f   : > { %v3910_v60 = vadd.f32 %v977_v12, %v3799_v20  ;;  %v3913_v17 = vadd.f32 %v1283_v36, %v3737_v24  ;;  %v1896_v24 = vor.u32 %v1894_v53, %v1892_v14  ;;  %v1211_v12 = vshrl.u32 %v3895_v30, 16 }
 0x140   : > { %v615_v47 = vpop.f32.mrf.mxu1  ;;  %v1215_v36 = vshll.u32 %v3938_v61, 16 }
 0x141   : > { %v1901_v62 = vsel %vm296_vm2, %v1896_v24, %v1900_v9  ;;  %v616_v49 = vadd.f32 %v615_v47, %v3670_v51 }
 0x142   : > { %v1217_v58 = vrot.slane %v1215_v36, 1  ;;  %v1910_v36 = vshrl.u32 %v3945_v29, 16 }
 0x143   : > { %v764_v37 = vpop.f32.mrf.mxu2  ;;  %3041 = vmatmul.msk.bf16.gmra.mxu1 %vm409_vm0, %v1385_v52  ;;  %v1906_v52 = vshll.u32 %v3945_v29, 16 }
 0x144   : > { %v3921_v20 = vadd.f32 %v764_v37, %v613_v55  ;;  %v1213_v55 = vor.u32 %v1211_v12, %v1209_v23 }
 0x146   : > { %v979_v6 = vpop.f32.mrf.mxu3  ;;  %v1286_v10 = vpop.f32.mrf.mxu0  ;;  %v1218_v13 = vsel %vm296_vm2, %v1213_v55, %v1217_v58 }
 0x147   : > { %v3929_v0 = vadd.f32 %v979_v6, %v3814_v11  ;;  %v3932_v15 = vadd.f32 %v1286_v10, %v3752_v18  ;;  %v1386_v18 = vrot.slane %v3825_v31, 1  ;;  %v1902_v31 = vshrl.u32 %v3902_v50, 16  ;;  %v3414_v10 = vld [vmem:[%s3497_s6 + $0x10] sm:$0xf0] }
 0x148   : > { %3113 = vmatmul.msk.bf16.gmra.mxu2 %vm409_vm0, %v3356_v4  ;;  %v617_v14 = vpop.f32.mrf.mxu1 }
 0x149   : > { %3020 = vmatmul.msk.bf16.gmra.mxu0 %vm409_vm0, %v1210_v42  ;;  %v1387_v47 = vsel %vm629_vm1, %v1384_v63, %v1386_v18  ;;  %v618_v44 = vadd.f32 %v617_v14, %v3682_v3  ;;  %v1904_v57 = vor.u32 %v1902_v31, %v1900_v9  ;;  %v1908_v63 = vrot.slane %v1906_v52, 1  ;;  %v3415_v42 = vld [vmem:[%s3497_s6 + $0x10] sm:$0xe] }
 0x14a   : > { %v2109_v31 = vrot.slane %v3775_v45, 1 }
 0x14b   : > { %v767_v27 = vpop.f32.mrf.mxu2  ;;  %3178 = vmatmul.msk.bf16.gmra.mxu3 %vm409_vm0, %v1901_v62  ;;  %v1909_v6 = vsel %vm296_vm2, %v1904_v57, %v1908_v63 }
 0x14c   : > { %v3941_v11 = vadd.f32 %v767_v27, %v616_v49  ;;  %v3416_v49 = vor.u32 %v3415_v42, %v3414_v10 }
 0x14e   : > { %v982_v48 = vpop.f32.mrf.mxu3  ;;  %v1288_v34 = vpop.f32.mrf.mxu0 }
 0x14f   : > { %v3950_v51 = vadd.f32 %v982_v48, %v3828_v59  ;;  %v3953_v26 = vadd.f32 %v1288_v34, %v3761_v33  ;;  %v3357_v33 = vld [vmem:[%s3497_s6 + $0x50] sm:$0xff] }
 0x150   : > { %v1451_v40 = vpop.f32.mrf.mxu1 }
 0x151   : > { %v1511_v53 = vadd.f32 %v1451_v40, %v3851_v38 }
 0x153   : > { %v769_v37 = vpop.f32.mrf.mxu2  ;;  %3042 = vmatmul.msk.bf16.gmra.mxu1 %vm409_vm0, %v1387_v47  ;;  %v2108_v47 = vrot.slane %v3416_v49, 1 }
 0x154   : > { %v3961_v59 = vadd.f32 %v769_v37, %v618_v44 }
 0x156   : > { %v984_v4 = vpop.f32.mrf.mxu3  ;;  %v1291_v24 = vpop.f32.mrf.mxu0 }
 0x157   : > { %v3966_v38 = vadd.f32 %v984_v4, %v3843_v28  ;;  %v3969_v3 = vadd.f32 %v1291_v24, %v3780_v54  ;;  %v1388_v28 = vrot.slane %v3858_v46, 1  ;;  %v3983_v54 = vld [vmem:[%s3497_s6 + $0x48] sm:$0xff] }
 0x158   : > { %3114 = vmatmul.msk.bf16.gmra.mxu2 %vm409_vm0, %v3357_v33  ;;  %v3972_v23 = vpop.f32.mrf.mxu1  ;;  %v1914_v40 = vshll.u32 %v3983_v54, 16  ;;  %v1918_v10 = vshrl.u32 %v3983_v54, 16 }
 0x159   : > { %3021 = vmatmul.msk.bf16.gmra.mxu0 %vm409_vm0, %v1218_v13  ;;  %v1389_v12 = vsel %vm629_vm1, %v1386_v18, %v1388_v28  ;;  %v2110_v18 = vsel %vm629_vm1, %v2108_v47, %v2109_v31 }
 0x15b   : > { %v1681_v9 = vpop.f32.mrf.mxu2  ;;  %3179 = vmatmul.msk.bf16.gmra.mxu3 %vm409_vm0, %v1909_v6 }
 0x15c   : > { %v3979_v5 = vadd.f32 %v1681_v9, %v1511_v53  ;;  %v1916_v53 = vrot.slane %v1914_v40, 1 }
 0x15e   : > { %v987_v14 = vpop.f32.mrf.mxu3  ;;  %v1293_v62 = vpop.f32.mrf.mxu0  ;;  %v1920_v49 = vor.u32 %v1918_v10, %v1916_v53 }
 0x15f   : > { %v3986_v27 = vadd.f32 %v987_v14, %v3861_v41  ;;  %v3989_v48 = vadd.f32 %v1293_v62, %v3790_v39  ;;  %v3358_v41 = vld [vmem:[%s3497_s6 + $0x58] sm:$0xff]  ;;  %v1912_v39 = vor.u32 %v1910_v36, %v1908_v63  ;;  %v4017_v63 = vld [vmem:[%s3497_s6 + $0x50] sm:$0xff] }
 0x160   : > { %v1456_v34 = vpop.f32.mrf.mxu1  ;;  %v1922_v42 = vshll.u32 %v4017_v63, 16 }
 0x161   : > { %v1513_v46 = vadd.f32 %v1456_v34, %v3888_v16  ;;  %v1917_v37 = vsel %vm296_vm2, %v1912_v39, %v1916_v53 }
 0x163   : > { %v3996_v52 = vpop.f32.mrf.mxu2  ;;  %3043 = vmatmul.msk.bf16.gmra.mxu1 %vm409_vm0, %v1389_v12 }
 0x166   : > { %v989_v44 = vpop.f32.mrf.mxu3  ;;  %v1296_v55 = vpop.f32.mrf.mxu0 }
 0x167   : > { %v4002_v58 = vadd.f32 %v989_v44, %v3880_v43  ;;  %v4005_v16 = vadd.f32 %v1296_v55, %v3808_v32  ;;  %v1390_v43 = vrot.slane %v3895_v30, 1  ;;  %v2111_v30 = vrot.slane %v3803_v25, 1 }
 0x168   : > { %3115 = vmatmul.msk.bf16.gmra.mxu2 %vm409_vm0, %v3358_v41  ;;  %v4008_v45 = vpop.f32.mrf.mxu1 }
 0x169   : > { %3198 = vmatmul.msk.bf16.vlgmr.msra.gmra.mxu0 %vm409_vm0, %v2110_v18  ;;  %v1391_v9 = vsel %vm629_vm1, %v1388_v28, %v1390_v43  ;;  %v2112_v28 = vsel %vm629_vm1, %v2109_v31, %v2111_v30  ;;  %v4051_v31 = vld [vmem:[%s3497_s6 + $0x58] sm:$0xff]  ;;  %v1926_v18 = vshrl.u32 %v4017_v63, 16 }
 0x16b   : > { %v1686_v33 = vpop.f32.mrf.mxu2  ;;  %3180 = vmatmul.msk.bf16.gmra.mxu3 %vm409_vm0, %v1917_v37  ;;  %v1930_v37 = vshll.u32 %v4051_v31, 16 }
 0x16c   : > { %v4013_v57 = vadd.f32 %v1686_v33, %v1513_v46 }
 0x16e   : > { %v992_v32 = vpop.f32.mrf.mxu3  ;;  %v1298_v4 = vpop.f32.mrf.mxu0 }
 0x16f   : > { %v4020_v24 = vadd.f32 %v992_v32, %v3898_v7  ;;  %v4023_v13 = vadd.f32 %v1298_v4, %v3819_v21  ;;  %v3359_v7 = vld [vmem:[%s3497_s6 + $0x60] sm:$0xff]  ;;  %v1924_v21 = vrot.slane %v1922_v42, 1 }
 0x170   : > { %v1461_v6 = vpop.f32.mrf.mxu1 }
 0x171   : > { %v1515_v14 = vadd.f32 %v1461_v6, %v3932_v15  ;;  %v1925_v15 = vsel %vm296_vm2, %v1920_v49, %v1924_v21  ;;  %v1928_v4 = vor.u32 %v1926_v18, %v1924_v21 }
 0x173   : > { %v4030_v62 = vpop.f32.mrf.mxu2  ;;  %3044 = vmatmul.msk.bf16.gmra.mxu1 %vm409_vm0, %v1391_v9 }
 0x176   : > { %v994_v34 = vpop.f32.mrf.mxu3  ;;  %v1301_v12 = vpop.f32.mrf.mxu0 }
 0x177   : > { %v4036_v36 = vadd.f32 %v994_v34, %v3921_v20  ;;  %v4039_v40 = vadd.f32 %v1301_v12, %v3837_v8  ;;  %v1392_v20 = vrot.slane %v3938_v61, 1  ;;  %v2113_v61 = vrot.slane %v3832_v1, 1 }
 0x178   : > { %3116 = vmatmul.msk.bf16.gmra.mxu2 %vm409_vm0, %v3359_v7  ;;  %v4042_v25 = vpop.f32.mrf.mxu1  ;;  %v1934_v12 = vshrl.u32 %v4051_v31, 16 }
 0x179   : > { %3199 = vmatmul.msk.bf16.gmra.mxu0 %vm409_vm0, %v2112_v28  ;;  %v1393_v55 = vsel %vm629_vm1, %v1390_v43, %v1392_v20  ;;  %v2114_v43 = vsel %vm629_vm1, %v2111_v30, %v2113_v61  ;;  %v4084_v30 = vld [vmem:[%s3497_s6 + $0x60] sm:$0xff] }
 0x17a   : > { %v1938_v28 = vshll.u32 %v4084_v30, 16 }
 0x17b   : > { %v1691_v46 = vpop.f32.mrf.mxu2  ;;  %3181 = vmatmul.msk.bf16.gmra.mxu3 %vm409_vm0, %v1925_v15 }
 0x17c   : > { %v4047_v47 = vadd.f32 %v1691_v46, %v1515_v14  ;;  %v2115_v46 = vrot.slane %v3865_v22, 1 }
 0x17e   : > { %v997_v8 = vpop.f32.mrf.mxu3  ;;  %v1303_v41 = vpop.f32.mrf.mxu0 }
 0x17f   : > { %v4054_v39 = vadd.f32 %v997_v8, %v3941_v11  ;;  %v4057_v53 = vadd.f32 %v1303_v41, %v3848_v35  ;;  %v3360_v11 = vld [vmem:[%s3497_s6 + $0x68] sm:$0xff]  ;;  %v1932_v35 = vrot.slane %v1930_v37, 1  ;;  %v1940_v41 = vrot.slane %v1938_v28, 1 }
 0x180   : > { %v1466_v44 = vpop.f32.mrf.mxu1 }
 0x181   : > { %v1517_v33 = vadd.f32 %v1466_v44, %v3969_v3  ;;  %v1933_v3 = vsel %vm296_vm2, %v1928_v4, %v1932_v35  ;;  %v1936_v8 = vor.u32 %v1934_v12, %v1932_v35 }
 0x183   : > { %v4064_v32 = vpop.f32.mrf.mxu2  ;;  %3045 = vmatmul.msk.bf16.gmra.mxu1 %vm409_vm0, %v1393_v55  ;;  %v1941_v37 = vsel %vm296_vm2, %v1936_v8, %v1940_v41 }
 0x186   : > { %v999_v6 = vpop.f32.mrf.mxu3  ;;  %v1306_v9 = vpop.f32.mrf.mxu0 }
 0x187   : > { %v4070_v10 = vadd.f32 %v999_v6, %v3961_v59  ;;  %v4073_v42 = vadd.f32 %v1306_v9, %v3870_v2  ;;  %v1942_v6 = vshrl.u32 %v4084_v30, 16 }
 0x188   : > { %3117 = vmatmul.msk.bf16.gmra.mxu2 %vm409_vm0, %v3360_v11  ;;  %v4076_v1 = vpop.f32.mrf.mxu1 }
 0x189   : > { %3200 = vmatmul.msk.bf16.gmra.mxu0 %vm409_vm0, %v2114_v43  ;;  %v2117_v43 = vrot.slane %v3902_v50, 1 }
 0x18b   : > { %v1696_v14 = vpop.f32.mrf.mxu2  ;;  %3182 = vmatmul.msk.bf16.gmra.mxu3 %vm409_vm0, %v1933_v3 }
 0x18c   : > { %v4081_v7 = vadd.f32 %v1696_v14, %v1517_v33  ;;  %v4110_v33 = vld [vmem:[%s3497_s6 + $0x68] sm:$0xff]  ;;  %v1944_v14 = vor.u32 %v1942_v6, %v1940_v41 }
 0x18d   : > { %v1946_v9 = vshll.u32 %v4110_v33, 16 }
 0x18e   : > { %v1308_v59 = vpop.f32.mrf.mxu0  ;;  %v2015_v49 = vpop.f32.mrf.mxu3 }
 0x18f   : > { %v4087_v2 = vadd.f32 %v1308_v59, %v3885_v19  ;;  %v4090_v21 = vadd.f32 %v2015_v49, %v3979_v5  ;;  %v2116_v5 = vsel %vm629_vm1, %v2113_v61, %v2115_v46  ;;  %v1948_v59 = vrot.slane %v1946_v9, 1  ;;  %v1789_v49 = vld [vmem:[%s3497_s6 + $0x70] sm:$0x1] }
 0x190   : > { %v1471_v34 = vpop.f32.mrf.mxu1  ;;  %v1844_v8 = vunpack.c.l.b16 %v1789_v49 }
 0x191   : > { %v1519_v15 = vadd.f32 %v1471_v34, %v4005_v16 }
 0x192   : > { %v4137_v41 = vpack.c.b16 %v1844_v8, %v1844_v8 }
 0x193   : > { %v4096_v20 = vpop.f32.mrf.mxu2 }
 0x196   : > { %v1311_v44 = vpop.f32.mrf.mxu0  ;;  %v4098_v19 = vpop.f32.mrf.mxu3 }
 0x197   : > { %v4102_v55 = vadd.f32 %v1311_v44, %v3910_v60 }
 0x198   : > { %v4104_v18 = vpop.f32.mrf.mxu1 }
 0x199   : > { %3201 = vmatmul.msk.bf16.gmra.mxu0 %vm409_vm0, %v2116_v5 }
 0x19b   : > { %v1701_v22 = vpop.f32.mrf.mxu2  ;;  %3183 = vmatmul.msk.bf16.gmra.mxu3 %vm409_vm0, %v1941_v37 }
 0x19c   : > { %v1749_v16 = vadd.f32 %v1701_v22, %v1519_v15  ;;  %v1949_v15 = vsel %vm296_vm2, %v1944_v14, %v1948_v59  ;;  %v1950_v22 = vshrl.u32 %v4110_v33, 16 }
 0x19e   : > { %v1313_v11 = vpop.f32.mrf.mxu0  ;;  %v2020_v4 = vpop.f32.mrf.mxu3  ;;  %v1952_v9 = vor.u32 %v1950_v22, %v1948_v59 }
 0x19f   : > { %v4113_v61 = vadd.f32 %v1313_v11, %v3929_v0  ;;  %v4116_v60 = vadd.f32 %v2020_v4, %v4013_v57  ;;  %v2118_v0 = vsel %vm629_vm1, %v2115_v46, %v2117_v43  ;;  %v1954_v11 = vshll.u32 %v4137_v41, 16 }
 0x1a0   : > { %v4118_v35 = vpop.f32.mrf.mxu1  ;;  %v2119_v4 = vrot.slane %v3945_v29, 1 }
 0x1a1   : > { %v1956_v14 = vrot.slane %v1954_v11, 1 }
 0x1a3   : > { %v4123_v3 = vpop.f32.mrf.mxu2 }
 0x1a6   : > { %v1316_v34 = vpop.f32.mrf.mxu0  ;;  %v4126_v12 = vpop.f32.mrf.mxu3 }
 0x1a7   : > { %v1352_v57 = vadd.f32 %v1316_v34, %v3950_v51 }
 0x1a8   : > { %v4130_v28 = vpop.f32.mrf.mxu1 }
 0x1a9   : > { %3202 = vmatmul.msk.bf16.gmra.mxu0 %vm409_vm0, %v2118_v0 }
 0x1ab   : > { %v4134_v50 = vpop.f32.mrf.mxu2  ;;  %3184 = vmatmul.msk.bf16.gmra.mxu3 %vm409_vm0, %v1949_v15  ;;  %v1957_v15 = vsel %vm296_vm2, %v1952_v9, %v1956_v14 }
 0x1ae   : > { %v1318_v44 = vpop.f32.mrf.mxu0  ;;  %v2025_v5 = vpop.f32.mrf.mxu3 }
 0x1af   : > { %v4140_v37 = vadd.f32 %v1318_v44, %v3966_v38  ;;  %v4143_v51 = vadd.f32 %v2025_v5, %v4047_v47  ;;  %v2120_v38 = vsel %vm629_vm1, %v2117_v43, %v2119_v4  ;;  %v2121_v5 = vrot.slane %v3983_v54, 1 }
 0x1b0   : > { %v4145_v46 = vpop.f32.mrf.mxu1 }
 0x1b1   : > { %v2122_v14 = vsel %vm629_vm1, %v2119_v4, %v2121_v5  ;;  %v2123_v4 = vrot.slane %v4017_v63, 1  ;;  %v2125_v63 = vrot.slane %v4051_v31, 1 }
 0x1b3   : > { %v4150_v6 = vpop.f32.mrf.mxu2 }
 0x1b6   : > { %v1321_v49 = vpop.f32.mrf.mxu0  ;;  %v4152_v34 = vpop.f32.mrf.mxu3 }
 0x1b7   : > { %v4156_v47 = vadd.f32 %v1321_v49, %v3986_v27 }
 0x1b8   : > { %v4158_v0 = vpop.f32.mrf.mxu1 }
 0x1b9   : > { %4525 = vst [vmem:[#allocation2_spill] sm:$0xff] %v4156_v47  ;;  %3203 = vmatmul.msk.bf16.gmra.mxu0 %vm409_vm0, %v2120_v38 }
 0x1bb   : > { %v4162_v8 = vpop.f32.mrf.mxu2  ;;  %3185 = vmatmul.msk.bf16.gmra.mxu3 %vm409_vm0, %v1957_v15 }
 0x1be   : > { %v1323_v29 = vpop.f32.mrf.mxu0  ;;  %v2030_v59 = vpop.f32.mrf.mxu3 }
 0x1bf   : > { %v4166_v44 = vadd.f32 %v1323_v29, %v4002_v58  ;;  %v4169_v43 = vadd.f32 %v2030_v59, %v4081_v7 }
 0x1c0   : > { %v4171_v27 = vpop.f32.mrf.mxu1 }
 0x1c1   : > { %4526 = vst [vmem:[#allocation3_spill] sm:$0xff] %v4166_v44 }
 0x1c3   : > { %v4174_v22 = vpop.f32.mrf.mxu2 }
 0x1c6   : > { %v1326_v11 = vpop.f32.mrf.mxu0  ;;  %v4176_v9 = vpop.f32.mrf.mxu3 }
 0x1c7   : > { %v4180_v49 = vadd.f32 %v1326_v11, %v4020_v24 }
 0x1c8   : > { %v4182_v38 = vpop.f32.mrf.mxu1 }
 0x1c9   : > { %4527 = vst [vmem:[#allocation4_spill] sm:$0xff] %v4180_v49  ;;  %3204 = vmatmul.msk.bf16.gmra.mxu0 %vm409_vm0, %v2122_v14  ;;  %v2124_v14 = vsel %vm629_vm1, %v2121_v5, %v2123_v4  ;;  %v2126_v5 = vsel %vm629_vm1, %v2123_v4, %v2125_v63 }
 0x1cb   : > { %v4185_v58 = vpop.f32.mrf.mxu2 }
 0x1ce   : > { %v1328_v7 = vpop.f32.mrf.mxu0  ;;  %v2035_v15 = vpop.f32.mrf.mxu3 }
 0x1cf   : > { %v4188_v54 = vadd.f32 %v1328_v7, %v4036_v36  ;;  %v4190_v29 = vadd.f32 %v2035_v15, %v1749_v16 }
 0x1d0   : > { %v1491_v59 = vpop.f32.mrf.mxu1 }
 0x1d1   : > { %4528 = vst [vmem:[#allocation5_spill] sm:$0xff] %v4188_v54  ;;  %v1527_v44 = vadd.f32 %v1491_v59, %v1352_v57 }
 0x1d3   : > { %v4193_v47 = vpop.f32.mrf.mxu2 }
 0x1d6   : > { %v1331_v24 = vpop.f32.mrf.mxu0  ;;  %v4195_v11 = vpop.f32.mrf.mxu3 }
 0x1d7   : > { %v4199_v49 = vadd.f32 %v1331_v24, %v4054_v39  ;;  %v1512_v24 = vadd.f32 %v3972_v23, %v3873_v56  ;;  %v2127_v56 = vrot.slane %v4084_v30, 1 }
 0x1d9   : > { %3205 = vmatmul.msk.bf16.gmra.mxu0 %vm409_vm0, %v2124_v14 }
 0x1db   : > { %v1721_v36 = vpop.f32.mrf.mxu2 }
 0x1dc   : > { %v1757_v7 = vadd.f32 %v1721_v36, %v1527_v44  ;;  %v1742_v44 = vadd.f32 %v3996_v52, %v1512_v24 }
 0x1de   : > { %v1333_v16 = vpop.f32.mrf.mxu0  ;;  %v4202_v15 = vpop.f32.mrf.mxu3  ;;  %v2076_v31 = vadd.f32 %v4098_v19, %v1742_v44  ;;  %v1514_v44 = vadd.f32 %v4008_v45, %v3913_v17 }
 0x1df   : > { %v4205_v57 = vadd.f32 %v1333_v16, %v4070_v10  ;;  %v4219_v10 = vld [vmem:[%s4522_s2] ss:$0 sm:$0xff] }
 0x1e1   : > { %4529 = vst [vmem:[#allocation6_spill] sm:$0xff] %v4205_v57  ;;  %v2128_v57 = vsel %vm629_vm1, %v2125_v63, %v2127_v56  ;;  %v2129_v63 = vrot.slane %v4110_v33, 1 }
 0x1e6   : > { %v4208_v59 = vpop.f32.mrf.mxu3  ;;  %v2190_v54 = vpop.f32.mrf.mxu0 }
 0x1e7   : > { %v2250_v39 = vadd.f32 %v2190_v54, %v4090_v21 }
 0x1e9   : > { %3206 = vmatmul.msk.bf16.gmra.mxu0 %vm409_vm0, %v2126_v5  ;;  %v2278_v4 = vadd.f32 %v4219_v10, %v2250_v39  ;;  %v1744_v39 = vadd.f32 %v4030_v62, %v1514_v44  ;;  %v2130_v62 = vsel %vm629_vm1, %v2127_v56, %v2129_v63 }
 0x1eb   : > { %v2302_v23 = vmax.f32 %v2278_v4, 0.0  ;;  %v2078_v30 = vadd.f32 %v4126_v12, %v1744_v39 }
 0x1ee   : > { %v4222_v14 = vpop.f32.mrf.mxu3  ;;  %v2192_v36 = vpop.f32.mrf.mxu0 }
 0x1ef   : > { %v2251_v21 = vadd.f32 %v2192_v36, %v2076_v31 }
 0x1f1   : > { %v2279_v54 = vadd.f32 %v4219_v10, %v2251_v21 }
 0x1f3   : > { %v2303_v16 = vmax.f32 %v2279_v54, 0.0 }
 0x1f5   : > { %v4227_v52 = vpack.c.bf16 %v2303_v16, %v2302_v23 }
 0x1f6   : > { %v4229_v5 = vpop.f32.mrf.mxu3  ;;  %v2195_v24 = vpop.f32.mrf.mxu0 }
 0x1f7   : > { %v2252_v19 = vadd.f32 %v2195_v24, %v4116_v60 }
 0x1f9   : > { %3207 = vmatmul.msk.bf16.gmra.mxu0 %vm409_vm0, %v2128_v57  ;;  %v2280_v4 = vadd.f32 %v4219_v10, %v2252_v19  ;;  %v1516_v57 = vadd.f32 %v4042_v25, %v3953_v26 }
 0x1fb   : > { %v2304_v60 = vmax.f32 %v2280_v4, 0.0  ;;  %v1746_v24 = vadd.f32 %v4064_v32, %v1516_v57 }
 0x1fd   : > { %v2080_v33 = vadd.f32 %v4152_v34, %v1746_v24 }
 0x1fe   : > { %v4238_v31 = vpop.f32.mrf.mxu3  ;;  %v2197_v36 = vpop.f32.mrf.mxu0 }
 0x1ff   : > { %v2253_v21 = vadd.f32 %v2197_v36, %v2078_v30 }
 0x201   : > { %v2281_v54 = vadd.f32 %v4219_v10, %v2253_v21 }
 0x203   : > { %v2305_v23 = vmax.f32 %v2281_v54, 0.0  ;;  %v1518_v54 = vadd.f32 %v4076_v1, %v3989_v48  ;;  %v1520_v48 = vadd.f32 %v4104_v18, %v4023_v13  ;;  %v1522_v18 = vadd.f32 %v4130_v28, %v4057_v53 }
 0x205   : > { %v4243_v16 = vpack.c.bf16 %v2305_v23, %v2304_v60  ;;  %v1750_v1 = vadd.f32 %v4123_v3, %v1520_v48  ;;  %v1723_v48 = vpop.f32.mrf.mxu2 }
 0x206   : > { %v4245_v17 = vpop.f32.mrf.mxu3  ;;  %v2200_v45 = vpop.f32.mrf.mxu0 }
 0x207   : > { %v2254_v12 = vadd.f32 %v2200_v45, %v4143_v51  ;;  %v2131_v51 = vrot.slane %v4137_v41, 1 }
 0x209   : > { %3208 = vmatmul.msk.bf16.gmra.mxu0 %vm409_vm0, %v2130_v62  ;;  %v2282_v39 = vadd.f32 %v4219_v10, %v2254_v12  ;;  %v2132_v32 = vsel %vm629_vm1, %v2129_v63, %v2131_v51 }
 0x20b   : > { %v2306_v4 = vmax.f32 %v2282_v39, 0.0 }
 0x20e   : > { %v2055_v19 = vpop.f32.mrf.mxu3  ;;  %v2202_v44 = vpop.f32.mrf.mxu0 }
 0x20f   : > { %v4255_v30 = vadd.f32 %v2055_v19, %v1757_v7  ;;  %v2255_v36 = vadd.f32 %v2202_v44, %v2080_v33  ;;  %v1748_v7 = vadd.f32 %v4096_v20, %v1518_v54  ;;  %v2084_v20 = vadd.f32 %v4195_v11, %v1750_v1 }
 0x210   : > { %v1752_v11 = vadd.f32 %v4150_v6, %v1522_v18  ;;  %v1524_v6 = vadd.f32 %v4158_v0, %v4087_v2 }
 0x211   : > { %v2283_v56 = vadd.f32 %v4219_v10, %v2255_v36  ;;  %v2082_v60 = vadd.f32 %v4176_v9, %v1748_v7 }
 0x213   : > { %v2307_v21 = vmax.f32 %v2283_v56, 0.0  ;;  %v1521_v56 = vadd.f32 %v4118_v35, %v4039_v40 }
 0x215   : > { %v4259_v26 = vpack.c.bf16 %v2307_v21, %v2306_v4  ;;  %v1751_v13 = vadd.f32 %v4134_v50, %v1521_v56  ;;  %v2086_v21 = vadd.f32 %v4208_v59, %v1752_v11  ;;  %v1523_v50 = vadd.f32 %v4145_v46, %v4073_v42 }
 0x216   : > { %v2205_v25 = vpop.f32.mrf.mxu0  ;;  %v1754_v59 = vadd.f32 %v4174_v22, %v1524_v6  ;;  %v1526_v22 = vadd.f32 %v4182_v38, %v4113_v61  ;;  %v1726_v38 = vpop.f32.mrf.mxu2 }
 0x217   : > { %v2256_v34 = vadd.f32 %v2205_v25, %v4169_v43  ;;  %v2085_v3 = vadd.f32 %v4202_v15, %v1751_v13  ;;  %v1753_v28 = vadd.f32 %v4162_v8, %v1523_v50  ;;  %v1525_v8 = vadd.f32 %v4171_v27, %v4102_v55  ;;  %v4531_v50 = vld [vmem:[#allocation3_spill] sm:$0xff] }
 0x219   : > { %3209 = vmatmul.msk.bf16.gmra.mxu0 %vm409_vm0, %v2132_v32  ;;  %v2284_v41 = vadd.f32 %v4219_v10, %v2256_v34  ;;  %v2087_v15 = vadd.f32 %v4222_v14, %v1753_v28  ;;  %v1755_v0 = vadd.f32 %v4185_v58, %v1525_v8 }
 0x21b   : > { %v2308_v12 = vmax.f32 %v2284_v41, 0.0  ;;  %v2089_v14 = vadd.f32 %v4238_v31, %v1755_v0 }
 0x21e   : > { %v2207_v23 = vpop.f32.mrf.mxu0 }
 0x21f   : > { %v2257_v45 = vadd.f32 %v2207_v23, %v2082_v60  ;;  %v2088_v23 = vadd.f32 %v4229_v5, %v1754_v59  ;;  %v1493_v5 = vpop.f32.mrf.mxu1 }
 0x221   : > { %v2285_v62 = vadd.f32 %v4219_v10, %v2257_v45 }
 0x223   : > { %v2309_v57 = vmax.f32 %v2285_v62, 0.0 }
 0x225   : > { %v4270_v63 = vpack.c.bf16 %v2309_v57, %v2308_v12 }
 0x226   : > { %v2210_v43 = vpop.f32.mrf.mxu0 }
 0x227   : > { %v2258_v24 = vadd.f32 %v2210_v43, %v4190_v29  ;;  %v1756_v43 = vadd.f32 %v4193_v47, %v1526_v22 }
 0x229   : > { %v2286_v33 = vadd.f32 %v4219_v10, %v2258_v24  ;;  %v2090_v1 = vadd.f32 %v4245_v17, %v1756_v43 }
 0x22b   : > { %v2310_v39 = vmax.f32 %v2286_v33, 0.0 }
 0x22e   : > { %v2212_v9 = vpop.f32.mrf.mxu0 }
 0x22f   : > { %v2259_v19 = vadd.f32 %v2212_v9, %v2084_v20  ;;  %v2057_v20 = vpop.f32.mrf.mxu3 }
 0x231   : > { %v2287_v44 = vadd.f32 %v4219_v10, %v2259_v19 }
 0x233   : > { %v2311_v36 = vmax.f32 %v2287_v44, 0.0  ;;  %v1496_v44 = vpop.f32.mrf.mxu1 }
 0x235   : > { %v4281_v51 = vpack.c.bf16 %v2311_v36, %v2310_v39  ;;  %v1528_v39 = vadd.f32 %v1493_v5, %v4140_v37  ;;  %v4532_v5 = vld [vmem:[#allocation4_spill] sm:$0xff] }
 0x236   : > { %v2215_v29 = vpop.f32.mrf.mxu0 }
 0x237   : > { %v2260_v4 = vadd.f32 %v2215_v29, %v2085_v3  ;;  %v2060_v17 = vpop.f32.mrf.mxu3  ;;  %v1758_v36 = vadd.f32 %v1723_v48, %v1528_v39  ;;  %v3220_v39 = vld [vmem:[%s4523_s3 + $0x10] sm:$0xf] }
 0x239   : > { %v2288_v32 = vadd.f32 %v4219_v10, %v2260_v4  ;;  %v2092_v56 = vadd.f32 %v2057_v20, %v1758_v36  ;;  %v3381_v36 = vld [vmem:[%s4523_s3 + $0x14] sm:$0xf0] }
 0x23b   : > { %v2312_v35 = vmax.f32 %v2288_v32, 0.0  ;;  %v1498_v29 = vpop.f32.mrf.mxu1 }
 0x23e   : > { %v2217_v25 = vpop.f32.mrf.mxu0 }
 0x23f   : > { %v2261_v34 = vadd.f32 %v2217_v25, %v2086_v21  ;;  %v2062_v4 = vpop.f32.mrf.mxu3  ;;  %v4530_v25 = vld [vmem:[#allocation2_spill] sm:$0xff] }
 0x240   : > { %v1529_v32 = vadd.f32 %v1496_v44, %v4530_v25 }
 0x241   : > { %v2289_v40 = vadd.f32 %v4219_v10, %v2261_v34 }
 0x243   : > { %v2313_v54 = vmax.f32 %v2289_v40, 0.0 }
 0x245   : > { %v4293_v7 = vpack.c.bf16 %v2313_v54, %v2312_v35  ;;  %v1759_v35 = vadd.f32 %v1726_v38, %v1529_v32  ;;  %v1501_v54 = vpop.f32.mrf.mxu1 }
 0x246   : > { %v2220_v53 = vpop.f32.mrf.mxu0  ;;  %v1531_v43 = vadd.f32 %v1501_v54, %v4532_v5  ;;  %v4534_v54 = vld [vmem:[#allocation6_spill] sm:$0xff]  ;;  %v3382_v5 = vld [vmem:[%s4523_s3 + $0x2c] sm:$0xf] }
 0x247   : > { %v2262_v60 = vadd.f32 %v2220_v53, %v2087_v15  ;;  %v1530_v53 = vadd.f32 %v1498_v29, %v4531_v50  ;;  %v2093_v28 = vadd.f32 %v2060_v17, %v1759_v35 }
 0x249   : > { %v2290_v45 = vadd.f32 %v4219_v10, %v2262_v60  ;;  %v2065_v60 = vpop.f32.mrf.mxu3 }
 0x24b   : > { %v2314_v46 = vmax.f32 %v2290_v45, 0.0 }
 0x24d   : > { %v1503_v8 = vpop.f32.mrf.mxu1 }
 0x24e   : > { %v2222_v41 = vpop.f32.mrf.mxu0 }
 0x24f   : > { %v2263_v62 = vadd.f32 %v2222_v41, %v2088_v23 }
 0x251   : > { %v2291_v42 = vadd.f32 %v4219_v10, %v2263_v62  ;;  %v2067_v48 = vpop.f32.mrf.mxu3 }
 0x253   : > { %v2315_v12 = vmax.f32 %v2291_v42, 0.0  ;;  %v3212_v42 = vld [vmem:[%s4523_s3] sm:$0xf] }
 0x255   : > { %v4305_v57 = vpack.c.bf16 %v2315_v12, %v2314_v46  ;;  %v3379_v46 = vld [vmem:[%s4523_s3 + $0x4] sm:$0xf0] }
 0x256   : > { %v2225_v2 = vpop.f32.mrf.mxu0 }
 0x257   : > { %v2264_v24 = vadd.f32 %v2225_v2, %v2089_v14  ;;  %v3213_v2 = vor.u32 %v3379_v46, %v3212_v42 }
 0x259   : > { %v2292_v55 = vadd.f32 %v4219_v10, %v2264_v24 }
 0x25b   : > { %v2316_v58 = vmax.f32 %v2292_v55, 0.0 }
 0x25e   : > { %v2227_v9 = vpop.f32.mrf.mxu0 }
 0x25f   : > { %v2265_v27 = vadd.f32 %v2227_v9, %v2090_v1  ;;  %v4533_v9 = vld [vmem:[#allocation5_spill] sm:$0xff] }
 0x260   : > { %v1532_v55 = vadd.f32 %v1503_v8, %v4533_v9  ;;  %v3244_v8 = vld [vmem:[%s4523_s3 + $0x38] sm:$0xf] }
 0x261   : > { %v2293_v33 = vadd.f32 %v4219_v10, %v2265_v27 }
 0x263   : > { %v2317_v19 = vmax.f32 %v2293_v33, 0.0 }
 0x265   : > { %v4315_v61 = vpack.c.bf16 %v2317_v19, %v2316_v58  ;;  %v1506_v19 = vpop.f32.mrf.mxu1 }
 0x266   : > { %v2230_v31 = vpop.f32.mrf.mxu0 }
 0x267   : > { %v2266_v47 = vadd.f32 %v2230_v31, %v4255_v30  ;;  %2377 = vmatpush.bf16.msra.mxu1 %v4315_v61  ;;  %2462 = vmatpush.bf16.msrb.mxu3 %v4315_v61  ;;  %v1728_v30 = vpop.f32.mrf.mxu2 }
 0x268   : > { %v1760_v15 = vadd.f32 %v1728_v30, %v1530_v53  ;;  %v3236_v30 = vld [vmem:[%s4523_s3 + $0x28] sm:$0xf] }
 0x269   : > { %v2294_v18 = vadd.f32 %v4219_v10, %v2266_v47 }
 0x26a   : > { %v2094_v23 = vadd.f32 %v2062_v4, %v1760_v15 }
 0x26b   : > { %2378 = vmatpush.bf16.msra.mxu1 %v4305_v57  ;;  %2463 = vmatpush.bf16.msrb.mxu3 %v4305_v57  ;;  %v2318_v37 = vmax.f32 %v2294_v18, 0.0 }
 0x26e   : > { %v2232_v13 = vpop.f32.mrf.mxu0 }
 0x26f   : > { %v2267_v3 = vadd.f32 %v2232_v13, %v2092_v56  ;;  %2379 = vmatpush.bf16.msra.mxu1 %v4293_v7  ;;  %2464 = vmatpush.bf16.msrb.mxu3 %v4293_v7  ;;  %v1731_v6 = vpop.f32.mrf.mxu2  ;;  %v2070_v56 = vpop.f32.mrf.mxu3  ;;  %v3221_v13 = vor.u32 %v3381_v36, %v3220_v39  ;;  %v3260_v39 = vld [vmem:[%s4523_s3 + $0x50] sm:$0xf]  ;;  %v3387_v36 = vld [vmem:[%s4523_s3 + $0x54] sm:$0xf0] }
 0x270   : > { %v1761_v20 = vadd.f32 %v1731_v6, %v1531_v43  ;;  %v3238_v43 = vld [vmem:[%s4523_s3 + $0x30] sm:$0xf0] }
 0x271   : > { %v2295_v11 = vadd.f32 %v4219_v10, %v2267_v3 }
 0x272   : > { %v2095_v27 = vadd.f32 %v2065_v60, %v1761_v20  ;;  %v3233_v20 = vld [vmem:[%s4523_s3 + $0x48] sm:$0x33] }
 0x273   : > { %v2319_v21 = vmax.f32 %v2295_v11, 0.0  ;;  %2380 = vmatpush.bf16.msra.mxu1 %v4281_v51  ;;  %2465 = vmatpush.bf16.msrb.mxu3 %v4281_v51  ;;  %v1533_v11 = vadd.f32 %v1506_v19, %v4199_v49  ;;  %v4374_v49 = vld [vmem:[%s4523_s3 + $0x20] sm:$0x33]  ;;  %v2442_v9 = vunpack.c.l.b16 %v3233_v20  ;;  %v3386_v19 = vld [vmem:[%s4523_s3 + $0x54] sm:$0xf] }
 0x275   : > { %v4330_v34 = vpack.c.bf16 %v2319_v21, %v2318_v37  ;;  %v3383_v37 = vld [vmem:[%s4523_s3 + $0x2c] sm:$0xf0]  ;;  %v1508_v21 = vpop.f32.mrf.mxu1 }
 0x276   : > { %v2235_v40 = vpop.f32.mrf.mxu0  ;;  %v3237_v32 = vor.u32 %v3383_v37, %v3236_v30  ;;  %v1534_v50 = vadd.f32 %v1508_v21, %v4534_v54  ;;  %v3391_v30 = vld [vmem:[%s4523_s3 + $0x7c] sm:$0xf0]  ;;  %v3292_v21 = vld [vmem:[%s4523_s3 + $0x88] sm:$0xf]  ;;  %v3390_v54 = vld [vmem:[%s4523_s3 + $0x7c] sm:$0xf] }
 0x277   : > { %2381 = vmatpush.bf16.msra.mxu1 %v4270_v63  ;;  %2466 = vmatpush.bf16.msrb.mxu3 %v4270_v63  ;;  %v2268_v59 = vadd.f32 %v2235_v40, %v2093_v28  ;;  %v1733_v14 = vpop.f32.mrf.mxu2  ;;  %v2072_v28 = vpop.f32.mrf.mxu3 }
 0x278   : > { %v1762_v33 = vadd.f32 %v1733_v14, %v1532_v55  ;;  %v3214_v14 = vld [vmem:[%s4523_s3 + $0x8] sm:$0xf0]  ;;  %v2448_v55 = vpack.c.b16 %v2442_v9, %v2442_v9 }
 0x279   : > { %v2296_v45 = vadd.f32 %v4219_v10, %v2268_v59 }
 0x27a   : > { %v2096_v44 = vadd.f32 %v2067_v48, %v1762_v33  ;;  %v3384_v33 = vld [vmem:[%s4523_s3 + $0x3c] sm:$0xf] }
 0x27b   : > { %2382 = vmatpush.bf16.msra.mxu1 %v4259_v26  ;;  %2467 = vmatpush.bf16.msrb.mxu3 %v4259_v26  ;;  %v2320_v0 = vmax.f32 %v2296_v45, 0.0 }
 0x27e   : > { %v2237_v41 = vpop.f32.mrf.mxu0 }
 0x27f   : > { %v2269_v62 = vadd.f32 %v2237_v41, %v2094_v23  ;;  %2383 = vmatpush.bf16.msra.mxu1 %v4243_v16  ;;  %2468 = vmatpush.bf16.msrb.mxu3 %v4243_v16  ;;  %v1736_v38 = vpop.f32.mrf.mxu2  ;;  %v2356_v23 = vunpack.c.l.b16 %v4374_v49 }
 0x280   : > { %v1763_v40 = vadd.f32 %v1736_v38, %v1533_v11 }
 0x281   : > { %v2297_v12 = vadd.f32 %v4219_v10, %v2269_v62  ;;  %v2362_v42 = vpack.c.b16 %v2356_v23, %v2356_v23  ;;  %v3392_v23 = vld [vmem:[%s4523_s3 + $0x8c] sm:$0xf] }
 0x282   : > { %v2097_v53 = vadd.f32 %v2070_v56, %v1763_v40 }
 0x283   : > { %v2321_v22 = vmax.f32 %v2297_v12, 0.0  ;;  %2384 = vmatpush.bf16.msra.mxu1 %v4227_v52  ;;  %2469 = vmatpush.bf16.msrb.mxu3 %v4227_v52 }
 0x285   : > { %v4350_v24 = vpack.c.bf16 %v2321_v22, %v2320_v0  ;;  %v3385_v0 = vld [vmem:[%s4523_s3 + $0x3c] sm:$0xf0] }
 0x286   : > { %v2240_v1 = vpop.f32.mrf.mxu0  ;;  %2385 = vmatmul.bf16.vlgmr.msra.gmra.mxu1 %v3213_v2  ;;  %2470 = vmatmul.bf16.vlgmr.msrb.gmra.mxu3 %v3237_v32  ;;  %v3245_v22 = vor.u32 %v3385_v0, %v3244_v8 }
 0x287   : > { %v2270_v58 = vadd.f32 %v2240_v1, %v2095_v27  ;;  %v1738_v35 = vpop.f32.mrf.mxu2  ;;  %v3241_v1 = vor.u32 %v3382_v5, %v3238_v43  ;;  %v3380_v27 = vld [vmem:[%s4523_s3 + $0x14] sm:$0xf] }
 0x288   : > { %v1764_v6 = vadd.f32 %v1738_v35, %v1534_v50  ;;  %v3286_v50 = vld [vmem:[%s4523_s3 + $0x80] sm:$0xf0] }
 0x289   : > { %v2298_v47 = vadd.f32 %v4219_v10, %v2270_v58 }
 0x28a   : > { %v2098_v59 = vadd.f32 %v2072_v28, %v1764_v6  ;;  %v3289_v6 = vor.u32 %v3390_v54, %v3286_v50 }
 0x28b   : > { %v2322_v18 = vmax.f32 %v2298_v47, 0.0 }
 0x28e   : > { %v2242_v31 = vpop.f32.mrf.mxu0 }
 0x28f   : > { %v2271_v17 = vadd.f32 %v2242_v31, %v2096_v44  ;;  %v3262_v44 = vld [vmem:[%s4523_s3 + $0x58] sm:$0xf0]  ;;  %v2443_v31 = vunpack.c.h.b16 %v3233_v20 }
 0x290   : > { %v3265_v38 = vor.u32 %v3386_v19, %v3262_v44 }
 0x291   : > { %v2299_v29 = vadd.f32 %v4219_v10, %v2271_v17  ;;  %v2449_v47 = vpack.c.b16 %v2443_v31, %v2443_v31  ;;  %v3270_v17 = vld [vmem:[%s4523_s3 + $0x68] sm:$0xf0] }
 0x293   : > { %v2323_v3 = vmax.f32 %v2299_v29, 0.0  ;;  %v3261_v29 = vor.u32 %v3387_v36, %v3260_v39 }
 0x295   : > { %v4365_v4 = vpack.c.bf16 %v2323_v3, %v2322_v18  ;;  %v3284_v3 = vld [vmem:[%s4523_s3 + $0x78] sm:$0xf] }
 0x296   : > { %v2245_v25 = vpop.f32.mrf.mxu0  ;;  %2390 = vmatmul.bf16.gmra.mxu1 %v3221_v13  ;;  %2475 = vmatmul.bf16.gmra.mxu3 %v3245_v22  ;;  %v3285_v11 = vor.u32 %v3391_v30, %v3284_v3 }
 0x297   : > { %v2272_v15 = vadd.f32 %v2245_v25, %v2097_v53  ;;  %v3393_v25 = vld [vmem:[%s4523_s3 + $0x8c] sm:$0xf0]  ;;  %v3281_v53 = vld [vmem:[%s4523_s3 + $0x98] sm:$0x33] }
 0x298   : > { %v3293_v32 = vor.u32 %v3393_v25, %v3292_v21  ;;  %v2622_v28 = vunpack.c.l.b16 %v3281_v53  ;;  %v2623_v8 = vunpack.c.h.b16 %v3281_v53 }
 0x299   : > { %v2300_v41 = vadd.f32 %v4219_v10, %v2272_v15 }
 0x29a   : > { %v2628_v15 = vpack.c.b16 %v2622_v28, %v2622_v28 }
 0x29b   : > { %v2324_v46 = vmax.f32 %v2300_v41, 0.0  ;;  %v3294_v41 = vld [vmem:[%s4523_s3 + $0x90] sm:$0xf0] }
 0x29e   : > { %v2247_v60 = vpop.f32.mrf.mxu0 }
 0x29f   : > { %v2273_v45 = vadd.f32 %v2247_v60, %v2098_v59 }
 0x2a1   : > { %v2301_v62 = vadd.f32 %v4219_v10, %v2273_v45  ;;  %v3378_v10 = vld [vmem:[%s4523_s3 + $0x4] sm:$0xf]  ;;  %v3297_v45 = vor.u32 %v3392_v23, %v3294_v41 }
 0x2a2   : > { %v3217_v48 = vor.u32 %v3378_v10, %v3214_v14 }
 0x2a3   : > { %v2325_v12 = vmax.f32 %v2301_v62, 0.0 }
 0x2a5   : > { %v2337_v2 = vpack.c.bf16 %v2325_v12, %v2324_v46 }
 0x2a6   : > { %2395 = vmatmul.bf16.gmra.mxu1 %v2362_v42  ;;  %2480 = vmatmul.bf16.gmra.mxu3 %v2448_v55 }
 0x2a7   : > { %2404 = vmatpush.bf16.msra.mxu2 %v2337_v2  ;;  %2489 = vmatpush.bf16.msrb.mxu1 %v2337_v2 }
 0x2a8   : > { %2579 = vmatpush.bf16.msra.mxu3 %v2337_v2 }
 0x2ab   : > { %2405 = vmatpush.bf16.msra.mxu2 %v4365_v4  ;;  %2490 = vmatpush.bf16.msrb.mxu1 %v4365_v4 }
 0x2ac   : > { %2580 = vmatpush.bf16.msra.mxu3 %v4365_v4 }
 0x2af   : > { %2406 = vmatpush.bf16.msra.mxu2 %v4350_v24  ;;  %2491 = vmatpush.bf16.msrb.mxu1 %v4350_v24 }
 0x2b0   : > { %2581 = vmatpush.bf16.msra.mxu3 %v4350_v24 }
 0x2b3   : > { %2407 = vmatpush.bf16.msra.mxu2 %v4330_v34  ;;  %2492 = vmatpush.bf16.msrb.mxu1 %v4330_v34 }
 0x2b4   : > { %2582 = vmatpush.bf16.msra.mxu3 %v4330_v34 }
 0x2b6   : > { %3226 = vmatmul.msk.bf16.vlgmr.msra.gmra.mxu2 %vm2367_vm3, %v3217_v48  ;;  %3250 = vmatmul.msk.bf16.vlgmr.msrb.gmra.mxu1 %vm2367_vm3, %v3241_v1 }
 0x2b7   : > { %2552 = vmatpush.bf16.msrb.mxu2 %v4315_v61  ;;  %2642 = vmatpush.bf16.msra.mxu1 %v4315_v61  ;;  %v3222_v61 = vld [vmem:[%s4523_s3 + $0x18] sm:$0xf0] }
 0x2b8   : > { %3274 = vmatmul.msk.bf16.vlgmr.msra.gmra.mxu3 %vm2367_vm3, %v3265_v38 }
 0x2bb   : > { %2553 = vmatpush.bf16.msrb.mxu2 %v4305_v57  ;;  %2643 = vmatpush.bf16.msra.mxu1 %v4305_v57  ;;  %v3246_v57 = vld [vmem:[%s4523_s3 + $0x40] sm:$0xf0] }
 0x2bc   : > { %v3249_v58 = vor.u32 %v3384_v33, %v3246_v57 }
 0x2bf   : > { %2554 = vmatpush.bf16.msrb.mxu2 %v4293_v7  ;;  %2644 = vmatpush.bf16.msra.mxu1 %v4293_v7  ;;  %v3225_v7 = vor.u32 %v3380_v27, %v3222_v61 }
 0x2c3   : > { %2555 = vmatpush.bf16.msrb.mxu2 %v4281_v51  ;;  %2645 = vmatpush.bf16.msra.mxu1 %v4281_v51  ;;  %v2357_v51 = vunpack.c.h.b16 %v4374_v49 }
 0x2c6   : > { %3227 = vmatmul.msk.bf16.gmra.mxu2 %vm2367_vm3, %v3225_v7  ;;  %3251 = vmatmul.msk.bf16.gmra.mxu1 %vm2367_vm3, %v3249_v58 }
 0x2c7   : > { %2556 = vmatpush.bf16.msrb.mxu2 %v4270_v63  ;;  %2646 = vmatpush.bf16.msra.mxu1 %v4270_v63  ;;  %v2363_v63 = vpack.c.b16 %v2357_v51, %v2357_v51 }
 0x2cb   : > { %2557 = vmatpush.bf16.msrb.mxu2 %v4259_v26  ;;  %2647 = vmatpush.bf16.msra.mxu1 %v4259_v26  ;;  %v3388_v26 = vld [vmem:[%s4523_s3 + $0x64] sm:$0xf] }
 0x2cf   : > { %2558 = vmatpush.bf16.msrb.mxu2 %v4243_v16  ;;  %2648 = vmatpush.bf16.msra.mxu1 %v4243_v16  ;;  %v3273_v16 = vor.u32 %v3388_v26, %v3270_v17 }
 0x2d1   : > { %3275 = vmatmul.msk.bf16.gmra.mxu3 %vm2367_vm3, %v3273_v16 }
 0x2d3   : > { %2559 = vmatpush.bf16.msrb.mxu2 %v4227_v52  ;;  %2649 = vmatpush.bf16.msra.mxu1 %v4227_v52  ;;  %v3257_v52 = vld [vmem:[%s4523_s3 + $0x70] sm:$0x33] }
 0x2d4   : > { %v2533_v56 = vunpack.c.h.b16 %v3257_v52 }
 0x2d6   : > { %3228 = vmatmul.msk.bf16.gmra.mxu2 %vm2367_vm3, %v2363_v63  ;;  %3252 = vmatmul.msk.bf16.gmra.mxu1 %vm2367_vm3, %v2449_v47  ;;  %v2539_v13 = vpack.c.b16 %v2533_v56, %v2533_v56 }
 0x2d7   : > { %2669 = vmatpush.bf16.msra.mxu2 %v2337_v2  ;;  %v2629_v2 = vpack.c.b16 %v2623_v8, %v2623_v8 }
 0x2db   : > { %2670 = vmatpush.bf16.msra.mxu2 %v4365_v4  ;;  %v2532_v4 = vunpack.c.l.b16 %v3257_v52 }
 0x2dd   : > { %v2538_v37 = vpack.c.b16 %v2532_v4, %v2532_v4 }
 0x2df   : > { %2671 = vmatpush.bf16.msra.mxu2 %v4350_v24  ;;  %v3389_v24 = vld [vmem:[%s4523_s3 + $0x64] sm:$0xf0] }
 0x2e1   : > { %3276 = vmatmul.msk.bf16.gmra.mxu3 %vm2367_vm3, %v2539_v13 }
 0x2e3   : > { %2672 = vmatpush.bf16.msra.mxu2 %v4330_v34  ;;  %v3268_v34 = vld [vmem:[%s4523_s3 + $0x60] sm:$0xf] }
 0x2e4   : > { %v3269_v18 = vor.u32 %v3389_v24, %v3268_v34 }
 0x2e6   : > { %2560 = vmatmul.bf16.vlgmr.msrb.gmra.mxu2 %v3261_v29  ;;  %2650 = vmatmul.bf16.vlgmr.msra.gmra.mxu1 %v3285_v11 }
 0x2f6   : > { %2565 = vmatmul.bf16.gmra.mxu2 %v3269_v18  ;;  %2655 = vmatmul.bf16.gmra.mxu1 %v3293_v32 }
 0x303   : > { %v2386_v40 = vpop.f32.mrf.mxu1 }
 0x306   : > { %2570 = vmatmul.bf16.gmra.mxu2 %v2538_v37  ;;  %2660 = vmatmul.bf16.gmra.mxu1 %v2628_v15 }
 0x309   : > { %v2471_v60 = vpop.f32.mrf.mxu3 }
 0x30b   : > { %v2388_v35 = vpop.f32.mrf.mxu1 }
 0x311   : > { %v2473_v42 = vpop.f32.mrf.mxu3 }
 0x313   : > { %v2391_v49 = vpop.f32.mrf.mxu1 }
 0x316   : > { %3298 = vmatmul.msk.bf16.vlgmr.msra.gmra.mxu2 %vm2367_vm3, %v3289_v6 }
 0x319   : > { %v2476_v12 = vpop.f32.mrf.mxu3 }
 0x31b   : > { %v2393_v59 = vpop.f32.mrf.mxu1 }
 0x321   : > { %v2478_v10 = vpop.f32.mrf.mxu3 }
 0x323   : > { %v2396_v62 = vpop.f32.mrf.mxu1 }
 0x326   : > { %3299 = vmatmul.msk.bf16.gmra.mxu2 %vm2367_vm3, %v3297_v45 }
 0x329   : > { %v2481_v20 = vpop.f32.mrf.mxu3 }
 0x32b   : > { %v2398_v46 = vpop.f32.mrf.mxu1 }
 0x331   : > { %v2483_v57 = vpop.f32.mrf.mxu3 }
 0x333   : > { %v2494_v0 = vpop.f32.mrf.mxu1 }
 0x334   : > { %v2495_v22 = vadd.f32 %v2494_v0, %v2471_v60 }
 0x336   : > { %3300 = vmatmul.msk.bf16.gmra.mxu2 %vm2367_vm3, %v2629_v2  ;;  %v3439_v2 = vmov 0  }
 0x337   : > { %2706 = vst.msk [vmem:[%s197_s12 + $0x10] sm:$0xc] %vm2705_vm6, %v3439_v2 }
 0x338   : > { %2707 = vst.msk [vmem:[%s197_s12 + $0x14] sm:$0x3] %vm2703_vm5, %v3439_v2 }
 0x339   : > { %v2409_v14 = vpop.f32.mrf.mxu2 }
 0x33a   : > { %v2410_v5 = vadd.f32 %v2409_v14, %v2386_v40 }
 0x33b   : > { %v2496_v43 = vpop.f32.mrf.mxu1  ;;  %v2584_v51 = vpop.f32.mrf.mxu3 }
 0x33c   : > { %v2508_v48 = vmax.f32 %v2410_v5, %v2495_v22  ;;  %v2497_v1 = vadd.f32 %v2496_v43, %v2473_v42 }
 0x341   : > { %v2411_v9 = vpop.f32.mrf.mxu2 }
 0x342   : > { %v2412_v55 = vadd.f32 %v2411_v9, %v2388_v35 }
 0x343   : > { %v2499_v27 = vpop.f32.mrf.mxu1  ;;  %v2586_v16 = vpop.f32.mrf.mxu3 }
 0x344   : > { %v2509_v61 = vmax.f32 %v2412_v55, %v2497_v1  ;;  %v2500_v33 = vadd.f32 %v2499_v27, %v2476_v12 }
 0x349   : > { %v2414_v7 = vpop.f32.mrf.mxu2 }
 0x34a   : > { %v2415_v58 = vadd.f32 %v2414_v7, %v2391_v49 }
 0x34b   : > { %v2501_v19 = vpop.f32.mrf.mxu1 }
 0x34c   : > { %v2510_v44 = vmax.f32 %v2415_v58, %v2500_v33  ;;  %v2502_v38 = vadd.f32 %v2501_v19, %v2478_v10 }
 0x351   : > { %v2416_v31 = vpop.f32.mrf.mxu2 }
 0x352   : > { %v2417_v63 = vadd.f32 %v2416_v31, %v2393_v59 }
 0x353   : > { %v2504_v47 = vpop.f32.mrf.mxu1 }
 0x354   : > { %v2511_v26 = vmax.f32 %v2417_v63, %v2502_v38  ;;  %v2505_v17 = vadd.f32 %v2504_v47, %v2481_v20  ;;  %v2589_v29 = vpop.f32.mrf.mxu3 }
 0x359   : > { %v2419_v52 = vpop.f32.mrf.mxu2 }
 0x35a   : > { %v2420_v39 = vadd.f32 %v2419_v52, %v2396_v62 }
 0x35b   : > { %v2506_v36 = vpop.f32.mrf.mxu1 }
 0x35c   : > { %v2512_v56 = vmax.f32 %v2420_v39, %v2505_v17  ;;  %v2591_v34 = vpop.f32.mrf.mxu3 }
 0x361   : > { %v2421_v13 = vpop.f32.mrf.mxu2 }
 0x363   : > { %v2651_v4 = vpop.f32.mrf.mxu1 }
 0x364   : > { %v2594_v30 = vpop.f32.mrf.mxu3 }
 0x369   : > { %v2561_v24 = vpop.f32.mrf.mxu2 }
 0x36a   : > { %v2585_v18 = vadd.f32 %v2584_v51, %v2561_v24 }
 0x36b   : > { %v2653_v40 = vpop.f32.mrf.mxu1 }
 0x36c   : > { %v2598_v3 = vmax.f32 %v2508_v48, %v2585_v18  ;;  %v2596_v25 = vpop.f32.mrf.mxu3 }
 0x371   : > { %v2563_v11 = vpop.f32.mrf.mxu2 }
 0x372   : > { %v2587_v37 = vadd.f32 %v2586_v16, %v2563_v11 }
 0x373   : > { %v2656_v53 = vpop.f32.mrf.mxu1 }
 0x374   : > { %v2599_v21 = vmax.f32 %v2509_v61, %v2587_v37 }
 0x379   : > { %v2566_v32 = vpop.f32.mrf.mxu2 }
 0x37a   : > { %v2590_v35 = vadd.f32 %v2589_v29, %v2566_v32 }
 0x37b   : > { %v2658_v49 = vpop.f32.mrf.mxu1 }
 0x37c   : > { %v2600_v54 = vmax.f32 %v2510_v44, %v2590_v35 }
 0x381   : > { %v2568_v50 = vpop.f32.mrf.mxu2 }
 0x382   : > { %v2592_v28 = vadd.f32 %v2591_v34, %v2568_v50 }
 0x383   : > { %v2661_v41 = vpop.f32.mrf.mxu1 }
 0x384   : > { %v2601_v6 = vmax.f32 %v2511_v26, %v2592_v28 }
 0x389   : > { %v2571_v15 = vpop.f32.mrf.mxu2 }
 0x38a   : > { %v2595_v59 = vadd.f32 %v2594_v30, %v2571_v15 }
 0x38b   : > { %v2663_v42 = vpop.f32.mrf.mxu1 }
 0x38c   : > { %v2602_v60 = vmax.f32 %v2512_v56, %v2595_v59 }
 0x391   : > { %v2573_v23 = vpop.f32.mrf.mxu2 }
 0x399   : > { %v2674_v45 = vpop.f32.mrf.mxu2 }
 0x39a   : > { %v2675_v62 = vadd.f32 %v2674_v45, %v2651_v4 }
 0x39c   : > { %v2688_v46 = vmax.f32 %v2598_v3, %v2675_v62 }
 0x39e   : > { %v2693_v12 = vpack.c.bf16 %v2688_v46, %v2688_v46 }
 0x3a0   : > { %2699 = vst.msk [vmem:[%s197_s12] sm:$0xf] %vm2698_vm4, %v2693_v12 }
 0x3a1   : > { %v2676_v8 = vpop.f32.mrf.mxu2 }
 0x3a2   : > { %v2677_v0 = vadd.f32 %v2676_v8, %v2653_v40 }
 0x3a4   : > { %v2689_v22 = vmax.f32 %v2599_v21, %v2677_v0 }
 0x3a6   : > { %v2694_v10 = vpack.c.bf16 %v2689_v22, %v2689_v22 }
 0x3a8   : > { %2700 = vst.msk [vmem:[%s197_s12 + $0x4] sm:$0xf] %vm2698_vm4, %v2694_v10 }
 0x3a9   : > { %v2679_v14 = vpop.f32.mrf.mxu2 }
 0x3aa   : > { %v2680_v5 = vadd.f32 %v2679_v14, %v2656_v53 }
 0x3ac   : > { %v2690_v43 = vmax.f32 %v2600_v54, %v2680_v5 }
 0x3ae   : > { %v2695_v48 = vpack.c.bf16 %v2690_v43, %v2690_v43 }
 0x3b0   : > { %2701 = vst.msk [vmem:[%s197_s12 + $0x8] sm:$0xf] %vm2698_vm4, %v2695_v48 }
 0x3b1   : > { %v2681_v1 = vpop.f32.mrf.mxu2 }
 0x3b2   : > { %v2682_v20 = vadd.f32 %v2681_v1, %v2658_v49 }
 0x3b4   : > { %v2691_v9 = vmax.f32 %v2601_v6, %v2682_v20 }
 0x3b6   : > { %v2696_v55 = vpack.c.bf16 %v2691_v9, %v2691_v9 }
 0x3b8   : > { %2702 = vst.msk [vmem:[%s197_s12 + $0xc] sm:$0xf] %vm2698_vm4, %v2696_v55 }
 0x3b9   : > { %v2684_v27 = vpop.f32.mrf.mxu2 }
 0x3ba   : > { %v2685_v61 = vadd.f32 %v2684_v27, %v2661_v41 }
 0x3bc   : > { %v2692_v33 = vmax.f32 %v2602_v60, %v2685_v61 }
 0x3be   : > { %v2697_v57 = vpack.c.bf16 %v2692_v33, %v2692_v33 }
 0x3c0   : > { %2704 = vst.msk [vmem:[%s197_s12 + $0x10] sm:$0x3] %vm2703_vm5, %v2697_v57 }
 0x3c1   : > { %v2686_v7 = vpop.f32.mrf.mxu2 }
 0x3c2 PF: > { %s14_s15 = sadd.s32 1, %s3437_s15  }
 0x3c3   : > { %p11_p4 = scmp.ge.s32.totalorder %s14_s15, 4  }
 0x3c5   :  { %13 = sbr.rel (!%p11_p4) target bundleno = 1 (0x1), region = 77 }

</bundles_post_ra>
